<compile_context>
chip_gen: v7x
topology: tpu7x:2x2x1
jax: 0.10.0
libtpu: 0.0.40
codegen_flags: <defaults>
</compile_context>

<pallas_src>
import functools

import jax
import jax.numpy as jnp
import numpy as np
from jax.experimental import pallas as pl
from jax.experimental.pallas import tpu as pltpu


# ----------------------------------------------------------------------------
# Pallas kernels
# ----------------------------------------------------------------------------
def _stage1_kernel(x_ref, w_ref, b_ref, o_ref):
    """softplus(X @ W + b) for one (batch, L-tile) block.

    x_ref: (1, TL, CKp) bf16 im2col tile
    w_ref: (CKp, O)     bf16 weight (VMEM-resident, constant index_map)
    b_ref: (1, O)       f32 bias
    o_ref: (1, TL, O)   f32 output
    """
    y = jnp.dot(x_ref[0], w_ref[...], preferred_element_type=jnp.float32)
    y = y + b_ref[...]
    o_ref[0] = jnp.logaddexp(y, 0.0).astype(o_ref.dtype)       # stable softplus


def _stage2_kernel(a_ref, w_ref, b_ref, o_ref, acc_ref, *, tb, cin, l_out):
    """Fused K=601 'same' convolution as a tap-block reduction (no im2col).

    a_ref : (1, Lp, Cin) f32  zero-padded activation, resident across kk
    w_ref : (TB*Cin, O)  f32  weight rows for taps [kk*TB, (kk+1)*TB)
    b_ref : (1, O)       f32  summed bias of the three deconvs
    o_ref : (1, L, O)    f32  output (resident across the reduction axis)
    acc_ref: (L, O)      f32  accumulator scratch
    """
    kk = pl.program_id(1)

    @pl.when(kk == 0)
    def _():
        acc_ref[...] = jnp.zeros_like(acc_ref)

    base = kk * tb
    part = jnp.zeros(acc_ref.shape, jnp.float32)
    for j in range(tb):                                   # static unroll over taps
        a = a_ref[0, pl.ds(base + j, l_out), :]           # (L, Cin) shifted window
        w = w_ref[pl.ds(j * cin, cin), :]                 # (Cin, O) taps (static slice)
        part = part + jnp.dot(a, w, preferred_element_type=jnp.float32)
    acc_ref[...] += part

    @pl.when(kk == pl.num_programs(1) - 1)
    def _():
        out = acc_ref[...] + b_ref[...]
        o_ref[0] = jnp.logaddexp(out, 0.0).astype(o_ref.dtype)   # final softplus


# ----------------------------------------------------------------------------
# Wrappers
# ----------------------------------------------------------------------------
def _im2col_same(x_ncl, k):
    """x: (N, C, L) -> (N, L, C*K) patches for a 'same' conv (odd K)."""
    n, c, length = x_ncl.shape
    assert k % 2 == 1, "im2col assumes odd kernel size"
    pad = (k - 1) // 2
    xp = jnp.pad(x_ncl, ((0, 0), (0, 0), (pad, pad)))
    idx = jnp.arange(length)[:, None] + jnp.arange(k)[None, :]      # (L, K)
    patches = xp[:, :, idx]                                         # (N, C, L, K)
    patches = jnp.transpose(patches, (0, 2, 1, 3))                  # (N, L, C, K)
    return patches.reshape(n, length, c * k)


def _embed_taps(w_ock, k_big):
    """Zero-pad a (O, C, k) 'same' kernel to a centered (O, C, k_big) kernel."""
    o, c, k = w_ock.shape
    off = (k_big - k) // 2
    return jnp.zeros((o, c, k_big), w_ock.dtype).at[:, :, off:off + k].set(w_ock)


def stage1_fused(x_both_ncl, w_ock, b_o):
    """softplus('same' conv) for all stage-1 filters in a single pallas_call.

    x_both_ncl: (2N, 4, L), w_ock: (52, 4, 51), b_o: (52,) -> (2N, L, 52) f32
    """
    n2, c, length = x_both_ncl.shape
    o, c2, k = w_ock.shape
    assert c == c2
    ck = c * k
    ckp = ((ck + 127) // 128) * 128            # pad contraction to 128 only -> kc == 1
    tl = length if length <= 512 else 512      # L-tiling for longer sequences
    assert length % tl == 0

    cols = _im2col_same(x_both_ncl, k)                               # (2N, L, CK)
    cols = jnp.pad(cols, ((0, 0), (0, 0), (0, ckp - ck))).astype(jnp.bfloat16)
    wmat = jnp.pad(w_ock.reshape(o, ck).T,
                   ((0, ckp - ck), (0, 0))).astype(jnp.bfloat16)     # (CKp, O)
    bias = b_o.reshape(1, o).astype(jnp.float32)

    return pl.pallas_call(
        _stage1_kernel,
        out_shape=jax.ShapeDtypeStruct((n2, length, o), jnp.float32),
        grid_spec=pltpu.PrefetchScalarGridSpec(
            num_scalar_prefetch=0,
            grid=(n2, length // tl),
            in_specs=[
                pl.BlockSpec((1, tl, ckp), lambda i, j: (i, j, 0)),
                pl.BlockSpec((ckp, o), lambda i, j: (0, 0)),   # weight stays resident
                pl.BlockSpec((1, o), lambda i, j: (0, 0)),
            ],
            out_specs=pl.BlockSpec((1, tl, o), lambda i, j: (i, j, 0)),
        ),
        compiler_params=pltpu.CompilerParams(
            dimension_semantics=("parallel", "parallel"),
            vmem_limit_bytes=32 * 1024 * 1024,
        ),
    )(cols, wmat, bias)


def stage2_fused(a_nlc, w2, b2, *, k_taps, pad_left, tb=16):
    """softplus( sum_t A[:, l+t-pad, :] @ W_t + b ) — fused deconv stack.

    a_nlc: (N, L, C2) f32 activations (un-padded)
    w2   : (k_taps*C2, O) f32, rows ordered (tap, channel)
    b2   : (O,) summed bias
    """
    n, length, c2 = a_nlc.shape
    rows, o = w2.shape
    assert rows == k_taps * c2 and k_taps % tb == 0

    # Zero-pad along L so the kernel only needs forward-shifted slices.
    lp = ((length + k_taps - 1 + 7) // 8) * 8
    pad_right = lp - length - pad_left
    assert pad_right >= k_taps - 1 - pad_left
    a_pad = jnp.pad(a_nlc, ((0, 0), (pad_left, pad_right), (0, 0))).astype(jnp.float32)
    bias = b2.reshape(1, o).astype(jnp.float32)

    # TODO(synk): for very long (genomic) L the full padded activation no longer
    # fits VMEM; an L-tile axis with overlapping windows (manual DMA) is needed.
    kernel = functools.partial(_stage2_kernel, tb=tb, cin=c2, l_out=length)
    return pl.pallas_call(
        kernel,
        out_shape=jax.ShapeDtypeStruct((n, length, o), jnp.float32),
        grid_spec=pltpu.PrefetchScalarGridSpec(
            num_scalar_prefetch=0,
            grid=(n, k_taps // tb),
            in_specs=[
                pl.BlockSpec((1, lp, c2), lambda i, kk: (i, 0, 0)),   # resident act
                pl.BlockSpec((tb * c2, o), lambda i, kk: (kk, 0)),    # streamed taps
                pl.BlockSpec((1, o), lambda i, kk: (0, 0)),
            ],
            out_specs=pl.BlockSpec((1, length, o), lambda i, kk: (i, 0, 0)),
            scratch_shapes=[pltpu.VMEM((length, o), jnp.float32)],
        ),
        compiler_params=pltpu.CompilerParams(
            dimension_semantics=("parallel", "arbitrary"),
            vmem_limit_bytes=32 * 1024 * 1024,
        ),
    )(a_pad, w2, bias)


# ----------------------------------------------------------------------------
# Puffin forward (Pallas)
# ----------------------------------------------------------------------------
def puffin_forward(x, params):
    """x: (N, 4, L) f32 -> (N, 10, L) f32."""
    n, _, length = x.shape
    x_rc = x[:, ::-1, ::-1]                               # flip([1, 2])
    x_both = jnp.concatenate([x, x_rc], axis=0)           # strands -> batch (2N)

    # ---------------- stage 1: fused conv / conv_inr / conv_sim -------------
    k1 = 51
    w1 = jnp.concatenate(
        [params["conv_w"],                                # (10, 4, 51)
         _embed_taps(params["conv_inr_w"], k1),           # (10, 4, 51)
         _embed_taps(params["conv_sim_w"], k1)],          # (32, 4, 51)
        axis=0)                                           # (52, 4, 51)
    b1 = jnp.concatenate(
        [params["conv_b"], params["conv_inr_b"], params["conv_sim_b"]])

    y_both = stage1_fused(x_both, w1, b1)                 # (2N, L, 52), softplus'd
    fwd = y_both[:n]
    rev = y_both[n:, ::-1, :]                             # re-flip positions

    yact  = jnp.concatenate([fwd[..., 0:10],  rev[..., 0:10]],  axis=-1)   # (N,L,20)
    y_inr = jnp.concatenate([fwd[..., 10:20], rev[..., 10:20]], axis=-1)   # (N,L,20)
    y_sim = jnp.concatenate([fwd[..., 20:52], rev[..., 20:52]], axis=-1)   # (N,L,64)

    # ------------- stage 2: fused deconv + deconv_inr + deconv_sim ----------
    a_all = jnp.concatenate([yact, y_inr, y_sim], axis=-1)          # (N, L, 104)

    tb = 16
    kp = ((601 + tb - 1) // tb) * tb                                # 608 taps
    # ConvTranspose1d(20,10,15,pad=7) stride 1 == 'same' Conv1d with transposed,
    # tap-flipped weights; embed its 15 taps at the center of the K=601 frame.
    w_inr_eq = jnp.transpose(params["deconv_inr_w"], (1, 0, 2))[:, :, ::-1]  # (10,20,15)
    w_inr_601 = jnp.zeros((10, 20, 601), jnp.float32).at[:, :, 293:308].set(w_inr_eq)
    w_cat = jnp.concatenate(
        [params["deconv_w"], w_inr_601, params["deconv_sim_w"]], axis=1)     # (10,104,601)
    w_cat = jnp.pad(w_cat, ((0, 0), (0, 0), (0, kp - 601)))                  # (10,104,608)
    w2 = jnp.transpose(w_cat, (2, 1, 0)).reshape(kp * 104, 10)     # rows = (tap, chan)
    b2 = params["deconv_b"] + params["deconv_inr_b"] + params["deconv_sim_b"]

    y_pred = stage2_fused(a_all, w2, b2, k_taps=kp, pad_left=300, tb=tb)     # (N,L,10)
    return jnp.transpose(y_pred, (0, 2, 1))                                  # (N,10,L)


# ----------------------------------------------------------------------------
# Pure-JAX reference (correctness smoke check)
# ----------------------------------------------------------------------------
def _conv1d_ref(x, w, b, pad):
    out = jax.lax.conv_general_dilated(
        x, w, window_strides=(1,), padding=[(pad, pad)],
        dimension_numbers=("NCH", "OIH", "NCH"),
        precision=jax.lax.Precision.HIGHEST,
    )
    return out + b[None, :, None]


def puffin_forward_ref(x, params):
    sp = lambda v: jnp.logaddexp(v, 0.0)
    x_rc = x[:, ::-1, ::-1]

    def both(w, b, pad):
        f = _conv1d_ref(x, w, b, pad)
        r = _conv1d_ref(x_rc, w, b, pad)[:, :, ::-1]
        return jnp.concatenate([f, r], axis=1)

    yact = sp(both(params["conv_w"], params["conv_b"], 25))
    y_sim_act = sp(both(params["conv_sim_w"], params["conv_sim_b"], 1))
    y_inr_act = sp(both(params["conv_inr_w"], params["conv_inr_b"], 7))

    w_inr_eq = jnp.transpose(params["deconv_inr_w"], (1, 0, 2))[:, :, ::-1]
    d1 = _conv1d_ref(yact, params["deconv_w"], params["deconv_b"], 300)
    d2 = _conv1d_ref(y_inr_act, w_inr_eq, params["deconv_inr_b"], 7)
    d3 = _conv1d_ref(y_sim_act, params["deconv_sim_w"], params["deconv_sim_b"], 300)
    return sp(d1 + d2 + d3)


# ----------------------------------------------------------------------------
# Main
# ----------------------------------------------------------------------------
if __name__ == "__main__":
    key = jax.random.PRNGKey(0)
    ks = jax.random.split(key, 13)

    def rnd(k, shape, scale=0.05):
        return scale * jax.random.normal(k, shape, dtype=jnp.float32)

    # Deterministic synthetic parameters (shapes from Puffin.__init__).
    params = {
        "conv_w": rnd(ks[0], (10, 4, 51)),      "conv_b": rnd(ks[1], (10,)),
        "conv_inr_w": rnd(ks[2], (10, 4, 15)),  "conv_inr_b": rnd(ks[3], (10,)),
        "conv_sim_w": rnd(ks[4], (32, 4, 3)),   "conv_sim_b": rnd(ks[5], (32,)),
        "deconv_w": rnd(ks[6], (10, 20, 601), 0.02),     "deconv_b": rnd(ks[7], (10,)),
        "deconv_sim_w": rnd(ks[8], (10, 64, 601), 0.02), "deconv_sim_b": rnd(ks[9], (10,)),
        "deconv_inr_w": rnd(ks[10], (20, 10, 15)),       "deconv_inr_b": rnd(ks[11], (10,)),
        # scaler / scaler2 exist in __init__ but are unused in forward().
    }

    N, C, L = 2, 4, 128
    x = jax.random.normal(ks[12], (N, C, L), dtype=jnp.float32)

    fwd = jax.jit(puffin_forward)
    out = jax.block_until_ready(fwd(x, params))

    assert out.shape == (N, 10, L), out.shape
    ref = jax.block_until_ready(puffin_forward_ref(x, params))
    np.testing.assert_allclose(np.asarray(out), np.asarray(ref), rtol=5e-2, atol=5e-2)
    assert np.isfinite(np.asarray(out)).all()

    print("KERNEL_OK")
</pallas_src>

<mosaic_0001>
module attributes {stable_mosaic.version = 11 : i64} {
  func.func @_stage1_kernel(%arg0: i32, %arg1: i32, %arg2: memref<1x128x256xbf16, #tpu.memory_space<vmem>>, %arg3: memref<256x52xbf16, #tpu.memory_space<vmem>>, %arg4: memref<1x52xf32, #tpu.memory_space<vmem>>, %arg5: memref<1x128x52xf32, #tpu.memory_space<vmem>>) attributes {dimension_semantics = [#tpu.dimension_semantics<parallel>, #tpu.dimension_semantics<parallel>], iteration_bounds = array<i64: 4, 1>, scalar_prefetch = 0 : i64, scratch_operands = 0 : i64, tpu.core_type = #tpu.core_type<tc>, window_params = [{transform_indices = @transform_0, window_bounds = array<i64: 1, 128, 256>}, {pipeline_mode = #tpu.pipeline_mode<synchronous>, transform_indices = @transform_1, window_bounds = array<i64: 256, 52>}, {pipeline_mode = #tpu.pipeline_mode<synchronous>, transform_indices = @transform_2, window_bounds = array<i64: 1, 52>}, {transform_indices = @transform_3, window_bounds = array<i64: 1, 128, 52>}]} {
    %c0 = arith.constant 0 : index
    %c0_0 = arith.constant 0 : index
    %c0_1 = arith.constant 0 : index
    %0 = vector.load %arg2[%c0, %c0_0, %c0_1] : memref<1x128x256xbf16, #tpu.memory_space<vmem>>, vector<1x128x256xbf16>
    %1 = vector.shape_cast %0 : vector<1x128x256xbf16> to vector<128x256xbf16>
    %c0_2 = arith.constant 0 : index
    %c0_3 = arith.constant 0 : index
    %2 = vector.load %arg3[%c0_2, %c0_3] : memref<256x52xbf16, #tpu.memory_space<vmem>>, vector<256x52xbf16>
    %cst = arith.constant dense<0.000000e+00> : vector<128x52xf32>
    %3 = tpu.matmul %1, %2, %cst {dimension_numbers = #tpu.dot_dimension_numbers<[1], [0], [0], [1], [0, 0, 1, 1], [], []>} : vector<128x256xbf16>, vector<256x52xbf16>, vector<128x52xf32> -> vector<128x52xf32>
    %c0_4 = arith.constant 0 : index
    %c0_5 = arith.constant 0 : index
    %4 = vector.load %arg4[%c0_4, %c0_5] : memref<1x52xf32, #tpu.memory_space<vmem>>, vector<1x52xf32>
    %5 = vector.broadcast %4 : vector<1x52xf32> to vector<128x52xf32>
    %6 = arith.addf %3, %5 : vector<128x52xf32>
    %cst_6 = arith.constant 0.000000e+00 : f32
    %7 = vector.broadcast %cst_6 : f32 to vector<128x52xf32>
    %8 = arith.maximumf %6, %7 : vector<128x52xf32>
    %9 = vector.broadcast %cst_6 : f32 to vector<128x52xf32>
    %10 = arith.subf %6, %9 : vector<128x52xf32>
    %11 = arith.cmpf one, %10, %10 : vector<128x52xf32>
    %12 = vector.broadcast %cst_6 : f32 to vector<128x52xf32>
    %13 = arith.addf %6, %12 : vector<128x52xf32>
    %14 = math.absf %10 : vector<128x52xf32>
    %cst_7 = arith.constant 0.000000e+00 : f32
    %15 = vector.broadcast %cst_7 : f32 to vector<128x52xf32>
    %16 = arith.subf %15, %14 : vector<128x52xf32>
    %17 = math.exp %16 : vector<128x52xf32>
    %18 = math.log1p %17 : vector<128x52xf32>
    %19 = arith.addf %8, %18 : vector<128x52xf32>
    %20 = arith.select %11, %13, %19 : vector<128x52xi1>, vector<128x52xf32>
    %c0_8 = arith.constant 0 : index
    %c0_9 = arith.constant 0 : index
    %c0_10 = arith.constant 0 : index
    %21 = vector.load %arg5[%c0_8, %c0_9, %c0_10] : memref<1x128x52xf32, #tpu.memory_space<vmem>>, vector<1x128x52xf32>
    %22 = vector.shape_cast %21 : vector<1x128x52xf32> to vector<128x52xf32>
    %23 = vector.shape_cast %20 : vector<128x52xf32> to vector<1x128x52xf32>
    tpu.vector_store %arg5[%c0_8, %c0_9, %c0_10], %23 {strides = array<i32>} : memref<1x128x52xf32, #tpu.memory_space<vmem>>, vector<1x128x52xf32>,
    return
  }
  func.func @transform_0(%arg0: i32, %arg1: i32) -> (i32, i32, i32) {
    %c0_i32 = arith.constant 0 : i32
    %c0_i32_0 = arith.constant 0 : i32
    return %arg0, %arg1, %c0_i32 : i32, i32, i32
  }
  func.func @transform_1(%arg0: i32, %arg1: i32) -> (i32, i32) {
    %c0_i32 = arith.constant 0 : i32
    %c0_i32_0 = arith.constant 0 : i32
    %c0_i32_1 = arith.constant 0 : i32
    return %c0_i32, %c0_i32_0 : i32, i32
  }
  func.func @transform_2(%arg0: i32, %arg1: i32) -> (i32, i32) {
    %c0_i32 = arith.constant 0 : i32
    %c0_i32_0 = arith.constant 0 : i32
    %c0_i32_1 = arith.constant 0 : i32
    return %c0_i32, %c0_i32_0 : i32, i32
  }
  func.func @transform_3(%arg0: i32, %arg1: i32) -> (i32, i32, i32) {
    %c0_i32 = arith.constant 0 : i32
    %c0_i32_0 = arith.constant 0 : i32
    return %arg0, %arg1, %c0_i32 : i32, i32, i32
  }
}

module attributes {stable_mosaic.version = 11 : i64} {
  func.func @_stage2_kernel(%arg0: i32, %arg1: i32, %arg2: memref<1x736x104xf32, #tpu.memory_space<vmem>>, %arg3: memref<1664x10xf32, #tpu.memory_space<vmem>>, %arg4: memref<1x10xf32, #tpu.memory_space<vmem>>, %arg5: memref<1x128x10xf32, #tpu.memory_space<vmem>>, %arg6: memref<128x10xf32, #tpu.memory_space<vmem>>) attributes {dimension_semantics = [#tpu.dimension_semantics<parallel>, #tpu.dimension_semantics<arbitrary>], iteration_bounds = array<i64: 2, 38>, scalar_prefetch = 0 : i64, scratch_operands = 1 : i64, tpu.core_type = #tpu.core_type<tc>, window_params = [{transform_indices = @transform_0, window_bounds = array<i64: 1, 736, 104>}, {transform_indices = @transform_1, window_bounds = array<i64: 1664, 10>}, {pipeline_mode = #tpu.pipeline_mode<synchronous>, transform_indices = @transform_2, window_bounds = array<i64: 1, 10>}, {transform_indices = @transform_3, window_bounds = array<i64: 1, 128, 10>}]} {
    %c0_i32 = arith.constant 0 : i32
    %0 = arith.cmpi eq, %arg1, %c0_i32 : i32
    %1 = arith.extui %0 : i1 to i32
    %c0_i32_0 = arith.constant 0 : i32
    %2 = arith.cmpi ne, %1, %c0_i32_0 : i32
    scf.if %2 {
      %cst_71 = arith.constant 0.000000e+00 : f32
      %123 = vector.broadcast %cst_71 : f32 to vector<128x10xf32>
      %c0_72 = arith.constant 0 : index
      %c0_73 = arith.constant 0 : index
      %124 = vector.load %arg6[%c0_72, %c0_73] : memref<128x10xf32, #tpu.memory_space<vmem>>, vector<128x10xf32>
      tpu.vector_store %arg6[%c0_72, %c0_73], %123 {strides = array<i32>} : memref<128x10xf32, #tpu.memory_space<vmem>>, vector<128x10xf32>,
    } else {
    }
    %c16_i32 = arith.constant 16 : i32
    %3 = arith.muli %arg1, %c16_i32 : i32
    %cst = arith.constant 0.000000e+00 : f32
    %4 = vector.broadcast %cst : f32 to vector<128x10xf32>
    %c0_i32_1 = arith.constant 0 : i32
    %5 = arith.addi %3, %c0_i32_1 : i32
    %c0 = arith.constant 0 : index
    %6 = arith.index_cast %5 : i32 to index
    %c0_2 = arith.constant 0 : index
    %7 = vector.load %arg2[%c0, %6, %c0_2] : memref<1x736x104xf32, #tpu.memory_space<vmem>>, vector<1x128x104xf32>
    %8 = vector.shape_cast %7 : vector<1x128x104xf32> to vector<128x104xf32>
    %c0_3 = arith.constant 0 : index
    %c0_4 = arith.constant 0 : index
    %9 = vector.load %arg3[%c0_3, %c0_4] : memref<1664x10xf32, #tpu.memory_space<vmem>>, vector<104x10xf32>
    %cst_5 = arith.constant dense<0.000000e+00> : vector<128x10xf32>
    %10 = tpu.matmul %8, %9, %cst_5 {dimension_numbers = #tpu.dot_dimension_numbers<[1], [0], [0], [1], [0, 0, 1, 1], [], []>} : vector<128x104xf32>, vector<104x10xf32>, vector<128x10xf32> -> vector<128x10xf32>
    %11 = arith.addf %4, %10 : vector<128x10xf32>
    %c1_i32 = arith.constant 1 : i32
    %12 = arith.addi %3, %c1_i32 : i32
    %c0_6 = arith.constant 0 : index
    %13 = arith.index_cast %12 : i32 to index
    %c0_7 = arith.constant 0 : index
    %14 = vector.load %arg2[%c0_6, %13, %c0_7] : memref<1x736x104xf32, #tpu.memory_space<vmem>>, vector<1x128x104xf32>
    %15 = vector.shape_cast %14 : vector<1x128x104xf32> to vector<128x104xf32>
    %c104 = arith.constant 104 : index
    %c0_8 = arith.constant 0 : index
    %16 = vector.load %arg3[%c104, %c0_8] : memref<1664x10xf32, #tpu.memory_space<vmem>>, vector<104x10xf32>
    %cst_9 = arith.constant dense<0.000000e+00> : vector<128x10xf32>
    %17 = tpu.matmul %15, %16, %cst_9 {dimension_numbers = #tpu.dot_dimension_numbers<[1], [0], [0], [1], [0, 0, 1, 1], [], []>} : vector<128x104xf32>, vector<104x10xf32>, vector<128x10xf32> -> vector<128x10xf32>
    %18 = arith.addf %11, %17 : vector<128x10xf32>
    %c2_i32 = arith.constant 2 : i32
    %19 = arith.addi %3, %c2_i32 : i32
    %c0_10 = arith.constant 0 : index
    %20 = arith.index_cast %19 : i32 to index
    %c0_11 = arith.constant 0 : index
    %21 = vector.load %arg2[%c0_10, %20, %c0_11] : memref<1x736x104xf32, #tpu.memory_space<vmem>>, vector<1x128x104xf32>
    %22 = vector.shape_cast %21 : vector<1x128x104xf32> to vector<128x104xf32>
    %c208 = arith.constant 208 : index
    %c0_12 = arith.constant 0 : index
    %23 = vector.load %arg3[%c208, %c0_12] : memref<1664x10xf32, #tpu.memory_space<vmem>>, vector<104x10xf32>
    %cst_13 = arith.constant dense<0.000000e+00> : vector<128x10xf32>
    %24 = tpu.matmul %22, %23, %cst_13 {dimension_numbers = #tpu.dot_dimension_numbers<[1], [0], [0], [1], [0, 0, 1, 1], [], []>} : vector<128x104xf32>, vector<104x10xf32>, vector<128x10xf32> -> vector<128x10xf32>
    %25 = arith.addf %18, %24 : vector<128x10xf32>
    %c3_i32 = arith.constant 3 : i32
    %26 = arith.addi %3, %c3_i32 : i32
    %c0_14 = arith.constant 0 : index
    %27 = arith.index_cast %26 : i32 to index
    %c0_15 = arith.constant 0 : index
    %28 = vector.load %arg2[%c0_14, %27, %c0_15] : memref<1x736x104xf32, #tpu.memory_space<vmem>>, vector<1x128x104xf32>
    %29 = vector.shape_cast %28 : vector<1x128x104xf32> to vector<128x104xf32>
    %c312 = arith.constant 312 : index
    %c0_16 = arith.constant 0 : index
    %30 = vector.load %arg3[%c312, %c0_16] : memref<1664x10xf32, #tpu.memory_space<vmem>>, vector<104x10xf32>
    %cst_17 = arith.constant dense<0.000000e+00> : vector<128x10xf32>
    %31 = tpu.matmul %29, %30, %cst_17 {dimension_numbers = #tpu.dot_dimension_numbers<[1], [0], [0], [1], [0, 0, 1, 1], [], []>} : vector<128x104xf32>, vector<104x10xf32>, vector<128x10xf32> -> vector<128x10xf32>
    %32 = arith.addf %25, %31 : vector<128x10xf32>
    %c4_i32 = arith.constant 4 : i32
    %33 = arith.addi %3, %c4_i32 : i32
    %c0_18 = arith.constant 0 : index
    %34 = arith.index_cast %33 : i32 to index
    %c0_19 = arith.constant 0 : index
    %35 = vector.load %arg2[%c0_18, %34, %c0_19] : memref<1x736x104xf32, #tpu.memory_space<vmem>>, vector<1x128x104xf32>
    %36 = vector.shape_cast %35 : vector<1x128x104xf32> to vector<128x104xf32>
    %c416 = arith.constant 416 : index
    %c0_20 = arith.constant 0 : index
    %37 = vector.load %arg3[%c416, %c0_20] : memref<1664x10xf32, #tpu.memory_space<vmem>>, vector<104x10xf32>
    %cst_21 = arith.constant dense<0.000000e+00> : vector<128x10xf32>
    %38 = tpu.matmul %36, %37, %cst_21 {dimension_numbers = #tpu.dot_dimension_numbers<[1], [0], [0], [1], [0, 0, 1, 1], [], []>} : vector<128x104xf32>, vector<104x10xf32>, vector<128x10xf32> -> vector<128x10xf32>
    %39 = arith.addf %32, %38 : vector<128x10xf32>
    %c5_i32 = arith.constant 5 : i32
    %40 = arith.addi %3, %c5_i32 : i32
    %c0_22 = arith.constant 0 : index
    %41 = arith.index_cast %40 : i32 to index
    %c0_23 = arith.constant 0 : index
    %42 = vector.load %arg2[%c0_22, %41, %c0_23] : memref<1x736x104xf32, #tpu.memory_space<vmem>>, vector<1x128x104xf32>
    %43 = vector.shape_cast %42 : vector<1x128x104xf32> to vector<128x104xf32>
    %c520 = arith.constant 520 : index
    %c0_24 = arith.constant 0 : index
    %44 = vector.load %arg3[%c520, %c0_24] : memref<1664x10xf32, #tpu.memory_space<vmem>>, vector<104x10xf32>
    %cst_25 = arith.constant dense<0.000000e+00> : vector<128x10xf32>
    %45 = tpu.matmul %43, %44, %cst_25 {dimension_numbers = #tpu.dot_dimension_numbers<[1], [0], [0], [1], [0, 0, 1, 1], [], []>} : vector<128x104xf32>, vector<104x10xf32>, vector<128x10xf32> -> vector<128x10xf32>
    %46 = arith.addf %39, %45 : vector<128x10xf32>
    %c6_i32 = arith.constant 6 : i32
    %47 = arith.addi %3, %c6_i32 : i32
    %c0_26 = arith.constant 0 : index
    %48 = arith.index_cast %47 : i32 to index
    %c0_27 = arith.constant 0 : index
    %49 = vector.load %arg2[%c0_26, %48, %c0_27] : memref<1x736x104xf32, #tpu.memory_space<vmem>>, vector<1x128x104xf32>
    %50 = vector.shape_cast %49 : vector<1x128x104xf32> to vector<128x104xf32>
    %c624 = arith.constant 624 : index
    %c0_28 = arith.constant 0 : index
    %51 = vector.load %arg3[%c624, %c0_28] : memref<1664x10xf32, #tpu.memory_space<vmem>>, vector<104x10xf32>
    %cst_29 = arith.constant dense<0.000000e+00> : vector<128x10xf32>
    %52 = tpu.matmul %50, %51, %cst_29 {dimension_numbers = #tpu.dot_dimension_numbers<[1], [0], [0], [1], [0, 0, 1, 1], [], []>} : vector<128x104xf32>, vector<104x10xf32>, vector<128x10xf32> -> vector<128x10xf32>
    %53 = arith.addf %46, %52 : vector<128x10xf32>
    %c7_i32 = arith.constant 7 : i32
    %54 = arith.addi %3, %c7_i32 : i32
    %c0_30 = arith.constant 0 : index
    %55 = arith.index_cast %54 : i32 to index
    %c0_31 = arith.constant 0 : index
    %56 = vector.load %arg2[%c0_30, %55, %c0_31] : memref<1x736x104xf32, #tpu.memory_space<vmem>>, vector<1x128x104xf32>
    %57 = vector.shape_cast %56 : vector<1x128x104xf32> to vector<128x104xf32>
    %c728 = arith.constant 728 : index
    %c0_32 = arith.constant 0 : index
    %58 = vector.load %arg3[%c728, %c0_32] : memref<1664x10xf32, #tpu.memory_space<vmem>>, vector<104x10xf32>
    %cst_33 = arith.constant dense<0.000000e+00> : vector<128x10xf32>
    %59 = tpu.matmul %57, %58, %cst_33 {dimension_numbers = #tpu.dot_dimension_numbers<[1], [0], [0], [1], [0, 0, 1, 1], [], []>} : vector<128x104xf32>, vector<104x10xf32>, vector<128x10xf32> -> vector<128x10xf32>
    %60 = arith.addf %53, %59 : vector<128x10xf32>
    %c8_i32 = arith.constant 8 : i32
    %61 = arith.addi %3, %c8_i32 : i32
    %c0_34 = arith.constant 0 : index
    %62 = arith.index_cast %61 : i32 to index
    %c0_35 = arith.constant 0 : index
    %63 = vector.load %arg2[%c0_34, %62, %c0_35] : memref<1x736x104xf32, #tpu.memory_space<vmem>>, vector<1x128x104xf32>
    %64 = vector.shape_cast %63 : vector<1x128x104xf32> to vector<128x104xf32>
    %c832 = arith.constant 832 : index
    %c0_36 = arith.constant 0 : index
    %65 = vector.load %arg3[%c832, %c0_36] : memref<1664x10xf32, #tpu.memory_space<vmem>>, vector<104x10xf32>
    %cst_37 = arith.constant dense<0.000000e+00> : vector<128x10xf32>
    %66 = tpu.matmul %64, %65, %cst_37 {dimension_numbers = #tpu.dot_dimension_numbers<[1], [0], [0], [1], [0, 0, 1, 1], [], []>} : vector<128x104xf32>, vector<104x10xf32>, vector<128x10xf32> -> vector<128x10xf32>
    %67 = arith.addf %60, %66 : vector<128x10xf32>
    %c9_i32 = arith.constant 9 : i32
    %68 = arith.addi %3, %c9_i32 : i32
    %c0_38 = arith.constant 0 : index
    %69 = arith.index_cast %68 : i32 to index
    %c0_39 = arith.constant 0 : index
    %70 = vector.load %arg2[%c0_38, %69, %c0_39] : memref<1x736x104xf32, #tpu.memory_space<vmem>>, vector<1x128x104xf32>
    %71 = vector.shape_cast %70 : vector<1x128x104xf32> to vector<128x104xf32>
    %c936 = arith.constant 936 : index
    %c0_40 = arith.constant 0 : index
    %72 = vector.load %arg3[%c936, %c0_40] : memref<1664x10xf32, #tpu.memory_space<vmem>>, vector<104x10xf32>
    %cst_41 = arith.constant dense<0.000000e+00> : vector<128x10xf32>
    %73 = tpu.matmul %71, %72, %cst_41 {dimension_numbers = #tpu.dot_dimension_numbers<[1], [0], [0], [1], [0, 0, 1, 1], [], []>} : vector<128x104xf32>, vector<104x10xf32>, vector<128x10xf32> -> vector<128x10xf32>
    %74 = arith.addf %67, %73 : vector<128x10xf32>
    %c10_i32 = arith.constant 10 : i32
    %75 = arith.addi %3, %c10_i32 : i32
    %c0_42 = arith.constant 0 : index
    %76 = arith.index_cast %75 : i32 to index
    %c0_43 = arith.constant 0 : index
    %77 = vector.load %arg2[%c0_42, %76, %c0_43] : memref<1x736x104xf32, #tpu.memory_space<vmem>>, vector<1x128x104xf32>
    %78 = vector.shape_cast %77 : vector<1x128x104xf32> to vector<128x104xf32>
    %c1040 = arith.constant 1040 : index
    %c0_44 = arith.constant 0 : index
    %79 = vector.load %arg3[%c1040, %c0_44] : memref<1664x10xf32, #tpu.memory_space<vmem>>, vector<104x10xf32>
    %cst_45 = arith.constant dense<0.000000e+00> : vector<128x10xf32>
    %80 = tpu.matmul %78, %79, %cst_45 {dimension_numbers = #tpu.dot_dimension_numbers<[1], [0], [0], [1], [0, 0, 1, 1], [], []>} : vector<128x104xf32>, vector<104x10xf32>, vector<128x10xf32> -> vector<128x10xf32>
    %81 = arith.addf %74, %80 : vector<128x10xf32>
    %c11_i32 = arith.constant 11 : i32
    %82 = arith.addi %3, %c11_i32 : i32
    %c0_46 = arith.constant 0 : index
    %83 = arith.index_cast %82 : i32 to index
    %c0_47 = arith.constant 0 : index
    %84 = vector.load %arg2[%c0_46, %83, %c0_47] : memref<1x736x104xf32, #tpu.memory_space<vmem>>, vector<1x128x104xf32>
    %85 = vector.shape_cast %84 : vector<1x128x104xf32> to vector<128x104xf32>
    %c1144 = arith.constant 1144 : index
    %c0_48 = arith.constant 0 : index
    %86 = vector.load %arg3[%c1144, %c0_48] : memref<1664x10xf32, #tpu.memory_space<vmem>>, vector<104x10xf32>
    %cst_49 = arith.constant dense<0.000000e+00> : vector<128x10xf32>
    %87 = tpu.matmul %85, %86, %cst_49 {dimension_numbers = #tpu.dot_dimension_numbers<[1], [0], [0], [1], [0, 0, 1, 1], [], []>} : vector<128x104xf32>, vector<104x10xf32>, vector<128x10xf32> -> vector<128x10xf32>
    %88 = arith.addf %81, %87 : vector<128x10xf32>
    %c12_i32 = arith.constant 12 : i32
    %89 = arith.addi %3, %c12_i32 : i32
    %c0_50 = arith.constant 0 : index
    %90 = arith.index_cast %89 : i32 to index
    %c0_51 = arith.constant 0 : index
    %91 = vector.load %arg2[%c0_50, %90, %c0_51] : memref<1x736x104xf32, #tpu.memory_space<vmem>>, vector<1x128x104xf32>
    %92 = vector.shape_cast %91 : vector<1x128x104xf32> to vector<128x104xf32>
    %c1248 = arith.constant 1248 : index
    %c0_52 = arith.constant 0 : index
    %93 = vector.load %arg3[%c1248, %c0_52] : memref<1664x10xf32, #tpu.memory_space<vmem>>, vector<104x10xf32>
    %cst_53 = arith.constant dense<0.000000e+00> : vector<128x10xf32>
    %94 = tpu.matmul %92, %93, %cst_53 {dimension_numbers = #tpu.dot_dimension_numbers<[1], [0], [0], [1], [0, 0, 1, 1], [], []>} : vector<128x104xf32>, vector<104x10xf32>, vector<128x10xf32> -> vector<128x10xf32>
    %95 = arith.addf %88, %94 : vector<128x10xf32>
    %c13_i32 = arith.constant 13 : i32
    %96 = arith.addi %3, %c13_i32 : i32
    %c0_54 = arith.constant 0 : index
    %97 = arith.index_cast %96 : i32 to index
    %c0_55 = arith.constant 0 : index
    %98 = vector.load %arg2[%c0_54, %97, %c0_55] : memref<1x736x104xf32, #tpu.memory_space<vmem>>, vector<1x128x104xf32>
    %99 = vector.shape_cast %98 : vector<1x128x104xf32> to vector<128x104xf32>
    %c1352 = arith.constant 1352 : index
    %c0_56 = arith.constant 0 : index
    %100 = vector.load %arg3[%c1352, %c0_56] : memref<1664x10xf32, #tpu.memory_space<vmem>>, vector<104x10xf32>
    %cst_57 = arith.constant dense<0.000000e+00> : vector<128x10xf32>
    %101 = tpu.matmul %99, %100, %cst_57 {dimension_numbers = #tpu.dot_dimension_numbers<[1], [0], [0], [1], [0, 0, 1, 1], [], []>} : vector<128x104xf32>, vector<104x10xf32>, vector<128x10xf32> -> vector<128x10xf32>
    %102 = arith.addf %95, %101 : vector<128x10xf32>
    %c14_i32 = arith.constant 14 : i32
    %103 = arith.addi %3, %c14_i32 : i32
    %c0_58 = arith.constant 0 : index
    %104 = arith.index_cast %103 : i32 to index
    %c0_59 = arith.constant 0 : index
    %105 = vector.load %arg2[%c0_58, %104, %c0_59] : memref<1x736x104xf32, #tpu.memory_space<vmem>>, vector<1x128x104xf32>
    %106 = vector.shape_cast %105 : vector<1x128x104xf32> to vector<128x104xf32>
    %c1456 = arith.constant 1456 : index
    %c0_60 = arith.constant 0 : index
    %107 = vector.load %arg3[%c1456, %c0_60] : memref<1664x10xf32, #tpu.memory_space<vmem>>, vector<104x10xf32>
    %cst_61 = arith.constant dense<0.000000e+00> : vector<128x10xf32>
    %108 = tpu.matmul %106, %107, %cst_61 {dimension_numbers = #tpu.dot_dimension_numbers<[1], [0], [0], [1], [0, 0, 1, 1], [], []>} : vector<128x104xf32>, vector<104x10xf32>, vector<128x10xf32> -> vector<128x10xf32>
    %109 = arith.addf %102, %108 : vector<128x10xf32>
    %c15_i32 = arith.constant 15 : i32
    %110 = arith.addi %3, %c15_i32 : i32
    %c0_62 = arith.constant 0 : index
    %111 = arith.index_cast %110 : i32 to index
    %c0_63 = arith.constant 0 : index
    %112 = vector.load %arg2[%c0_62, %111, %c0_63] : memref<1x736x104xf32, #tpu.memory_space<vmem>>, vector<1x128x104xf32>
    %113 = vector.shape_cast %112 : vector<1x128x104xf32> to vector<128x104xf32>
    %c1560 = arith.constant 1560 : index
    %c0_64 = arith.constant 0 : index
    %114 = vector.load %arg3[%c1560, %c0_64] : memref<1664x10xf32, #tpu.memory_space<vmem>>, vector<104x10xf32>
    %cst_65 = arith.constant dense<0.000000e+00> : vector<128x10xf32>
    %115 = tpu.matmul %113, %114, %cst_65 {dimension_numbers = #tpu.dot_dimension_numbers<[1], [0], [0], [1], [0, 0, 1, 1], [], []>} : vector<128x104xf32>, vector<104x10xf32>, vector<128x10xf32> -> vector<128x10xf32>
    %116 = arith.addf %109, %115 : vector<128x10xf32>
    %c0_66 = arith.constant 0 : index
    %c0_67 = arith.constant 0 : index
    %117 = vector.load %arg6[%c0_66, %c0_67] : memref<128x10xf32, #tpu.memory_space<vmem>>, vector<128x10xf32>
    %118 = arith.addf %117, %116 : vector<128x10xf32>
    %c0_68 = arith.constant 0 : index
    %c0_69 = arith.constant 0 : index
    %119 = vector.load %arg6[%c0_68, %c0_69] : memref<128x10xf32, #tpu.memory_space<vmem>>, vector<128x10xf32>
    tpu.vector_store %arg6[%c0_68, %c0_69], %118 {strides = array<i32>} : memref<128x10xf32, #tpu.memory_space<vmem>>, vector<128x10xf32>,
    %c37_i32 = arith.constant 37 : i32
    %120 = arith.cmpi eq, %arg1, %c37_i32 : i32
    %121 = arith.extui %120 : i1 to i32
    %c0_i32_70 = arith.constant 0 : i32
    %122 = arith.cmpi ne, %121, %c0_i32_70 : i32
    scf.if %122 {
      %c0_71 = arith.constant 0 : index
      %c0_72 = arith.constant 0 : index
      %123 = vector.load %arg6[%c0_71, %c0_72] : memref<128x10xf32, #tpu.memory_space<vmem>>, vector<128x10xf32>
      %c0_73 = arith.constant 0 : index
      %c0_74 = arith.constant 0 : index
      %124 = vector.load %arg4[%c0_73, %c0_74] : memref<1x10xf32, #tpu.memory_space<vmem>>, vector<1x10xf32>
      %125 = vector.broadcast %124 : vector<1x10xf32> to vector<128x10xf32>
      %126 = arith.addf %123, %125 : vector<128x10xf32>
      %cst_75 = arith.constant 0.000000e+00 : f32
      %127 = vector.broadcast %cst_75 : f32 to vector<128x10xf32>
      %128 = arith.maximumf %126, %127 : vector<128x10xf32>
      %129 = vector.broadcast %cst_75 : f32 to vector<128x10xf32>
      %130 = arith.subf %126, %129 : vector<128x10xf32>
      %131 = arith.cmpf one, %130, %130 : vector<128x10xf32>
      %132 = vector.broadcast %cst_75 : f32 to vector<128x10xf32>
      %133 = arith.addf %126, %132 : vector<128x10xf32>
      %134 = math.absf %130 : vector<128x10xf32>
      %cst_76 = arith.constant 0.000000e+00 : f32
      %135 = vector.broadcast %cst_76 : f32 to vector<128x10xf32>
      %136 = arith.subf %135, %134 : vector<128x10xf32>
      %137 = math.exp %136 : vector<128x10xf32>
      %138 = math.log1p %137 : vector<128x10xf32>
      %139 = arith.addf %128, %138 : vector<128x10xf32>
      %140 = arith.select %131, %133, %139 : vector<128x10xi1>, vector<128x10xf32>
      %c0_77 = arith.constant 0 : index
      %c0_78 = arith.constant 0 : index
      %c0_79 = arith.constant 0 : index
      %141 = vector.load %arg5[%c0_77, %c0_78, %c0_79] : memref<1x128x10xf32, #tpu.memory_space<vmem>>, vector<1x128x10xf32>
      %142 = vector.shape_cast %141 : vector<1x128x10xf32> to vector<128x10xf32>
      %143 = vector.shape_cast %140 : vector<128x10xf32> to vector<1x128x10xf32>
      tpu.vector_store %arg5[%c0_77, %c0_78, %c0_79], %143 {strides = array<i32>} : memref<1x128x10xf32, #tpu.memory_space<vmem>>, vector<1x128x10xf32>,
    } else {
    }
    return
  }
  func.func @transform_0(%arg0: i32, %arg1: i32) -> (i32, i32, i32) {
    %c0_i32 = arith.constant 0 : i32
    %c0_i32_0 = arith.constant 0 : i32
    %c0_i32_1 = arith.constant 0 : i32
    return %arg0, %c0_i32, %c0_i32_0 : i32, i32, i32
  }
  func.func @transform_1(%arg0: i32, %arg1: i32) -> (i32, i32) {
    %c0_i32 = arith.constant 0 : i32
    %c0_i32_0 = arith.constant 0 : i32
    return %arg1, %c0_i32 : i32, i32
  }
  func.func @transform_2(%arg0: i32, %arg1: i32) -> (i32, i32) {
    %c0_i32 = arith.constant 0 : i32
    %c0_i32_0 = arith.constant 0 : i32
    %c0_i32_1 = arith.constant 0 : i32
    return %c0_i32, %c0_i32_0 : i32, i32
  }
  func.func @transform_3(%arg0: i32, %arg1: i32) -> (i32, i32, i32) {
    %c0_i32 = arith.constant 0 : i32
    %c0_i32_0 = arith.constant 0 : i32
    %c0_i32_1 = arith.constant 0 : i32
    return %arg0, %c0_i32, %c0_i32_0 : i32, i32, i32
  }
}

</mosaic_0001>

<bundles_post_ra>
// kernel: reverse
= control target key start
LH: loop header
LB: loop body
LE: loop exit
PB: predicated region body
PF: predicated region fallthrough
CT: control target
= control target key end

     0   :  { %s524_s6 = smov 0   ;;  %s526_s7 = smov 0   ;;  %s602_s0 = inlined_call_operand.vmem [shape: f32[2,128,10], index: 0, kind: input, shape index: {}]   ;;  %s603_s1 = inlined_call_operand.vmem [shape: f32[2,128,10], index: 1, kind: output, shape index: {}]  }
   0x1   :  { %s528_s8 = smov 0  }
   0x2 LB: > { %s419_s9 = sadd.s32 4294967295, %s512_s8   ;;  %s26_s10 = sadd.s32 1, %s508_s7  ;;  %s512_s8 = sphi %s528_s8, %s7_s8   ;;  %s508_s7 = sphi %s526_s7, %s605_s7   ;;  %s504_s6 = sphi %s524_s6, %s604_s6  }
   0x3   : > { %p28_p0 = scmp.ge.s32.totalorder %s26_s10, 2  ;;  %p421_p1 = scmp.ge.s32.totalorder %s512_s8, 2 }
   0x4   : > { %s42_s11 = sand.u32 (!%p421_p1), 1, %s512_s8   ;;  %s464_s12 = sshll.u32 (!%p421_p1), %s508_s7, 7 }
   0x5   : > { %s607_s10 = smov (%p28_p0, %s26_s10), 0  ;;  %40 = sbr.rel (%p421_p1) target bundleno = 16 (0x10), region = 16 }
   0x6   : > { %s422_s13 = sshll.u32 (!%p421_p1), %s42_s11, 7  ;;  %s549_s16 = scalar_lea.vmem (!%p421_p1), %s602_s0, %s464_s12 }
   0x7   : > { %v109_v0 = vld [vmem:[%s549_s16] sm:$0xff] (!%p421_p1)  ;;  %v111_v1 = vld [vmem:[%s549_s16 + $0x8] sm:$0xff] (!%p421_p1)  ;;  %v113_v2 = vld [vmem:[%s549_s16 + $0x10] sm:$0xff] (!%p421_p1)  ;;  %s44_s17 = scalar_lea.vmem (!%p421_p1), [#allocation0], %s422_s13 }
   0x8   : > { %110 = vst [vmem:[%s44_s17] sm:$0xff] (!%p421_p1), %v109_v0  ;;  %112 = vst [vmem:[%s44_s17 + $0x8] sm:$0xff] (!%p421_p1), %v111_v1  ;;  %v115_v3 = vld [vmem:[%s549_s16 + $0x18] sm:$0xff] (!%p421_p1)  ;;  %v117_v4 = vld [vmem:[%s549_s16 + $0x20] sm:$0xff] (!%p421_p1) }
   0x9   : > { %114 = vst [vmem:[%s44_s17 + $0x10] sm:$0xff] (!%p421_p1), %v113_v2  ;;  %v119_v5 = vld [vmem:[%s549_s16 + $0x28] sm:$0xff] (!%p421_p1)  ;;  %116 = vst [vmem:[%s44_s17 + $0x18] sm:$0xff] (!%p421_p1), %v115_v3  ;;  %v121_v6 = vld [vmem:[%s549_s16 + $0x30] sm:$0xff] (!%p421_p1) }
   0xa   : > { %118 = vst [vmem:[%s44_s17 + $0x20] sm:$0xff] (!%p421_p1), %v117_v4  ;;  %120 = vst [vmem:[%s44_s17 + $0x28] sm:$0xff] (!%p421_p1), %v119_v5  ;;  %v123_v7 = vld [vmem:[%s549_s16 + $0x38] sm:$0xff] (!%p421_p1)  ;;  %v125_v8 = vld [vmem:[%s549_s16 + $0x40] sm:$0xff] (!%p421_p1) }
   0xb   : > { %122 = vst [vmem:[%s44_s17 + $0x30] sm:$0xff] (!%p421_p1), %v121_v6  ;;  %124 = vst [vmem:[%s44_s17 + $0x38] sm:$0xff] (!%p421_p1), %v123_v7  ;;  %v127_v9 = vld [vmem:[%s549_s16 + $0x48] sm:$0xff] (!%p421_p1)  ;;  %v129_v10 = vld [vmem:[%s549_s16 + $0x50] sm:$0xff] (!%p421_p1) }
   0xc   : > { %126 = vst [vmem:[%s44_s17 + $0x40] sm:$0xff] %v125_v8  ;;  %v131_v11 = vld [vmem:[%s549_s16 + $0x58] sm:$0xff]  ;;  %128 = vst [vmem:[%s44_s17 + $0x48] sm:$0xff] %v127_v9  ;;  %v133_v12 = vld [vmem:[%s549_s16 + $0x60] sm:$0xff] }
   0xd   : > { %130 = vst [vmem:[%s44_s17 + $0x50] sm:$0xff] %v129_v10  ;;  %132 = vst [vmem:[%s44_s17 + $0x58] sm:$0xff] %v131_v11  ;;  %v135_v13 = vld [vmem:[%s549_s16 + $0x68] sm:$0xff]  ;;  %v137_v14 = vld [vmem:[%s549_s16 + $0x70] sm:$0xff] }
   0xe   : > { %134 = vst [vmem:[%s44_s17 + $0x60] sm:$0xff] %v133_v12  ;;  %136 = vst [vmem:[%s44_s17 + $0x68] sm:$0xff] %v135_v13  ;;  %v139_v15 = vld [vmem:[%s549_s16 + $0x78] sm:$0xff] }
   0xf   : > { %138 = vst [vmem:[%s44_s17 + $0x70] sm:$0xff] %v137_v14  ;;  %140 = vst [vmem:[%s44_s17 + $0x78] sm:$0xff] %v139_v15 }
  0x10 PF: > { %p425_p2 = scmp.ge.s32.totalorder %s512_s8, 1  ;;  %p145_p3 = scmp.lt.s32.totalorder %s512_s8, 3 }
  0x12   : > { %p146_p4 = pnand %p425_p2, %p145_p3 }
  0x13   : > { %s152_s18 = sand.u32 (!%p146_p4), 1, %s419_s9   ;;  %s465_s19 = sshll.u32 (!%p146_p4), %s504_s6, 7 }
  0x14   : > { %149 = sbr.rel (%p146_p4) target bundleno = 32 (0x20), region = 54  ;;  %s426_s20 = sshll.u32 (!%p146_p4), %s152_s18, 7 }
  0x15   : > { %s575_s23 = scalar_lea.vmem (!%p146_p4), %s603_s1, %s465_s19  ;;  %s154_s24 = scalar_lea.vmem (!%p146_p4), [#allocation0], %s426_s20 }
  0x16   : > { %v428_v16 = vld [vmem:[%s154_s24 + $0x7f] ss:$-1 sm:$0xff] (!%p146_p4)  ;;  %v429_v17 = vld [vmem:[%s154_s24 + $0x77] ss:$-1 sm:$0xff] (!%p146_p4)  ;;  %v431_v18 = vld [vmem:[%s154_s24 + $0x6f] ss:$-1 sm:$0xff] (!%p146_p4) }
  0x17   : > { %v433_v19 = vld [vmem:[%s154_s24 + $0x67] ss:$-1 sm:$0xff] (!%p146_p4)  ;;  %v435_v20 = vld [vmem:[%s154_s24 + $0x5f] ss:$-1 sm:$0xff] (!%p146_p4)  ;;  %v437_v21 = vld [vmem:[%s154_s24 + $0x57] ss:$-1 sm:$0xff] (!%p146_p4)  ;;  %312 = vst [vmem:[%s575_s23] sm:$0xff] (!%p146_p4), %v428_v16 }
  0x18   : > { %314 = vst [vmem:[%s575_s23 + $0x8] sm:$0xff] (!%p146_p4), %v429_v17  ;;  %316 = vst [vmem:[%s575_s23 + $0x10] sm:$0xff] (!%p146_p4), %v431_v18  ;;  %v439_v22 = vld [vmem:[%s154_s24 + $0x4f] ss:$-1 sm:$0xff] (!%p146_p4)  ;;  %v441_v23 = vld [vmem:[%s154_s24 + $0x47] ss:$-1 sm:$0xff] (!%p146_p4) }
  0x19   : > { %v443_v24 = vld [vmem:[%s154_s24 + $0x3f] ss:$-1 sm:$0xff] (!%p146_p4)  ;;  %318 = vst [vmem:[%s575_s23 + $0x18] sm:$0xff] (!%p146_p4), %v433_v19  ;;  %320 = vst [vmem:[%s575_s23 + $0x20] sm:$0xff] (!%p146_p4), %v435_v20  ;;  %v445_v25 = vld [vmem:[%s154_s24 + $0x37] ss:$-1 sm:$0xff] (!%p146_p4) }
  0x1a   : > { %322 = vst [vmem:[%s575_s23 + $0x28] sm:$0xff] (!%p146_p4), %v437_v21  ;;  %v447_v26 = vld [vmem:[%s154_s24 + $0x2f] ss:$-1 sm:$0xff] (!%p146_p4)  ;;  %v449_v27 = vld [vmem:[%s154_s24 + $0x27] ss:$-1 sm:$0xff] (!%p146_p4)  ;;  %324 = vst [vmem:[%s575_s23 + $0x30] sm:$0xff] (!%p146_p4), %v439_v22 }
  0x1b   : > { %326 = vst [vmem:[%s575_s23 + $0x38] sm:$0xff] %v441_v23  ;;  %328 = vst [vmem:[%s575_s23 + $0x40] sm:$0xff] %v443_v24  ;;  %v451_v28 = vld [vmem:[%s154_s24 + $0x1f] ss:$-1 sm:$0xff]  ;;  %v453_v29 = vld [vmem:[%s154_s24 + $0x17] ss:$-1 sm:$0xff] }
  0x1c   : > { %v455_v30 = vld [vmem:[%s154_s24 + $0xf] ss:$-1 sm:$0xff]  ;;  %330 = vst [vmem:[%s575_s23 + $0x48] sm:$0xff] %v445_v25  ;;  %332 = vst [vmem:[%s575_s23 + $0x50] sm:$0xff] %v447_v26  ;;  %v457_v31 = vld [vmem:[%s154_s24 + $0x7] ss:$-1 sm:$0xff] }
  0x1d   : > { %334 = vst [vmem:[%s575_s23 + $0x58] sm:$0xff] %v449_v27  ;;  %336 = vst [vmem:[%s575_s23 + $0x60] sm:$0xff] %v451_v28 }
  0x1e   : > { %338 = vst [vmem:[%s575_s23 + $0x68] sm:$0xff] %v453_v29  ;;  %340 = vst [vmem:[%s575_s23 + $0x70] sm:$0xff] %v455_v30 }
  0x1f   : > { %342 = vst [vmem:[%s575_s23 + $0x78] sm:$0xff] %v457_v31 }
  0x20 PF: > { %s7_s8 = sadd.s32 1, %s512_s8   ;;  %s604_s6 = smov %s508_s7 }
  0x21   : > { %p4_p5 = scmp.ge.s32.totalorder %s7_s8, 4   ;;  %s605_s7 = smov %s607_s10 }
  0x23   :  { %6 = sbr.rel (!%p4_p5) target bundleno = 2 (0x2), region = 164 }

// kernel: reverse.2
= control target key start
LH: loop header
LB: loop body
LE: loop exit
PB: predicated region body
PF: predicated region fallthrough
CT: control target
= control target key end

     0   :  { %s524_s6 = smov 0   ;;  %s526_s7 = smov 0   ;;  %s602_s0 = inlined_call_operand.vmem [shape: f32[2,128,32], index: 0, kind: input, shape index: {}]   ;;  %s603_s1 = inlined_call_operand.vmem [shape: f32[2,128,32], index: 1, kind: output, shape index: {}]  }
   0x1   :  { %s528_s8 = smov 0  }
   0x2 LB: > { %s419_s9 = sadd.s32 4294967295, %s512_s8   ;;  %s26_s10 = sadd.s32 1, %s508_s7  ;;  %s512_s8 = sphi %s528_s8, %s7_s8   ;;  %s508_s7 = sphi %s526_s7, %s605_s7   ;;  %s504_s6 = sphi %s524_s6, %s604_s6  }
   0x3   : > { %p28_p0 = scmp.ge.s32.totalorder %s26_s10, 2  ;;  %p421_p1 = scmp.ge.s32.totalorder %s512_s8, 2 }
   0x4   : > { %s42_s11 = sand.u32 (!%p421_p1), 1, %s512_s8   ;;  %s464_s12 = sshll.u32 (!%p421_p1), %s508_s7, 7 }
   0x5   : > { %s607_s10 = smov (%p28_p0, %s26_s10), 0  ;;  %40 = sbr.rel (%p421_p1) target bundleno = 16 (0x10), region = 16 }
   0x6   : > { %s422_s13 = sshll.u32 (!%p421_p1), %s42_s11, 7  ;;  %s549_s16 = scalar_lea.vmem (!%p421_p1), %s602_s0, %s464_s12 }
   0x7   : > { %v109_v0 = vld [vmem:[%s549_s16] sm:$0xff] (!%p421_p1)  ;;  %v111_v1 = vld [vmem:[%s549_s16 + $0x8] sm:$0xff] (!%p421_p1)  ;;  %v113_v2 = vld [vmem:[%s549_s16 + $0x10] sm:$0xff] (!%p421_p1)  ;;  %s44_s17 = scalar_lea.vmem (!%p421_p1), [#allocation0], %s422_s13 }
   0x8   : > { %110 = vst [vmem:[%s44_s17] sm:$0xff] (!%p421_p1), %v109_v0  ;;  %112 = vst [vmem:[%s44_s17 + $0x8] sm:$0xff] (!%p421_p1), %v111_v1  ;;  %v115_v3 = vld [vmem:[%s549_s16 + $0x18] sm:$0xff] (!%p421_p1)  ;;  %v117_v4 = vld [vmem:[%s549_s16 + $0x20] sm:$0xff] (!%p421_p1) }
   0x9   : > { %114 = vst [vmem:[%s44_s17 + $0x10] sm:$0xff] (!%p421_p1), %v113_v2  ;;  %v119_v5 = vld [vmem:[%s549_s16 + $0x28] sm:$0xff] (!%p421_p1)  ;;  %116 = vst [vmem:[%s44_s17 + $0x18] sm:$0xff] (!%p421_p1), %v115_v3  ;;  %v121_v6 = vld [vmem:[%s549_s16 + $0x30] sm:$0xff] (!%p421_p1) }
   0xa   : > { %118 = vst [vmem:[%s44_s17 + $0x20] sm:$0xff] (!%p421_p1), %v117_v4  ;;  %120 = vst [vmem:[%s44_s17 + $0x28] sm:$0xff] (!%p421_p1), %v119_v5  ;;  %v123_v7 = vld [vmem:[%s549_s16 + $0x38] sm:$0xff] (!%p421_p1)  ;;  %v125_v8 = vld [vmem:[%s549_s16 + $0x40] sm:$0xff] (!%p421_p1) }
   0xb   : > { %122 = vst [vmem:[%s44_s17 + $0x30] sm:$0xff] (!%p421_p1), %v121_v6  ;;  %124 = vst [vmem:[%s44_s17 + $0x38] sm:$0xff] (!%p421_p1), %v123_v7  ;;  %v127_v9 = vld [vmem:[%s549_s16 + $0x48] sm:$0xff] (!%p421_p1)  ;;  %v129_v10 = vld [vmem:[%s549_s16 + $0x50] sm:$0xff] (!%p421_p1) }
   0xc   : > { %126 = vst [vmem:[%s44_s17 + $0x40] sm:$0xff] %v125_v8  ;;  %v131_v11 = vld [vmem:[%s549_s16 + $0x58] sm:$0xff]  ;;  %128 = vst [vmem:[%s44_s17 + $0x48] sm:$0xff] %v127_v9  ;;  %v133_v12 = vld [vmem:[%s549_s16 + $0x60] sm:$0xff] }
   0xd   : > { %130 = vst [vmem:[%s44_s17 + $0x50] sm:$0xff] %v129_v10  ;;  %132 = vst [vmem:[%s44_s17 + $0x58] sm:$0xff] %v131_v11  ;;  %v135_v13 = vld [vmem:[%s549_s16 + $0x68] sm:$0xff]  ;;  %v137_v14 = vld [vmem:[%s549_s16 + $0x70] sm:$0xff] }
   0xe   : > { %134 = vst [vmem:[%s44_s17 + $0x60] sm:$0xff] %v133_v12  ;;  %136 = vst [vmem:[%s44_s17 + $0x68] sm:$0xff] %v135_v13  ;;  %v139_v15 = vld [vmem:[%s549_s16 + $0x78] sm:$0xff] }
   0xf   : > { %138 = vst [vmem:[%s44_s17 + $0x70] sm:$0xff] %v137_v14  ;;  %140 = vst [vmem:[%s44_s17 + $0x78] sm:$0xff] %v139_v15 }
  0x10 PF: > { %p425_p2 = scmp.ge.s32.totalorder %s512_s8, 1  ;;  %p145_p3 = scmp.lt.s32.totalorder %s512_s8, 3 }
  0x12   : > { %p146_p4 = pnand %p425_p2, %p145_p3 }
  0x13   : > { %s152_s18 = sand.u32 (!%p146_p4), 1, %s419_s9   ;;  %s465_s19 = sshll.u32 (!%p146_p4), %s504_s6, 7 }
  0x14   : > { %149 = sbr.rel (%p146_p4) target bundleno = 32 (0x20), region = 54  ;;  %s426_s20 = sshll.u32 (!%p146_p4), %s152_s18, 7 }
  0x15   : > { %s575_s23 = scalar_lea.vmem (!%p146_p4), %s603_s1, %s465_s19  ;;  %s154_s24 = scalar_lea.vmem (!%p146_p4), [#allocation0], %s426_s20 }
  0x16   : > { %v428_v16 = vld [vmem:[%s154_s24 + $0x7f] ss:$-1 sm:$0xff] (!%p146_p4)  ;;  %v429_v17 = vld [vmem:[%s154_s24 + $0x77] ss:$-1 sm:$0xff] (!%p146_p4)  ;;  %v431_v18 = vld [vmem:[%s154_s24 + $0x6f] ss:$-1 sm:$0xff] (!%p146_p4) }
  0x17   : > { %v433_v19 = vld [vmem:[%s154_s24 + $0x67] ss:$-1 sm:$0xff] (!%p146_p4)  ;;  %v435_v20 = vld [vmem:[%s154_s24 + $0x5f] ss:$-1 sm:$0xff] (!%p146_p4)  ;;  %v437_v21 = vld [vmem:[%s154_s24 + $0x57] ss:$-1 sm:$0xff] (!%p146_p4)  ;;  %312 = vst [vmem:[%s575_s23] sm:$0xff] (!%p146_p4), %v428_v16 }
  0x18   : > { %314 = vst [vmem:[%s575_s23 + $0x8] sm:$0xff] (!%p146_p4), %v429_v17  ;;  %316 = vst [vmem:[%s575_s23 + $0x10] sm:$0xff] (!%p146_p4), %v431_v18  ;;  %v439_v22 = vld [vmem:[%s154_s24 + $0x4f] ss:$-1 sm:$0xff] (!%p146_p4)  ;;  %v441_v23 = vld [vmem:[%s154_s24 + $0x47] ss:$-1 sm:$0xff] (!%p146_p4) }
  0x19   : > { %v443_v24 = vld [vmem:[%s154_s24 + $0x3f] ss:$-1 sm:$0xff] (!%p146_p4)  ;;  %318 = vst [vmem:[%s575_s23 + $0x18] sm:$0xff] (!%p146_p4), %v433_v19  ;;  %320 = vst [vmem:[%s575_s23 + $0x20] sm:$0xff] (!%p146_p4), %v435_v20  ;;  %v445_v25 = vld [vmem:[%s154_s24 + $0x37] ss:$-1 sm:$0xff] (!%p146_p4) }
  0x1a   : > { %322 = vst [vmem:[%s575_s23 + $0x28] sm:$0xff] (!%p146_p4), %v437_v21  ;;  %v447_v26 = vld [vmem:[%s154_s24 + $0x2f] ss:$-1 sm:$0xff] (!%p146_p4)  ;;  %v449_v27 = vld [vmem:[%s154_s24 + $0x27] ss:$-1 sm:$0xff] (!%p146_p4)  ;;  %324 = vst [vmem:[%s575_s23 + $0x30] sm:$0xff] (!%p146_p4), %v439_v22 }
  0x1b   : > { %326 = vst [vmem:[%s575_s23 + $0x38] sm:$0xff] %v441_v23  ;;  %328 = vst [vmem:[%s575_s23 + $0x40] sm:$0xff] %v443_v24  ;;  %v451_v28 = vld [vmem:[%s154_s24 + $0x1f] ss:$-1 sm:$0xff]  ;;  %v453_v29 = vld [vmem:[%s154_s24 + $0x17] ss:$-1 sm:$0xff] }
  0x1c   : > { %v455_v30 = vld [vmem:[%s154_s24 + $0xf] ss:$-1 sm:$0xff]  ;;  %330 = vst [vmem:[%s575_s23 + $0x48] sm:$0xff] %v445_v25  ;;  %332 = vst [vmem:[%s575_s23 + $0x50] sm:$0xff] %v447_v26  ;;  %v457_v31 = vld [vmem:[%s154_s24 + $0x7] ss:$-1 sm:$0xff] }
  0x1d   : > { %334 = vst [vmem:[%s575_s23 + $0x58] sm:$0xff] %v449_v27  ;;  %336 = vst [vmem:[%s575_s23 + $0x60] sm:$0xff] %v451_v28 }
  0x1e   : > { %338 = vst [vmem:[%s575_s23 + $0x68] sm:$0xff] %v453_v29  ;;  %340 = vst [vmem:[%s575_s23 + $0x70] sm:$0xff] %v455_v30 }
  0x1f   : > { %342 = vst [vmem:[%s575_s23 + $0x78] sm:$0xff] %v457_v31 }
  0x20 PF: > { %s7_s8 = sadd.s32 1, %s512_s8   ;;  %s604_s6 = smov %s508_s7 }
  0x21   : > { %p4_p5 = scmp.ge.s32.totalorder %s7_s8, 4   ;;  %s605_s7 = smov %s607_s10 }
  0x23   :  { %6 = sbr.rel (!%p4_p5) target bundleno = 2 (0x2), region = 164 }

// kernel: puffin_forward.2
= control target key start
LH: loop header
LB: loop body
LE: loop exit
PB: predicated region body
PF: predicated region fallthrough
CT: control target
= control target key end

     0   :  { %s1235_s12 = smov 0   ;;  %s1237_s13 = smov 0   ;;  %s1633_s0 = inlined_call_operand.vmem [shape: bf16[4,128,256], index: 0, kind: input, shape index: {}]   ;;  %s1634_s1 = inlined_call_operand.vmem [shape: bf16[256,52], index: 1, kind: input, shape index: {}]   ;;  %s1635_s2 = inlined_call_operand.vmem [shape: f32[1,52], index: 2, kind: input, shape index: {}]   ;;  %s1636_s3 = inlined_call_operand.vmem [shape: f32[4,128,52], index: 3, kind: output, shape index: {}]  }
   0x1   :  { %s1239_s14 = smov 0  }
   0x2 LB: > { %s25_s15 = sadd.s32 1, %s1209_s13  ;;  %p941_p0 = scmp.ge.s32.totalorder %s1213_s14, 1  ;;  %s1213_s14 = sphi %s1239_s14, %s13_s14   ;;  %s1209_s13 = sphi %s1237_s13, %s1650_s13   ;;  %s1205_s12 = sphi %s1235_s12, %s1649_s12  }
   0x3   : > { %p27_p1 = scmp.ge.s32.totalorder %s25_s15, 4  ;;  %p159_p2 = scmp.lt.s32.totalorder %s1213_s14, 5 }
   0x5   : > { %s1652_s15 = smov (%p27_p1, %s25_s15), 0  ;;  %p160_p3 = pnand %p941_p0, %p159_p2 }
   0x6   : > { %v1087_v0 = vld [vmem:[%s1634_s1 + $0x40] sm:$0xff] (!%p160_p3)   ;;  %v1089_v2 = vld [vmem:[%s1634_s1 + $0x48] sm:$0xff] (!%p160_p3)   ;;  %p193_p4 = scmp.lt.s32.totalorder (!%p160_p3), %s1205_s12, 3  ;;  %v1091_v4 = vld [vmem:[%s1634_s1 + $0x50] sm:$0xff] (!%p160_p3)   ;;  %vm830_vm1 = vcmask (!%p160_p3), 424960  }
   0x7   : > { %163 = sbr.rel (%p160_p3) target bundleno = 347 (0x15b), region = 32  ;;  %v1088_v1 = vld [vmem:[%s1634_s1] sm:$0xff] (!%p160_p3)   ;;  %983 = vmatprep.subr.bf16.mxu0 (!%p160_p3), %v1087_v0  ;;  %1047 = vmatprep.subr.bf16.mxu1 (!%p160_p3), %v1087_v0  ;;  %v1090_v3 = vld [vmem:[%s1634_s1 + $0x8] sm:$0xff] (!%p160_p3)   ;;  %v1092_v5 = vld [vmem:[%s1634_s1 + $0x10] sm:$0xff] (!%p160_p3)  }
   0x8   : > { %984 = vmatpush3.bf16.msra.mxu0 (!%p160_p3), %v1088_v1  ;;  %1055 = vmatpush3.bf16.msra.mxu1 (!%p160_p3), %v1088_v1  ;;  %v1093_v6 = vld [vmem:[%s1634_s1 + $0x58] sm:$0xff] (!%p160_p3)   ;;  %v1095_v8 = vld [vmem:[%s1634_s1 + $0x60] sm:$0xff] (!%p160_p3)   ;;  %v1097_v10 = vld [vmem:[%s1634_s1 + $0x68] sm:$0xff] (!%p160_p3)  }
   0x9   : > { %985 = vmatprep.subr.bf16.mxu0 (!%p160_p3), %v1089_v2  ;;  %1048 = vmatprep.subr.bf16.mxu1 (!%p160_p3), %v1089_v2  ;;  %v1094_v7 = vld [vmem:[%s1634_s1 + $0x18] sm:$0xff] (!%p160_p3)   ;;  %v1096_v9 = vld [vmem:[%s1634_s1 + $0x20] sm:$0xff] (!%p160_p3)   ;;  %v1098_v13 = vld [vmem:[%s1634_s1 + $0x28] sm:$0xff] (!%p160_p3)  }
   0xa   : > { %v1099_v14 = vld [vmem:[%s1634_s1 + $0x70] sm:$0xff] (!%p160_p3)   ;;  %v1101_v16 = vld [vmem:[%s1634_s1 + $0x78] sm:$0xff] (!%p160_p3)   ;;  %v1330_v34 = vld [vmem:[%s1635_s2] ss:$0 sm:$0xff] (!%p160_p3) }
   0xb   : > { %v1100_v15 = vld [vmem:[%s1634_s1 + $0x30] sm:$0xff] (!%p160_p3)   ;;  %v1102_v17 = vld [vmem:[%s1634_s1 + $0x38] sm:$0xff] (!%p160_p3)  }
   0xc   : > { %986 = vmatpush3.bf16.msra.mxu0 (!%p160_p3), %v1090_v3  ;;  %1056 = vmatpush3.bf16.msra.mxu1 (!%p160_p3), %v1090_v3 }
   0xd   : > { %987 = vmatprep.subr.bf16.mxu0 (!%p160_p3), %v1091_v4  ;;  %1049 = vmatprep.subr.bf16.mxu1 (!%p160_p3), %v1091_v4 }
   0xe   : > { %s1654_s12 = smov (!%p193_p4, %s1205_s12), 3 }
   0xf   : > { %s981_s5 = sshll.u32 %s1654_s12, 7 }
  0x10   : > { %988 = vmatpush3.bf16.msra.mxu0 %v1092_v5  ;;  %1057 = vmatpush3.bf16.msra.mxu1 %v1092_v5  ;;  %s1288_s10 = scalar_lea.vmem %s1633_s0, %s981_s5  ;;  %s1454_s7 = scalar_lea.vmem %s1636_s3, %s981_s5 }
  0x11   : > { %989 = vmatprep.subr.bf16.mxu0 %v1093_v6  ;;  %1050 = vmatprep.subr.bf16.mxu1 %v1093_v6  ;;  %v1105_v11 = vld [vmem:[%s1288_s10 + $0x4] ss:$8 sps:$4 sm:$0xff]   ;;  %v1103_v18 = vld [vmem:[%s1288_s10] ss:$8 sps:$4 sm:$0xff]   ;;  %v1109_v20 = vld [vmem:[%s1288_s10 + $0x14] ss:$8 sps:$4 sm:$0xff]  }
  0x12   : > { %v1108_v12 = vld [vmem:[%s1288_s10 + $0x44] ss:$8 sps:$4 sm:$0xff]   ;;  %477 = vmatprep.mubr.bf16.mxu0 %v1105_v11  ;;  %v1106_v19 = vld [vmem:[%s1288_s10 + $0x40] ss:$8 sps:$4 sm:$0xff]   ;;  %v1111_v21 = vld [vmem:[%s1288_s10 + $0x54] ss:$8 sps:$4 sm:$0xff]  }
  0x13   : > { %509 = vmatprep.mubr.bf16.mxu1 %v1108_v12  ;;  %v1113_v22 = vld [vmem:[%s1288_s10 + $0x10] ss:$8 sps:$4 sm:$0xff]   ;;  %v1115_v24 = vld [vmem:[%s1288_s10 + $0x24] ss:$8 sps:$4 sm:$0xff]   ;;  %v1119_v26 = vld [vmem:[%s1288_s10 + $0x20] ss:$8 sps:$4 sm:$0xff]  }
  0x14   : > { %990 = vmatpush3.bf16.msra.mxu0 %v1094_v7  ;;  %1058 = vmatpush3.bf16.msra.mxu1 %v1094_v7  ;;  %v1114_v23 = vld [vmem:[%s1288_s10 + $0x50] ss:$8 sps:$4 sm:$0xff]   ;;  %v1117_v25 = vld [vmem:[%s1288_s10 + $0x64] ss:$8 sps:$4 sm:$0xff]   ;;  %v1120_v27 = vld [vmem:[%s1288_s10 + $0x60] ss:$8 sps:$4 sm:$0xff]  }
  0x15   : > { %991 = vmatprep.subr.bf16.mxu0 %v1095_v8  ;;  %1051 = vmatprep.subr.bf16.mxu1 %v1095_v8  ;;  %v1121_v28 = vld [vmem:[%s1288_s10 + $0x34] ss:$8 sps:$4 sm:$0xff]   ;;  %v1125_v30 = vld [vmem:[%s1288_s10 + $0x30] ss:$8 sps:$4 sm:$0xff]  }
  0x16   : > { %v1123_v29 = vld [vmem:[%s1288_s10 + $0x74] ss:$8 sps:$4 sm:$0xff]   ;;  %v1126_v31 = vld [vmem:[%s1288_s10 + $0x70] ss:$8 sps:$4 sm:$0xff]  }
  0x18   : > { %992 = vmatpush3.bf16.msra.mxu0 %v1096_v9  ;;  %1059 = vmatpush3.bf16.msra.mxu1 %v1096_v9 }
  0x19   : > { %993 = vmatprep.subr.bf16.mxu0 %v1097_v10  ;;  %1052 = vmatprep.subr.bf16.mxu1 %v1097_v10 }
  0x1c   : > { %994 = vmatpush3.bf16.msra.mxu0 %v1098_v13  ;;  %1060 = vmatpush3.bf16.msra.mxu1 %v1098_v13 }
  0x1d   : > { %995 = vmatprep.subr.bf16.mxu0 %v1099_v14  ;;  %1053 = vmatprep.subr.bf16.mxu1 %v1099_v14 }
  0x20   : > { %996 = vmatpush3.bf16.msra.mxu0 %v1100_v15  ;;  %1061 = vmatpush3.bf16.msra.mxu1 %v1100_v15 }
  0x21   : > { %997 = vmatprep.subr.bf16.mxu0 %v1101_v16  ;;  %1054 = vmatprep.subr.bf16.mxu1 %v1101_v16 }
  0x24   : > { %998 = vmatpush3.bf16.msra.mxu0 %v1102_v17  ;;  %1062 = vmatpush3.bf16.msra.mxu1 %v1102_v17 }
  0x27   : > { %478 = vmatmul.mubr.bf16.vlgmr.msra.gmra.mrb[0].mxu0 %v1103_v18  ;;  %510 = vmatmul.mubr.bf16.vlgmr.msra.gmra.mrb[0].mxu1 %v1106_v19 }
  0x28   : > { %485 = vmatprep.mubr.bf16.mxu0 %v1109_v20  ;;  %517 = vmatprep.mubr.bf16.mxu1 %v1111_v21 }
  0x2f   : > { %486 = vmatmul.mubr.bf16.gmra.mrb[4].mxu0 %v1113_v22  ;;  %518 = vmatmul.mubr.bf16.gmra.mrb[4].mxu1 %v1114_v23 }
  0x30   : > { %493 = vmatprep.mubr.bf16.mxu0 %v1115_v24  ;;  %525 = vmatprep.mubr.bf16.mxu1 %v1117_v25 }
  0x37   : > { %494 = vmatmul.mubr.bf16.gmra.mrb[8].mxu0 %v1119_v26  ;;  %526 = vmatmul.mubr.bf16.gmra.mrb[8].mxu1 %v1120_v27 }
  0x38   : > { %501 = vmatprep.mubr.bf16.mxu0 %v1121_v28  ;;  %533 = vmatprep.mubr.bf16.mxu1 %v1123_v29 }
  0x3f   : > { %502 = vmatmul.mubr.bf16.gmra.mrb[12].mxu0 %v1125_v30  ;;  %534 = vmatmul.mubr.bf16.gmra.mrb[12].mxu1 %v1126_v31 }
  0xfa   : > { %v999_v32 = vpop.f32.mrb[0].mxu0  ;;  %v1023_v33 = vpop.f32.mrb[0].mxu1 }
  0xfb   : > { %v1000_v35 = vpop.f32.mrb[1].mxu0  ;;  %v1024_v36 = vpop.f32.mrb[1].mxu1 }
  0xfc   : > { %v1001_v37 = vadd.f32 %v1000_v35, %v999_v32  ;;  %v1025_v38 = vadd.f32 %v1024_v36, %v1023_v33  ;;  %v1002_v39 = vpop.f32.mrb[2].mxu0  ;;  %v1026_v40 = vpop.f32.mrb[2].mxu1 }
  0xfd   : > { %v1003_v41 = vpop.f32.mrb[3].mxu0  ;;  %v1027_v42 = vpop.f32.mrb[3].mxu1 }
  0xfe   : > { %v1333_v43 = vadd.f32 %v1001_v37, %v1330_v34  ;;  %v1336_v44 = vadd.f32 %v1025_v38, %v1330_v34  ;;  %v1004_v45 = vadd.f32 %v1003_v41, %v1002_v39  ;;  %v1028_v46 = vadd.f32 %v1027_v42, %v1026_v40 }
 0x100   : > { %v590_v47 = vand.u32 2147483647, %v1333_v43  ;;  %v598_v48 = vand.u32 2147483647, %v1336_v44  ;;  %v1341_v49 = vadd.f32 %v1004_v45, %v1330_v34  ;;  %v1344_v50 = vadd.f32 %v1028_v46, %v1330_v34 }
 0x101   : > { %v542_v41 = vmax.f32 %v1333_v43, 0.0  ;;  %v550_v42 = vmax.f32 %v1336_v44, 0.0  ;;  %vm558_vm3 = vcmp.ne.f32.partialorder %v1333_v43, %v1333_v43  ;;  %vm566_vm4 = vcmp.ne.f32.partialorder %v1336_v44, %v1336_v44 }
 0x102   : > { %v606_v51 = vsub.f32 0.0, %v590_v47  ;;  %v1005_v52 = vpop.f32.mrb[4].mxu0  ;;  %v1029_v53 = vpop.f32.mrb[4].mxu1  ;;  %v614_v54 = vsub.f32 0.0, %v598_v48  ;;  %v591_v55 = vand.u32 2147483647, %v1341_v49  ;;  %vm559_vm5 = vcmp.ne.f32.partialorder %v1341_v49, %v1341_v49 }
 0x103   : > { %v1006_v56 = vpop.f32.mrb[5].mxu0  ;;  %v1030_v57 = vpop.f32.mrb[5].mxu1  ;;  %v599_v59 = vand.u32 2147483647, %v1344_v50  ;;  %vm567_vm8 = vcmp.ne.f32.partialorder %v1344_v50, %v1344_v50 }
 0x104   : > { %v622_v58 = vmul.f32 1.442695, %v606_v51  ;;  %v1008_v60 = vpop.f32.mrb[6].mxu0  ;;  %v638_v61 = vmul.f32 1.442695, %v614_v54  ;;  %v607_v62 = vsub.f32 0.0, %v591_v55  ;;  %v1007_v63 = vadd.f32 %v1006_v56, %v1005_v52 }
 0x105   : > { %v1031_v0 = vadd.f32 %v1030_v57, %v1029_v53  ;;  %v1032_v1 = vpop.f32.mrb[6].mxu1  ;;  %v1009_v2 = vpop.f32.mrb[7].mxu0  ;;  %v615_v3 = vsub.f32 0.0, %v599_v59  ;;  %v543_v51 = vmax.f32 %v1341_v49, 0.0  ;;  %v551_v52 = vmax.f32 %v1344_v50, 0.0 }
 0x106   : > { %1127 = vpow2.f32 %v622_v58  ;;  %v1010_v4 = vadd.f32 %v1009_v2, %v1008_v60  ;;  %v1033_v5 = vpop.f32.mrb[7].mxu1  ;;  %v624_v6 = vmul.f32 1.442695, %v607_v62  ;;  %v1349_v7 = vadd.f32 %v1007_v63, %v1330_v34 }
 0x107   : > { %1129 = vpow2.f32 %v638_v61  ;;  %v1352_v8 = vadd.f32 %v1031_v0, %v1330_v34  ;;  %v640_v9 = vmul.f32 1.442695, %v615_v3  ;;  %v1034_v11 = vadd.f32 %v1033_v5, %v1032_v1 }
 0x108   : > { %v1355_v10 = vadd.f32 %v1010_v4, %v1330_v34  ;;  %1131 = vpow2.f32 %v624_v6  ;;  %v592_v12 = vand.u32 2147483647, %v1349_v7  ;;  %vm560_vm10 = vcmp.ne.f32.partialorder %v1349_v7, %v1349_v7 }
 0x109   : > { %1133 = vpow2.f32 %v640_v9  ;;  %v600_v13 = vand.u32 2147483647, %v1352_v8  ;;  %v1361_v21 = vadd.f32 %v1034_v11, %v1330_v34  ;;  %v544_v9 = vmax.f32 %v1349_v7, 0.0 }
 0x10a   : > { %v1011_v14 = vpop.f32.mrb[8].mxu0  ;;  %v1035_v15 = vpop.f32.mrb[8].mxu1  ;;  %v608_v16 = vsub.f32 0.0, %v592_v12  ;;  %v593_v17 = vand.u32 2147483647, %v1355_v10  ;;  %v552_v11 = vmax.f32 %v1352_v8, 0.0  ;;  %vm568_vm13 = vcmp.ne.f32.partialorder %v1352_v8, %v1352_v8 }
 0x10b   : > { %v1012_v18 = vpop.f32.mrb[9].mxu0  ;;  %v1036_v19 = vpop.f32.mrb[9].mxu1  ;;  %v616_v20 = vsub.f32 0.0, %v600_v13  ;;  %v601_v31 = vand.u32 2147483647, %v1361_v21  ;;  %vm561_vm14 = vcmp.ne.f32.partialorder %v1355_v10, %v1355_v10 }
 0x10c   : > { %v1013_v22 = vadd.f32 %v1012_v18, %v1011_v14  ;;  %v1037_v23 = vadd.f32 %v1036_v19, %v1035_v15  ;;  %v1014_v24 = vpop.f32.mrb[10].mxu0  ;;  %v1038_v25 = vpop.f32.mrb[10].mxu1  ;;  %v626_v26 = vmul.f32 1.442695, %v608_v16  ;;  %v609_v27 = vsub.f32 0.0, %v593_v17 }
 0x10d   : > { %v1015_v28 = vpop.f32.mrb[11].mxu0  ;;  %v1039_v29 = vpop.f32.mrb[11].mxu1  ;;  %v642_v30 = vmul.f32 1.442695, %v616_v20  ;;  %v617_v35 = vsub.f32 0.0, %v601_v31  ;;  %v545_v14 = vmax.f32 %v1355_v10, 0.0 }
 0x10e   : > { %1135 = vpow2.f32 %v626_v26  ;;  %v628_v32 = vmul.f32 1.442695, %v609_v27  ;;  %v1364_v36 = vadd.f32 %v1015_v28, %v1014_v24  ;;  %v1366_v37 = vadd.f32 %v1039_v29, %v1038_v25 }
 0x10f   : > { %1137 = vpow2.f32 %v642_v30  ;;  %v644_v57 = vmul.f32 1.442695, %v617_v35  ;;  %v1380_v58 = vadd.f32 %v1013_v22, %v1330_v34  ;;  %v1398_v12 = vadd.f32 %v1037_v23, %v1330_v34 }
 0x110   : > { %v1128_v33 = vpop.eup %1127  ;;  %1139 = vpow2.f32 %v628_v32 }
 0x111   : > { %v1130_v38 = vpop.eup %1129  ;;  %v654_v39 = vadd.f32 1.0, %v1128_v33  ;;  %v657_v40 = vmul.f32 -0.5, %v1128_v33  ;;  %v660_v48 = vand.u32 2147483647, %v1128_v33  ;;  %v594_v15 = vand.u32 2147483647, %v1380_v58 }
 0x112   : > { %v726_v45 = vadd.f32 1.0, %v1130_v38  ;;  %v729_v46 = vmul.f32 -0.5, %v1130_v38  ;;  %v1370_v47 = vpop.eup %1131  ;;  %v1374_v53 = vpop.f32.mrb[12].mxu0  ;;  %v732_v62 = vand.u32 2147483647, %v1130_v38 }
 0x113   : > { %1141 = vlog2.f32 %v654_v39  ;;  %v1376_v54 = vpop.f32.mrb[12].mxu1  ;;  %v1134_v55 = vpop.eup %1133  ;;  %v663_v56 = vadd.f32 1.0, %v1370_v47  ;;  %v658_v61 = vadd.f32 1.0, %v657_v40  ;;  %v666_v3 = vmul.f32 -0.5, %v1370_v47 }
 0x114   : > { %1143 = vlog2.f32 %v726_v45  ;;  %v1382_v59 = vpop.f32.mrb[13].mxu0  ;;  %v1384_v60 = vpop.f32.mrb[13].mxu1  ;;  %v735_v63 = vadd.f32 1.0, %v1134_v55  ;;  %v730_v2 = vadd.f32 1.0, %v729_v46  ;;  %v738_v4 = vmul.f32 -0.5, %v1134_v55 }
 0x115   : > { %v1386_v0 = vpop.f32.mrb[14].mxu0  ;;  %v1388_v1 = vpop.f32.mrb[14].mxu1  ;;  %1145 = vlog2.f32 %v663_v56  ;;  %vm1400_vm0 = vcmp.lt.f32.partialorder %v660_v48, 0.0004427343  ;;  %v659_v17 = vmul.f32 %v1128_v33, %v658_v61  ;;  %vm1408_vm2 = vcmp.lt.f32.partialorder %v732_v62, 0.0004427343 }
 0x116   : > { %v1391_v5 = vpop.f32.mrb[15].mxu0  ;;  %v1393_v6 = vpop.f32.mrb[15].mxu1  ;;  %1147 = vlog2.f32 %v735_v63  ;;  %v669_v19 = vand.u32 2147483647, %v1370_v47  ;;  %v741_v20 = vand.u32 2147483647, %v1134_v55  ;;  %v731_v23 = vmul.f32 %v1130_v38, %v730_v2 }
 0x117   : > { %1149 = vpow2.f32 %v644_v57  ;;  %v667_v24 = vadd.f32 1.0, %v666_v3  ;;  %v739_v25 = vadd.f32 1.0, %v738_v4  ;;  %v610_v30 = vsub.f32 0.0, %v594_v15 }
 0x118   : > { %v1406_v16 = vpop.eup %1135  ;;  %v602_v31 = vand.u32 2147483647, %v1398_v12  ;;  %vm1430_vm6 = vcmp.lt.f32.partialorder %v669_v19, 0.0004427343  ;;  %vm1434_vm7 = vcmp.lt.f32.partialorder %v741_v20, 0.0004427343 }
 0x119   : > { %v1413_v22 = vpop.eup %1137  ;;  %v672_v26 = vadd.f32 1.0, %v1406_v16  ;;  %v675_v28 = vmul.f32 -0.5, %v1406_v16  ;;  %v678_v32 = vand.u32 2147483647, %v1406_v16  ;;  %v668_v56 = vmul.f32 %v1370_v47, %v667_v24 }
 0x11a   : > { %v1418_v27 = vpop.eup %1139  ;;  %v744_v29 = vadd.f32 1.0, %v1413_v22  ;;  %v747_v33 = vmul.f32 -0.5, %v1413_v22  ;;  %v750_v57 = vand.u32 2147483647, %v1413_v22  ;;  %v740_v62 = vmul.f32 %v1134_v55, %v739_v25 }
 0x11b   : > { %1151 = vlog2.f32 %v672_v26  ;;  %v681_v35 = vadd.f32 1.0, %v1418_v27  ;;  %v684_v45 = vmul.f32 -0.5, %v1418_v27  ;;  %v676_v63 = vadd.f32 1.0, %v675_v28 }
 0x11c   : > { %1153 = vlog2.f32 %v744_v29  ;;  %v630_v2 = vmul.f32 1.442695, %v610_v30  ;;  %vm1445_vm9 = vcmp.lt.f32.partialorder %v678_v32, 0.0004427343  ;;  %v748_v19 = vadd.f32 1.0, %v747_v33 }
 0x11d   : > { %v1142_v38 = vpop.eup %1141  ;;  %1155 = vlog2.f32 %v681_v35  ;;  %v618_v47 = vsub.f32 0.0, %v602_v31  ;;  %v685_v24 = vadd.f32 1.0, %v684_v45  ;;  %vm1487_vm11 = vcmp.lt.f32.partialorder %v750_v57, 0.0004427343 }
 0x11e   : > { %v1144_v46 = vpop.eup %1143  ;;  %v656_v48 = vmul.f32 0.6931472, %v1142_v38  ;;  %1157 = vpow2.f32 %v630_v2  ;;  %v677_v33 = vmul.f32 %v1406_v16, %v676_v63  ;;  %v749_v38 = vmul.f32 %v1413_v22, %v748_v19 }
 0x11f   : > { %v728_v61 = vmul.f32 0.6931472, %v1144_v46  ;;  %v1146_v3 = vpop.eup %1145  ;;  %v646_v29 = vmul.f32 1.442695, %v618_v47  ;;  %v686_v45 = vmul.f32 %v1418_v27, %v685_v24  ;;  %v1515_v22 = vadd.f32 %v1366_v37, %v1330_v34 }
 0x120   : > { %v662_v4 = vsel %vm1400_vm0, %v659_v17, %v656_v48  ;;  %v1148_v20 = vpop.eup %1147  ;;  %v665_v17 = vmul.f32 0.6931472, %v1146_v3  ;;  %v1043_v57 = vadd.f32 %v1384_v60, %v1376_v54  ;;  %v553_v24 = vmax.f32 %v1361_v21, 0.0 }
 0x121   : > { %v798_v55 = vadd.f32 %v662_v4, %v542_v41  ;;  %v734_v13 = vsel %vm1408_vm2, %v731_v23, %v728_v61  ;;  %v1460_v25 = vpop.eup %1149  ;;  %v737_v28 = vmul.f32 0.6931472, %v1148_v20  ;;  %v1475_v23 = vadd.f32 %v1364_v36, %v1330_v34 }
 0x122   : > { %v806_v26 = vadd.f32 %v734_v13, %v550_v42  ;;  %v671_v41 = vsel %vm1430_vm6, %v668_v56, %v665_v17  ;;  %v753_v18 = vadd.f32 1.0, %v1460_v25  ;;  %v756_v39 = vmul.f32 -0.5, %v1460_v25 }
 0x123   : > { %v814_v30 = vsel %vm558_vm3, %v1333_v43, %v798_v55  ;;  %v799_v42 = vadd.f32 %v671_v41, %v543_v51  ;;  %v743_v31 = vsel %vm1434_vm7, %v740_v62, %v737_v28  ;;  %v595_v46 = vand.u32 2147483647, %v1475_v23 }
 0x124   : > { %831 = vst.msk [vmem:[%s1454_s7] sm:$0xff] %vm830_vm1, %v814_v30  ;;  %v822_v43 = vsel %vm566_vm4, %v1336_v44, %v806_v26  ;;  %v807_v36 = vadd.f32 %v743_v31, %v551_v52  ;;  %v687_v44 = vand.u32 2147483647, %v1418_v27  ;;  %1159 = vlog2.f32 %v753_v18 }
 0x125   : > { %839 = vst.msk [vmem:[%s1454_s7 + $0x40] sm:$0xff] %vm830_vm1, %v822_v43  ;;  %v1152_v35 = vpop.eup %1151  ;;  %v815_v51 = vsel %vm559_vm5, %v1341_v49, %v799_v42  ;;  %1161 = vpow2.f32 %v646_v29  ;;  %v1019_v56 = vadd.f32 %v1382_v59, %v1374_v53  ;;  %v611_v61 = vsub.f32 0.0, %v595_v46 }
 0x126   : > { %v1154_v40 = vpop.eup %1153  ;;  %832 = vst.msk [vmem:[%s1454_s7 + $0x8] sm:$0xff] %vm830_vm1, %v815_v51  ;;  %v823_v52 = vsel %vm567_vm8, %v1344_v50, %v807_v36  ;;  %v674_v16 = vmul.f32 0.6931472, %v1152_v35  ;;  %v1022_v62 = vadd.f32 %v1391_v5, %v1386_v0  ;;  %vm688_vm12 = vcmp.lt.f32.partialorder %v687_v44, 0.0004427343 }
 0x127   : > { %v1156_v48 = vpop.eup %1155  ;;  %840 = vst.msk [vmem:[%s1454_s7 + $0x48] sm:$0xff] %vm830_vm1, %v823_v52  ;;  %v746_v49 = vmul.f32 0.6931472, %v1154_v40  ;;  %v757_v53 = vadd.f32 1.0, %v756_v39  ;;  %v632_v60 = vmul.f32 1.442695, %v611_v61  ;;  %v1557_v17 = vadd.f32 %v1043_v57, %v1330_v34 }
 0x128   : > { %v680_v50 = vsel %vm1445_vm9, %v677_v33, %v674_v16  ;;  %v683_v27 = vmul.f32 0.6931472, %v1156_v48  ;;  %v603_v2 = vand.u32 2147483647, %v1515_v22  ;;  %v1158_v3 = vpop.eup %1157  ;;  %v759_v4 = vand.u32 2147483647, %v1460_v25 }
 0x129   : > { %v800_v63 = vadd.f32 %v680_v50, %v544_v9  ;;  %v752_v37 = vsel %vm1487_vm11, %v749_v38, %v746_v49  ;;  %v1541_v9 = vadd.f32 %v1019_v56, %v1330_v34  ;;  %v690_v15 = vadd.f32 1.0, %v1158_v3 }
 0x12a   : > { %v808_v54 = vadd.f32 %v752_v37, %v552_v11  ;;  %v689_v59 = vsel %vm688_vm12, %v686_v45, %v683_v27  ;;  %1163 = vpow2.f32 %v632_v60  ;;  %v619_v19 = vsub.f32 0.0, %v603_v2 }
 0x12b   : > { %v816_v0 = vsel %vm560_vm10, %v1349_v7, %v800_v63  ;;  %v801_v5 = vadd.f32 %v689_v59, %v545_v14  ;;  %v758_v47 = vmul.f32 %v1460_v25, %v757_v53  ;;  %1165 = vlog2.f32 %v690_v15 }
 0x12c   : > { %833 = vst.msk [vmem:[%s1454_s7 + $0x10] sm:$0xff] %vm830_vm1, %v816_v0  ;;  %v824_v11 = vsel %vm568_vm13, %v1352_v8, %v808_v54  ;;  %v648_v55 = vmul.f32 1.442695, %v619_v19  ;;  %v596_v13 = vand.u32 2147483647, %v1541_v9  ;;  %v693_v28 = vmul.f32 -0.5, %v1158_v3 }
 0x12d   : > { %841 = vst.msk [vmem:[%s1454_s7 + $0x50] sm:$0xff] %vm830_vm1, %v824_v11  ;;  %v817_v7 = vsel %vm561_vm14, %v1355_v10, %v801_v5  ;;  %vm760_vm15 = vcmp.lt.f32.partialorder %v759_v4, 0.0004427343  ;;  %vm569_vm0 = vcmp.ne.f32.partialorder %v1361_v21, %v1361_v21  ;;  %v604_v41 = vand.u32 2147483647, %v1557_v17 }
 0x12e   : > { %v1160_v14 = vpop.eup %1159  ;;  %834 = vst.msk [vmem:[%s1454_s7 + $0x18] sm:$0xff] %vm830_vm1, %v817_v7  ;;  %1167 = vpow2.f32 %v648_v55  ;;  %v612_v29 = vsub.f32 0.0, %v596_v13  ;;  %v1564_v18 = vadd.f32 %v1022_v62, %v1330_v34  ;;  %v1046_v43 = vadd.f32 %v1393_v6, %v1388_v1 }
 0x12f   : > { %v1162_v20 = vpop.eup %1161  ;;  %v755_v8 = vmul.f32 0.6931472, %v1160_v14  ;;  %v694_v32 = vadd.f32 1.0, %v693_v28  ;;  %v620_v36 = vsub.f32 0.0, %v604_v41  ;;  %v696_v33 = vand.u32 2147483647, %v1158_v3 }
 0x130   : > { %v762_v10 = vadd.f32 1.0, %v1162_v20  ;;  %v634_v30 = vmul.f32 1.442695, %v612_v29  ;;  %v765_v31 = vmul.f32 -0.5, %v1162_v20  ;;  %v597_v44 = vand.u32 2147483647, %v1564_v18 }
 0x131   : > { %v761_v26 = vsel %vm760_vm15, %v758_v47, %v755_v8  ;;  %v650_v51 = vmul.f32 1.442695, %v620_v36  ;;  %v1573_v38 = vadd.f32 %v1046_v43, %v1330_v34  ;;  %v695_v16 = vmul.f32 %v1158_v3, %v694_v32 }
 0x132   : > { %v809_v25 = vadd.f32 %v761_v26, %v553_v24  ;;  %1169 = vlog2.f32 %v762_v10  ;;  %v766_v40 = vadd.f32 1.0, %v765_v31  ;;  %v613_v1 = vsub.f32 0.0, %v597_v44 }
 0x133   : > { %1171 = vpow2.f32 %v634_v30  ;;  %vm697_vm2 = vcmp.lt.f32.partialorder %v696_v33, 0.0004427343  ;;  %v768_v45 = vand.u32 2147483647, %v1162_v20  ;;  %v605_v56 = vand.u32 2147483647, %v1573_v38 }
 0x134   : > { %v825_v42 = vsel %vm569_vm0, %v1361_v21, %v809_v25  ;;  %v1164_v35 = vpop.eup %1163  ;;  %v546_v21 = vmax.f32 %v1380_v58, 0.0  ;;  %1173 = vpow2.f32 %v650_v51  ;;  %v636_v46 = vmul.f32 1.442695, %v613_v1 }
 0x135   : > { %842 = vst.msk [vmem:[%s1454_s7 + $0x58] sm:$0xff] %vm830_vm1, %v825_v42  ;;  %v1166_v39 = vpop.eup %1165  ;;  %v699_v52 = vadd.f32 1.0, %v1164_v35  ;;  %vm562_vm3 = vcmp.ne.f32.partialorder %v1380_v58, %v1380_v58  ;;  %v767_v50 = vmul.f32 %v1162_v20, %v766_v40  ;;  %v702_v62 = vmul.f32 -0.5, %v1164_v35 }
 0x136   : > { %v692_v6 = vmul.f32 0.6931472, %v1166_v39  ;;  %v621_v63 = vsub.f32 0.0, %v605_v56  ;;  %v554_v53 = vmax.f32 %v1398_v12, 0.0  ;;  %vm769_vm4 = vcmp.lt.f32.partialorder %v768_v45, 0.0004427343 }
 0x137   : > { %1175 = vlog2.f32 %v699_v52  ;;  %vm570_vm5 = vcmp.ne.f32.partialorder %v1398_v12, %v1398_v12  ;;  %v703_v0 = vadd.f32 1.0, %v702_v62  ;;  %v705_v11 = vand.u32 2147483647, %v1164_v35 }
 0x138   : > { %v1168_v48 = vpop.eup %1167  ;;  %v698_v49 = vsel %vm697_vm2, %v695_v16, %v692_v6  ;;  %1177 = vpow2.f32 %v636_v46  ;;  %v652_v60 = vmul.f32 1.442695, %v621_v63  ;;  %v547_v8 = vmax.f32 %v1475_v23, 0.0 }
 0x139   : > { %v802_v57 = vadd.f32 %v698_v49, %v546_v21  ;;  %v771_v27 = vadd.f32 1.0, %v1168_v48  ;;  %v774_v5 = vmul.f32 -0.5, %v1168_v48  ;;  %v704_v14 = vmul.f32 %v1164_v35, %v703_v0 }
 0x13a   : > { %vm706_vm6 = vcmp.lt.f32.partialorder %v705_v11, 0.0004427343  ;;  %v777_v55 = vand.u32 2147483647, %v1168_v48  ;;  %vm563_vm7 = vcmp.ne.f32.partialorder %v1475_v23, %v1475_v23  ;;  %v555_v26 = vmax.f32 %v1515_v22, 0.0 }
 0x13b   : > { %v818_v37 = vsel %vm562_vm3, %v1380_v58, %v802_v57  ;;  %1179 = vlog2.f32 %v771_v27  ;;  %v775_v47 = vadd.f32 1.0, %v774_v5  ;;  %vm571_vm9 = vcmp.ne.f32.partialorder %v1515_v22, %v1515_v22 }
 0x13c   : > { %v1170_v34 = vpop.eup %1169  ;;  %835 = vst.msk [vmem:[%s1454_s7 + $0x20] sm:$0xff] %vm830_vm1, %v818_v37  ;;  %1181 = vpow2.f32 %v652_v60  ;;  %vm778_vm8 = vcmp.lt.f32.partialorder %v777_v55, 0.0004427343  ;;  %v548_v44 = vmax.f32 %v1541_v9, 0.0  ;;  %vm564_vm11 = vcmp.ne.f32.partialorder %v1541_v9, %v1541_v9 }
 0x13d   : > { %v764_v61 = vmul.f32 0.6931472, %v1170_v34  ;;  %v1172_v54 = vpop.eup %1171  ;;  %v776_v25 = vmul.f32 %v1168_v48, %v775_v47  ;;  %vm572_vm13 = vcmp.ne.f32.partialorder %v1557_v17, %v1557_v17  ;;  %vm565_vm15 = vcmp.ne.f32.partialorder %v1564_v18, %v1564_v18 }
 0x13e   : > { %v708_v3 = vadd.f32 1.0, %v1172_v54  ;;  %v1174_v4 = vpop.eup %1173  ;;  %v711_v20 = vmul.f32 -0.5, %v1172_v54  ;;  %v714_v42 = vand.u32 2147483647, %v1172_v54  ;;  %v557_v5 = vmax.f32 %v1573_v38, 0.0 }
 0x13f   : > { %v770_v59 = vsel %vm769_vm4, %v767_v50, %v764_v61  ;;  %v780_v7 = vadd.f32 1.0, %v1174_v4  ;;  %v783_v41 = vmul.f32 -0.5, %v1174_v4  ;;  %v786_v1 = vand.u32 2147483647, %v1174_v4 }
 0x140   : > { %v810_v2 = vadd.f32 %v770_v59, %v554_v53  ;;  %1183 = vlog2.f32 %v708_v3  ;;  %v712_v30 = vadd.f32 1.0, %v711_v20  ;;  %vm715_vm10 = vcmp.lt.f32.partialorder %v714_v42, 0.0004427343 }
 0x141   : > { %v1176_v15 = vpop.eup %1175  ;;  %1185 = vlog2.f32 %v780_v7  ;;  %v784_v40 = vadd.f32 1.0, %v783_v41  ;;  %vm787_vm12 = vcmp.lt.f32.partialorder %v786_v1, 0.0004427343  ;;  %vm573_vm2 = vcmp.ne.f32.partialorder %v1573_v38, %v1573_v38 }
 0x142   : > { %v826_v58 = vsel %vm570_vm5, %v1398_v12, %v810_v2  ;;  %v701_v19 = vmul.f32 0.6931472, %v1176_v15  ;;  %v1178_v13 = vpop.eup %1177  ;;  %v713_v39 = vmul.f32 %v1172_v54, %v712_v30 }
 0x143   : > { %843 = vst.msk [vmem:[%s1454_s7 + $0x60] sm:$0xff] %vm830_vm1, %v826_v58  ;;  %v717_v28 = vadd.f32 1.0, %v1178_v13  ;;  %v785_v46 = vmul.f32 %v1174_v4, %v784_v40  ;;  %v723_v34 = vand.u32 2147483647, %v1178_v13 }
 0x144   : > { %v707_v24 = vsel %vm706_vm6, %v704_v14, %v701_v19 }
 0x145   : > { %v1180_v12 = vpop.eup %1179  ;;  %v803_v10 = vadd.f32 %v707_v24, %v547_v8  ;;  %1187 = vlog2.f32 %v717_v28  ;;  %vm724_vm14 = vcmp.lt.f32.partialorder %v723_v34, 0.0004427343 }
 0x146   : > { %v773_v29 = vmul.f32 0.6931472, %v1180_v12  ;;  %v1182_v31 = vpop.eup %1181 }
 0x147   : > { %v819_v43 = vsel %vm563_vm7, %v1475_v23, %v803_v10  ;;  %v789_v35 = vadd.f32 1.0, %v1182_v31  ;;  %v720_v23 = vmul.f32 -0.5, %v1178_v13  ;;  %v792_v49 = vmul.f32 -0.5, %v1182_v31 }
 0x148   : > { %836 = vst.msk [vmem:[%s1454_s7 + $0x28] sm:$0xff] %vm830_vm1, %v819_v43  ;;  %v779_v32 = vsel %vm778_vm8, %v776_v25, %v773_v29  ;;  %v795_v53 = vand.u32 2147483647, %v1182_v31 }
 0x149   : > { %v811_v33 = vadd.f32 %v779_v32, %v555_v26  ;;  %1189 = vlog2.f32 %v789_v35  ;;  %v721_v48 = vadd.f32 1.0, %v720_v23  ;;  %v793_v63 = vadd.f32 1.0, %v792_v49 }
 0x14a   : > { %v1184_v36 = vpop.eup %1183  ;;  %vm796_vm0 = vcmp.lt.f32.partialorder %v795_v53, 0.0004427343 }
 0x14b   : > { %v710_v51 = vmul.f32 0.6931472, %v1184_v36  ;;  %v827_v52 = vsel %vm571_vm9, %v1515_v22, %v811_v33  ;;  %v1186_v6 = vpop.eup %1185  ;;  %v556_v22 = vmax.f32 %v1557_v17, 0.0  ;;  %v722_v62 = vmul.f32 %v1178_v13, %v721_v48 }
 0x14c   : > { %844 = vst.msk [vmem:[%s1454_s7 + $0x68] sm:$0xff] %vm830_vm1, %v827_v52  ;;  %v782_v45 = vmul.f32 0.6931472, %v1186_v6  ;;  %v794_v3 = vmul.f32 %v1182_v31, %v793_v63 }
 0x14d   : > { %v716_v21 = vsel %vm715_vm10, %v713_v39, %v710_v51 }
 0x14e   : > { %v804_v16 = vadd.f32 %v716_v21, %v548_v44  ;;  %v788_v57 = vsel %vm787_vm12, %v785_v46, %v782_v45 }
 0x14f   : > { %v1188_v50 = vpop.eup %1187  ;;  %v812_v27 = vadd.f32 %v788_v57, %v556_v22 }
 0x150   : > { %v820_v56 = vsel %vm564_vm11, %v1541_v9, %v804_v16  ;;  %v719_v61 = vmul.f32 0.6931472, %v1188_v50  ;;  %v549_v9 = vmax.f32 %v1564_v18, 0.0 }
 0x151   : > { %837 = vst.msk [vmem:[%s1454_s7 + $0x30] sm:$0xff] %vm830_vm1, %v820_v56  ;;  %v828_v37 = vsel %vm572_vm13, %v1557_v17, %v812_v27 }
 0x152   : > { %845 = vst.msk [vmem:[%s1454_s7 + $0x70] sm:$0xff] %vm830_vm1, %v828_v37  ;;  %v725_v54 = vsel %vm724_vm14, %v722_v62, %v719_v61 }
 0x153   : > { %v1190_v59 = vpop.eup %1189  ;;  %v805_v60 = vadd.f32 %v725_v54, %v549_v9 }
 0x154   : > { %v791_v2 = vmul.f32 0.6931472, %v1190_v59 }
 0x155   : > { %v821_v0 = vsel %vm565_vm15, %v1564_v18, %v805_v60 }
 0x156   : > { %838 = vst.msk [vmem:[%s1454_s7 + $0x38] sm:$0xff] %vm830_vm1, %v821_v0  ;;  %v797_v17 = vsel %vm796_vm0, %v794_v3, %v791_v2 }
 0x157   : > { %v813_v58 = vadd.f32 %v797_v17, %v557_v5 }
 0x159   : > { %v829_v11 = vsel %vm573_vm2, %v1573_v38, %v813_v58 }
 0x15a   : > { %846 = vst.msk [vmem:[%s1454_s7 + $0x78] sm:$0xff] %vm830_vm1, %v829_v11 }
 0x15b PF: > { %s13_s14 = sadd.s32 1, %s1213_s14   ;;  %s1649_s12 = smov %s1209_s13 }
 0x15c   : > { %p10_p5 = scmp.ge.s32.totalorder %s13_s14, 6   ;;  %s1650_s13 = smov %s1652_s15 }
 0x15e   :  { %12 = sbr.rel (!%p10_p5) target bundleno = 2 (0x2), region = 62 }

// kernel: puffin_forward.3
= control target key start
LH: loop header
LB: loop body
LE: loop exit
PB: predicated region body
PF: predicated region fallthrough
CT: control target
= control target key end

     0   :  { %s7138_s12 = smov 0   ;;  %s7140_s13 = smov 0   ;;  %s8262_s0 = inlined_call_operand.vmem [shape: f32[2,736,104], index: 0, kind: input, shape index: {}]   ;;  %s8263_s1 = inlined_call_operand.vmem [shape: f32[63232,10], index: 1, kind: input, shape index: {}]   ;;  %s8264_s2 = inlined_call_operand.vmem [shape: f32[1,10], index: 2, kind: input, shape index: {}]   ;;  %s8265_s3 = inlined_call_operand.vmem [shape: f32[2,128,10], index: 3, kind: output, shape index: {}]  }
   0x1   :  { %s7142_s14 = smov 0   ;;  %s7144_s15 = smov 0  }
   0x2   :  { %s7146_s16 = smov 0  }
   0x3 LB: > { %s22_s17 = sadd.s32 1, %s7107_s14  ;;  %s25_s18 = sadd.s32 1, %s7111_s15  ;;  %s7115_s16 = sphi %s7146_s16, %s13_s16   ;;  %s7111_s15 = sphi %s7144_s15, %s8293_s15   ;;  %s7107_s14 = sphi %s7142_s14, %s8292_s14   ;;  %s7103_s13 = sphi %s7140_s13, %s8291_s13   ;;  %s7099_s12 = sphi %s7138_s12, %s8290_s12  }
   0x4   : > { %p23_p0 = scmp.ge.s32.totalorder %s22_s17, 38  ;;  %p4560_p1 = scmp.ge.s32.totalorder %s7115_s16, 1 }
   0x5   : > { %p160_p2 = scmp.lt.s32.totalorder %s7115_s16, 77 }
   0x6   : > { %s8295_s17 = smov (%p23_p0, %s22_s17), 0  ;;  %s8297_s18 = smov (!%p23_p0, %s25_s18), %s7111_s15 }
   0x7   : > { %p161_p3 = pnand %p4560_p1, %p160_p2  ;;  %p27_p4 = scmp.ge.s32.totalorder %s8297_s18, 2 }
   0x8   : > { %p189_p5 = scmp.lt.s32.totalorder (!%p161_p3), %s7103_s13, 1  ;;  %s194_s19 = smul.u32 (!%p161_p3), 208, %s7099_s12 }
   0x9   : > { %s8299_s18 = smov (%p27_p4, %s8297_s18), 0  ;;  %164 = sbr.rel (%p161_p3) target bundleno = 603 (0x25b), region = 32 }
   0xa   : > { %p195_p6 = scmp.lt.s32.totalorder (!%p161_p3), %s194_s19, 7903  ;;  %p4565_p7 = scmp.ne.s32.totalorder (!%p161_p3), %s7099_s12, 0 }
  0x10   : > { %s8301_s13 = smov (!%p189_p5, %s7103_s13), 1  ;;  %s8303_s19 = smov (!%p195_p6, %s194_s19), 7903 }
  0x11   : > { %s6971_s20 = smul.u32 736, %s8301_s13  ;;  %s5082_s21 = sshll.u32 %s8301_s13, 7  ;;  %vm209_vm0 = vcmask (!%p4565_p7), 80896   ;;  %v7117_v0 = vmov (!%p4565_p7), 0.0  }
  0x12   : > { %s7179_s27 = scalar_lea.vmem %s8265_s3, %s5082_s21  ;;  %s4562_s28 = sshll.u32 %s8303_s19, 3  ;;  %210 = vst.msk [vmem:[#allocation2] sm:$0xff] (!%p4565_p7), %vm209_vm0, %v7117_v0  ;;  %211 = vst.msk [vmem:[#allocation2 + $0x8] sm:$0xff] (!%p4565_p7), %vm209_vm0, %v7117_v0 }
  0x13   : > { %s7174_s24 = scalar_lea.vmem %s8262_s0, %s6971_s20  ;;  %s7184_s4 = scalar_lea.vmem %s8263_s1, %s4562_s28  ;;  %212 = vst.msk [vmem:[#allocation2 + $0x10] sm:$0xff] (!%p4565_p7), %vm209_vm0, %v7117_v0  ;;  %213 = vst.msk [vmem:[#allocation2 + $0x18] sm:$0xff] (!%p4565_p7), %vm209_vm0, %v7117_v0 }
  0x14   : > { %208 = sbr.rel (%p4565_p7) target bundleno = 27 (0x1b), region = 36  ;;  %214 = vst.msk [vmem:[#allocation2 + $0x20] sm:$0xff] (!%p4565_p7), %vm209_vm0, %v7117_v0  ;;  %215 = vst.msk [vmem:[#allocation2 + $0x28] sm:$0xff] (!%p4565_p7), %vm209_vm0, %v7117_v0 }
  0x15   : > { %216 = vst.msk [vmem:[#allocation2 + $0x30] sm:$0xff] (!%p4565_p7), %vm209_vm0, %v7117_v0  ;;  %217 = vst.msk [vmem:[#allocation2 + $0x38] sm:$0xff] (!%p4565_p7), %vm209_vm0, %v7117_v0 }
  0x16   : > { %218 = vst.msk [vmem:[#allocation2 + $0x40] sm:$0xff] (!%p4565_p7), %vm209_vm0, %v7117_v0  ;;  %219 = vst.msk [vmem:[#allocation2 + $0x48] sm:$0xff] (!%p4565_p7), %vm209_vm0, %v7117_v0 }
  0x17   : > { %220 = vst.msk [vmem:[#allocation2 + $0x50] sm:$0xff] (!%p4565_p7), %vm209_vm0, %v7117_v0  ;;  %221 = vst.msk [vmem:[#allocation2 + $0x58] sm:$0xff] (!%p4565_p7), %vm209_vm0, %v7117_v0 }
  0x18   : > { %222 = vst.msk [vmem:[#allocation2 + $0x60] sm:$0xff] (!%p4565_p7), %vm209_vm0, %v7117_v0  ;;  %223 = vst.msk [vmem:[#allocation2 + $0x68] sm:$0xff] (!%p4565_p7), %vm209_vm0, %v7117_v0 }
  0x19   : > { %224 = vst.msk [vmem:[#allocation2 + $0x70] sm:$0xff] (!%p4565_p7), %vm209_vm0, %v7117_v0  ;;  %225 = vst.msk [vmem:[#allocation2 + $0x78] sm:$0xff] (!%p4565_p7), %vm209_vm0, %v7117_v0 }
  0x1b PF: > { %v275_v1 = vld [vmem:[%s7184_s4 + $0x68] sm:$0xff]  ;;  %v276_v2 = vld [vmem:[%s7184_s4 + $0x70] sm:$0xff]  ;;  %v2133_v3 = vld [vmem:[%s7184_s4 + $0x340] sm:$0xff]  ;;  %s4566_s5 = sshll.u32 %s7099_s12, 4  ;;  %vm288_vm1 = vcmask 850944   ;;  %vm4067_vm2 = vcmask 80896  }
  0x1c   : > { %v6347_v4 = vpack.c.bf16 %v276_v2, %v275_v1  ;;  %v2134_v5 = vld [vmem:[%s7184_s4 + $0x348] sm:$0xff]  ;;  %v277_v6 = vld [vmem:[%s7184_s4 + $0x78] sm:$0xff]  ;;  %v278_v7 = vld [vmem:[%s7184_s4 + $0x80] sm:$0xff]  ;;  %s7217_s6 = scalar_lea.vmem %s7174_s24, %s4566_s5  ;;  %p5078_p8 = scmp.ne.s32.totalorder %s7099_s12, 37 }
  0x1d   : > { %v6539_v8 = vpack.c.bf16 %v2134_v5, %v2133_v3  ;;  %v6351_v9 = vpack.c.bf16 %v278_v7, %v277_v6  ;;  %v2135_v10 = vld [vmem:[%s7184_s4 + $0x350] sm:$0xff]  ;;  %v2136_v11 = vld [vmem:[%s7184_s4 + $0x358] sm:$0xff]  ;;  %v279_v12 = vld [vmem:[%s7184_s4 + $0x88] sm:$0xff] }
  0x1e   : > { %6348 = vmatprep.subr.bf16.mxu1 %v6347_v4  ;;  %v6543_v13 = vpack.c.bf16 %v2136_v11, %v2135_v10  ;;  %v280_v14 = vld [vmem:[%s7184_s4 + $0x90] sm:$0xff]  ;;  %v2137_v15 = vld [vmem:[%s7184_s4 + $0x360] sm:$0xff]  ;;  %v2138_v16 = vld [vmem:[%s7184_s4 + $0x368] sm:$0xff] }
  0x1f   : > { %6540 = vmatprep.subr.bf16.mxu0 %v6539_v8  ;;  %6350 = vmatpush3.bf16.msra.mxu1 %v6347_v4  ;;  %v6355_v17 = vpack.c.bf16 %v280_v14, %v279_v12  ;;  %v6547_v18 = vpack.c.bf16 %v2138_v16, %v2137_v15  ;;  %v281_v19 = vld [vmem:[%s7184_s4 + $0x98] sm:$0xff]  ;;  %v282_v20 = vld [vmem:[%s7184_s4 + $0xa0] sm:$0xff]  ;;  %v2139_v21 = vld [vmem:[%s7184_s4 + $0x370] sm:$0xff] }
  0x20   : > { %6542 = vmatpush3.bf16.msra.mxu0 %v6539_v8  ;;  %6352 = vmatprep.subr.bf16.mxu1 %v6351_v9  ;;  %v2140_v22 = vld [vmem:[%s7184_s4 + $0x378] sm:$0xff]  ;;  %v4568_v23 = vld [vmem:[%s7217_s6 + $0x1] sm:$0xff]  ;;  %v6359_v24 = vpack.c.bf16 %v282_v20, %v281_v19  ;;  %v284_v28 = vld [vmem:[%s7184_s4 + $0xb0] sm:$0xff] }
  0x21   : > { %6544 = vmatprep.subr.bf16.mxu0 %v6543_v13  ;;  %v7225_v25 = vld [vmem:[%s7217_s6 + $0x8] sm:$0xff]  ;;  %v6551_v26 = vpack.c.bf16 %v2140_v22, %v2139_v21  ;;  %5573 = vmatprep.mubr.msk.f32.mxu1 %vm288_vm1, %v4568_v23  ;;  %v2141_v29 = vld [vmem:[%s7184_s4 + $0x380] sm:$0xff]  ;;  %v285_v33 = vld [vmem:[%s7184_s4 + $0xb8] sm:$0xff] }
  0x22   : > { %v283_v27 = vld [vmem:[%s7184_s4 + $0xa8] sm:$0xff]  ;;  %5973 = vmatprep.mubr.msk.f32.mxu0 %vm288_vm1, %v7225_v25  ;;  %v286_v34 = vld [vmem:[%s7184_s4 + $0xc0] sm:$0xff]  ;;  %v2143_v35 = vld [vmem:[%s7184_s4 + $0x390] sm:$0xff] }
  0x23   : > { %6354 = vmatpush3.bf16.msra.mxu1 %v6351_v9  ;;  %v2142_v30 = vld [vmem:[%s7184_s4 + $0x388] sm:$0xff]  ;;  %v6363_v31 = vpack.c.bf16 %v284_v28, %v283_v27  ;;  %v2144_v36 = vld [vmem:[%s7184_s4 + $0x398] sm:$0xff]  ;;  %v6367_v37 = vpack.c.bf16 %v286_v34, %v285_v33  ;;  %v2145_v40 = vld [vmem:[%s7184_s4 + $0x3a0] sm:$0xff] }
  0x24   : > { %6546 = vmatpush3.bf16.msra.mxu0 %v6543_v13  ;;  %6356 = vmatprep.subr.bf16.mxu1 %v6355_v17  ;;  %v6555_v32 = vpack.c.bf16 %v2142_v30, %v2141_v29  ;;  %v6559_v38 = vpack.c.bf16 %v2144_v36, %v2143_v35  ;;  %v287_v39 = vld [vmem:[%s7184_s4 + $0xc8] sm:$0xff]  ;;  %v244_v41 = vld [vmem:[%s7184_s4] sm:$0xff]  ;;  %v2374_v44 = vld [vmem:[%s7184_s4 + $0x3b0] sm:$0xff] }
  0x25   : > { %6548 = vmatprep.subr.bf16.mxu0 %v6547_v18  ;;  %v245_v42 = vld [vmem:[%s7184_s4 + $0x8] sm:$0xff]  ;;  %v7248_v47 = vld [vmem:[%s7217_s6 + $0x10] sm:$0xff]  ;;  %v247_v50 = vld [vmem:[%s7184_s4 + $0x18] sm:$0xff] }
  0x26   : > { %v2373_v43 = vld [vmem:[%s7184_s4 + $0x3a8] sm:$0xff]  ;;  %v6371_v46 = vpack.c.bf16 %v245_v42, %v244_v41  ;;  %v246_v49 = vld [vmem:[%s7184_s4 + $0x10] sm:$0xff]  ;;  %v2375_v51 = vld [vmem:[%s7184_s4 + $0x3b8] sm:$0xff] }
  0x27   : > { %6358 = vmatpush3.bf16.msra.mxu1 %v6355_v17  ;;  %v7245_v45 = vld [vmem:[%s7217_s6 + $0x9] sm:$0xff]  ;;  %v6563_v48 = vpack.c.bf16 %v2374_v44, %v2373_v43  ;;  %v2376_v52 = vld [vmem:[%s7184_s4 + $0x3c0] sm:$0xff]  ;;  %v7257_v53 = vld [vmem:[%s7217_s6 + $0x11] sm:$0xff]  ;;  %v6375_v56 = vpack.c.bf16 %v247_v50, %v246_v49 }
  0x28   : > { %6550 = vmatpush3.bf16.msra.mxu0 %v6547_v18  ;;  %6360 = vmatprep.subr.bf16.mxu1 %v6359_v24  ;;  %v7262_v54 = vld [vmem:[%s7217_s6 + $0x18] sm:$0xff]  ;;  %v7268_v57 = vld [vmem:[%s7217_s6 + $0x20] sm:$0xff]  ;;  %v6567_v58 = vpack.c.bf16 %v2376_v52, %v2375_v51  ;;  %v249_v60 = vld [vmem:[%s7184_s4 + $0x28] sm:$0xff] }
  0x29   : > { %6552 = vmatprep.subr.bf16.mxu0 %v6551_v26  ;;  %v7265_v55 = vld [vmem:[%s7217_s6 + $0x19] sm:$0xff]  ;;  %v2377_v61 = vld [vmem:[%s7184_s4 + $0x3c8] sm:$0xff]  ;;  %v2378_v62 = vld [vmem:[%s7184_s4 + $0x3d0] sm:$0xff] }
  0x2a   : > { %v248_v59 = vld [vmem:[%s7184_s4 + $0x20] sm:$0xff]  ;;  %v7286_v0 = vld [vmem:[%s7217_s6 + $0x28] sm:$0xff]  ;;  %v7292_v3 = vld [vmem:[%s7217_s6 + $0x30] sm:$0xff]  ;;  %v6571_v4 = vpack.c.bf16 %v2378_v62, %v2377_v61 }
  0x2b   : > { %6362 = vmatpush3.bf16.msra.mxu1 %v6359_v24  ;;  %v7281_v63 = vld [vmem:[%s7217_s6 + $0x21] sm:$0xff]  ;;  %v7289_v1 = vld [vmem:[%s7217_s6 + $0x29] sm:$0xff]  ;;  %v6379_v2 = vpack.c.bf16 %v249_v60, %v248_v59  ;;  %v251_v6 = vld [vmem:[%s7184_s4 + $0x38] sm:$0xff] }
  0x2c   : > { %6554 = vmatpush3.bf16.msra.mxu0 %v6551_v26  ;;  %6364 = vmatprep.subr.bf16.mxu1 %v6363_v31  ;;  %v250_v5 = vld [vmem:[%s7184_s4 + $0x30] sm:$0xff]  ;;  %v2379_v8 = vld [vmem:[%s7184_s4 + $0x3d8] sm:$0xff]  ;;  %v2380_v9 = vld [vmem:[%s7184_s4 + $0x3e0] sm:$0xff] }
  0x2d   : > { %6556 = vmatprep.subr.bf16.mxu0 %v6555_v32  ;;  %v7299_v7 = vld [vmem:[%s7217_s6 + $0x31] sm:$0xff]  ;;  %v7313_v11 = vld [vmem:[%s7217_s6 + $0x39] sm:$0xff]  ;;  %v6383_v12 = vpack.c.bf16 %v251_v6, %v250_v5  ;;  %v6575_v14 = vpack.c.bf16 %v2380_v9, %v2379_v8  ;;  %v7323_v15 = vld [vmem:[%s7217_s6 + $0x41] sm:$0xff] }
  0x2e   : > { %v7308_v10 = vld [vmem:[%s7217_s6 + $0x38] sm:$0xff]  ;;  %v7318_v13 = vld [vmem:[%s7217_s6 + $0x40] sm:$0xff]  ;;  %v253_v17 = vld [vmem:[%s7184_s4 + $0x48] sm:$0xff] }
  0x2f   : > { %6366 = vmatpush3.bf16.msra.mxu1 %v6363_v31  ;;  %v252_v16 = vld [vmem:[%s7184_s4 + $0x40] sm:$0xff]  ;;  %v7330_v18 = vld [vmem:[%s7217_s6 + $0x48] sm:$0xff]  ;;  %v2382_v20 = vld [vmem:[%s7184_s4 + $0x3f0] sm:$0xff] }
  0x30   : > { %6558 = vmatpush3.bf16.msra.mxu0 %v6555_v32  ;;  %6368 = vmatprep.subr.bf16.mxu1 %v6367_v37  ;;  %v2381_v19 = vld [vmem:[%s7184_s4 + $0x3e8] sm:$0xff]  ;;  %v7342_v22 = vld [vmem:[%s7217_s6 + $0x50] sm:$0xff]  ;;  %v6387_v24 = vpack.c.bf16 %v253_v17, %v252_v16  ;;  %v7350_v26 = vld [vmem:[%s7217_s6 + $0x58] sm:$0xff] }
  0x31   : > { %6560 = vmatprep.subr.bf16.mxu0 %v6559_v38  ;;  %v7337_v21 = vld [vmem:[%s7217_s6 + $0x49] sm:$0xff]  ;;  %v7345_v23 = vld [vmem:[%s7217_s6 + $0x51] sm:$0xff]  ;;  %v6579_v27 = vpack.c.bf16 %v2382_v20, %v2381_v19  ;;  %v2384_v31 = vld [vmem:[%s7184_s4 + $0x400] sm:$0xff] }
  0x32   : > { %v254_v28 = vld [vmem:[%s7184_s4 + $0x50] sm:$0xff]  ;;  %v255_v29 = vld [vmem:[%s7184_s4 + $0x58] sm:$0xff]  ;;  %v7368_v33 = vld [vmem:[%s7217_s6 + $0x60] sm:$0xff] }
  0x33   : > { %6370 = vmatpush3.bf16.msra.mxu1 %v6367_v37  ;;  %v2383_v30 = vld [vmem:[%s7184_s4 + $0x3f8] sm:$0xff]  ;;  %v7371_v34 = vld [vmem:[%s7217_s6 + $0x61] sm:$0xff]  ;;  %v6391_v35 = vpack.c.bf16 %v255_v29, %v254_v28  ;;  %v693_v43 = vld [vmem:[%s7184_s4 + $0xd0] sm:$0xff] }
  0x34   : > { %6562 = vmatpush3.bf16.msra.mxu0 %v6559_v38  ;;  %5571 = vmatprep.subr.mxu1 %v287_v39  ;;  %v7363_v32 = vld [vmem:[%s7217_s6 + $0x59] sm:$0xff]  ;;  %v7374_v36 = vld [vmem:[%s7217_s6 + $0x68] sm:$0xff]  ;;  %v6583_v37 = vpack.c.bf16 %v2384_v31, %v2383_v30  ;;  %v697_v5 = vld [vmem:[%s7184_s4 + $0xf0] sm:$0xff] }
  0x35   : > { %5971 = vmatprep.subr.mxu0 %v2145_v40  ;;  %v7383_v38 = vld [vmem:[%s7217_s6 + $0x69] sm:$0xff]  ;;  %v7394_v41 = vld [vmem:[%s7217_s6 + $0x78] sm:$0xff]  ;;  %v256_v42 = vld [vmem:[%s7184_s4 + $0x60] sm:$0xff] }
  0x36   : > { %v694_v44 = vld [vmem:[%s7184_s4 + $0xd8] sm:$0xff]  ;;  %v4830_v51 = vld [vmem:[%s7217_s6 + $0x80] sm:$0xff]  ;;  %v696_v60 = vld [vmem:[%s7184_s4 + $0xe8] sm:$0xff] }
  0x37   : > { %5572 = vmatpush3.msra.mxu1 %v287_v39  ;;  %v7388_v39 = vld [vmem:[%s7217_s6 + $0x70] sm:$0xff]  ;;  %v2614_v49 = vld [vmem:[%s7184_s4 + $0x418] sm:$0xff]  ;;  %v228_v52 = vld [vmem:[%s7217_s6] sm:$0xff] }
  0x38   : > { %5972 = vmatpush3.msra.mxu0 %v2145_v40  ;;  %5574 = vmatmul.mubr.msk.f32.vlgmr.msra.gmra.mrb[0].mxu1 %vm288_vm1, %v7245_v45  ;;  %v7391_v40 = vld [vmem:[%s7217_s6 + $0x71] sm:$0xff]  ;;  %v7409_v50 = vld [vmem:[%s7217_s6 + $0x79] sm:$0xff]  ;;  %v2616_v62 = vld [vmem:[%s7184_s4 + $0x428] sm:$0xff] }
  0x39   : > { %6372 = vmatprep.subr.bf16.mxu1 %v6371_v46  ;;  %5974 = vmatmul.mubr.msk.f32.vlgmr.msra.gmra.mrb[0].mxu0 %vm288_vm1, %v7248_v47  ;;  %v695_v59 = vld [vmem:[%s7184_s4 + $0xe0] sm:$0xff]  ;;  %v698_v6 = vld [vmem:[%s7184_s4 + $0xf8] sm:$0xff]  ;;  %v2617_v8 = vld [vmem:[%s7184_s4 + $0x430] sm:$0xff] }
  0x3a   : > { %6564 = vmatprep.subr.bf16.mxu0 %v6563_v48  ;;  %6374 = vmatpush3.bf16.msra.mxu1 %v6371_v46  ;;  %v2385_v46 = vld [vmem:[%s7184_s4 + $0x408] sm:$0xff]  ;;  %v2615_v61 = vld [vmem:[%s7184_s4 + $0x420] sm:$0xff]  ;;  %v2618_v9 = vld [vmem:[%s7184_s4 + $0x438] sm:$0xff] }
  0x3b   : > { %6566 = vmatpush3.bf16.msra.mxu0 %v6563_v48  ;;  %5576 = vmatprep.mubr.msk.f32.mxu1 %vm288_vm1, %v7257_v53  ;;  %v2613_v48 = vld [vmem:[%s7184_s4 + $0x410] sm:$0xff]  ;;  %v702_v16 = vld [vmem:[%s7184_s4 + $0x118] sm:$0xff]  ;;  %v704_v19 = vld [vmem:[%s7184_s4 + $0x128] sm:$0xff] }
  0x3c   : > { %5976 = vmatprep.mubr.msk.f32.mxu0 %vm288_vm1, %v7262_v54  ;;  %5577 = vmatmul.mubr.msk.f32.gmra.mrb[2].mxu1 %vm288_vm1, %v7265_v55  ;;  %v2624_v20 = vld [vmem:[%s7184_s4 + $0x468] sm:$0xff]  ;;  %v936_v31 = vld [vmem:[%s7184_s4 + $0x150] sm:$0xff] }
  0x3d   : > { %5977 = vmatmul.mubr.msk.f32.gmra.mrb[2].mxu0 %vm288_vm1, %v7268_v57  ;;  %6376 = vmatprep.subr.bf16.mxu1 %v6375_v56  ;;  %v4617_v28 = vld [vmem:[%s7217_s6 + $0x2] sm:$0xff]  ;;  %v4881_v29 = vld [vmem:[%s7217_s6 + $0xa] sm:$0xff] }
  0x3e   : > { %6568 = vmatprep.subr.bf16.mxu0 %v6567_v58  ;;  %6378 = vmatpush3.bf16.msra.mxu1 %v6375_v56  ;;  %v6395_v56 = vpack.c.bf16 %v694_v44, %v693_v43  ;;  %v935_v30 = vld [vmem:[%s7184_s4 + $0x148] sm:$0xff] }
  0x3f   : > { %6570 = vmatpush3.bf16.msra.mxu0 %v6567_v58  ;;  %5579 = vmatprep.mubr.msk.f32.mxu1 %vm288_vm1, %v7281_v63  ;;  %v6587_v58 = vpack.c.bf16 %v2614_v49, %v2613_v48  ;;  %v4885_v44 = vld [vmem:[%s7217_s6 + $0x2a] sm:$0xff] }
  0x40   : > { %5979 = vmatprep.mubr.msk.f32.mxu0 %vm288_vm1, %v7286_v0  ;;  %5580 = vmatmul.mubr.msk.f32.gmra.mrb[4].mxu1 %vm288_vm1, %v7289_v1  ;;  %v939_v48 = vld [vmem:[%s7184_s4 + $0x168] sm:$0xff]  ;;  %v940_v49 = vld [vmem:[%s7184_s4 + $0x170] sm:$0xff] }
  0x41   : > { %5980 = vmatmul.mubr.msk.f32.gmra.mrb[4].mxu0 %vm288_vm1, %v7292_v3  ;;  %6380 = vmatprep.subr.bf16.mxu1 %v6379_v2 }
  0x42   : > { %6572 = vmatprep.subr.bf16.mxu0 %v6571_v4  ;;  %5582 = vmatprep.mubr.msk.f32.mxu1 %vm288_vm1, %v7299_v7 }
  0x43   : > { %6382 = vmatpush3.bf16.msra.mxu1 %v6379_v2  ;;  %5982 = vmatprep.mubr.msk.f32.mxu0 %vm288_vm1, %v7308_v10  ;;  %v6399_v2 = vpack.c.bf16 %v696_v60, %v695_v59  ;;  %v941_v60 = vld [vmem:[%s7184_s4 + $0x178] sm:$0xff] }
  0x44   : > { %6574 = vmatpush3.bf16.msra.mxu0 %v6571_v4  ;;  %5583 = vmatmul.mubr.msk.f32.gmra.mrb[6].mxu1 %vm288_vm1, %v7313_v11  ;;  %v6591_v4 = vpack.c.bf16 %v2616_v62, %v2615_v61  ;;  %v942_v61 = vld [vmem:[%s7184_s4 + $0x180] sm:$0xff]  ;;  %v2861_v62 = vld [vmem:[%s7184_s4 + $0x4b8] sm:$0xff] }
  0x45   : > { %5983 = vmatmul.mubr.msk.f32.gmra.mrb[6].mxu0 %vm288_vm1, %v7318_v13  ;;  %6384 = vmatprep.subr.bf16.mxu1 %v6383_v12 }
  0x46   : > { %6576 = vmatprep.subr.bf16.mxu0 %v6575_v14  ;;  %5585 = vmatprep.mubr.msk.f32.mxu1 %vm288_vm1, %v7323_v15 }
  0x47   : > { %6386 = vmatpush3.bf16.msra.mxu1 %v6383_v12  ;;  %5985 = vmatprep.mubr.msk.f32.mxu0 %vm288_vm1, %v7330_v18  ;;  %v700_v12 = vld [vmem:[%s7184_s4 + $0x108] sm:$0xff] }
  0x48   : > { %6578 = vmatpush3.bf16.msra.mxu0 %v6575_v14  ;;  %5586 = vmatmul.mubr.msk.f32.gmra.mrb[8].mxu1 %vm288_vm1, %v7337_v21  ;;  %v2620_v14 = vld [vmem:[%s7184_s4 + $0x448] sm:$0xff] }
  0x49   : > { %5986 = vmatmul.mubr.msk.f32.gmra.mrb[8].mxu0 %vm288_vm1, %v7342_v22  ;;  %5588 = vmatprep.mubr.msk.f32.mxu1 %vm288_vm1, %v7345_v23 }
  0x4a   : > { %6388 = vmatprep.subr.bf16.mxu1 %v6387_v24  ;;  %5988 = vmatprep.mubr.msk.f32.mxu0 %vm288_vm1, %v7350_v26 }
  0x4b   : > { %6580 = vmatprep.subr.bf16.mxu0 %v6579_v27  ;;  %6390 = vmatpush3.bf16.msra.mxu1 %v6387_v24 }
  0x4c   : > { %5589 = vmatmul.mubr.msk.f32.gmra.mrb[10].mxu1 %vm288_vm1, %v7363_v32  ;;  %6582 = vmatpush3.bf16.msra.mxu0 %v6579_v27  ;;  %v4863_v27 = vld [vmem:[%s7217_s6 + $0x81] sm:$0xff] }
  0x4d   : > { %5989 = vmatmul.mubr.msk.f32.gmra.mrb[10].mxu0 %vm288_vm1, %v7368_v33  ;;  %5591 = vmatprep.mubr.msk.f32.mxu1 %vm288_vm1, %v7371_v34 }
  0x4e   : > { %6392 = vmatprep.subr.bf16.mxu1 %v6391_v35  ;;  %5991 = vmatprep.mubr.msk.f32.mxu0 %vm288_vm1, %v7374_v36 }
  0x4f   : > { %6584 = vmatprep.subr.bf16.mxu0 %v6583_v37  ;;  %6394 = vmatpush3.bf16.msra.mxu1 %v6391_v35  ;;  %v6423_v35 = vpack.c.bf16 %v936_v31, %v935_v30  ;;  %v1178_v30 = vld [vmem:[%s7184_s4 + $0x1c8] sm:$0xff]  ;;  %v3097_v31 = vld [vmem:[%s7184_s4 + $0x500] sm:$0xff] }
  0x50   : > { %5592 = vmatmul.mubr.msk.f32.gmra.mrb[12].mxu1 %vm288_vm1, %v7383_v38  ;;  %6586 = vmatpush3.bf16.msra.mxu0 %v6583_v37 }
  0x51   : > { %5992 = vmatmul.mubr.msk.f32.gmra.mrb[12].mxu0 %vm288_vm1, %v7388_v39  ;;  %5594 = vmatprep.mubr.msk.f32.mxu1 %vm288_vm1, %v7391_v40 }
  0x52   : > { %5994 = vmatprep.mubr.msk.f32.mxu0 %vm288_vm1, %v7394_v41  ;;  %5621 = vmatprep.subr.mxu1 %v256_v42 }
  0x53   : > { %6021 = vmatprep.subr.mxu0 %v2385_v46  ;;  %5622 = vmatpush3.msra.mxu1 %v256_v42  ;;  %v4884_v42 = vld [vmem:[%s7217_s6 + $0x22] sm:$0xff] }
  0x54   : > { %5595 = vmatmul.mubr.msk.f32.gmra.mrb[14].mxu1 %vm288_vm1, %v7409_v50  ;;  %6022 = vmatpush3.msra.mxu0 %v2385_v46 }
  0x55   : > { %5995 = vmatmul.mubr.msk.f32.gmra.mrb[14].mxu0 %vm288_vm1, %v4830_v51  ;;  %5623 = vmatprep.mubr.msk.f32.mxu1 %vm288_vm1, %v228_v52  ;;  %v2860_v51 = vld [vmem:[%s7184_s4 + $0x4b0] sm:$0xff] }
  0x56   : > { %6023 = vmatprep.mubr.msk.f32.mxu0 %vm288_vm1, %v7245_v45  ;;  %6396 = vmatprep.subr.bf16.mxu1 %v6395_v56  ;;  %v6595_v45 = vpack.c.bf16 %v2618_v9, %v2617_v8  ;;  %v4886_v52 = vld [vmem:[%s7217_s6 + $0x32] sm:$0xff]  ;;  %v943_v9 = vld [vmem:[%s7184_s4 + $0x188] sm:$0xff] }
  0x57   : > { %6588 = vmatprep.subr.bf16.mxu0 %v6587_v58 }
  0x58   : > { %5624 = vmatmul.mubr.msk.f32.vlgmr.msra.gmra.mrb[0].mxu1 %vm288_vm1, %v7225_v25  ;;  %v6403_v25 = vpack.c.bf16 %v698_v6, %v697_v5  ;;  %v4889_v5 = vld [vmem:[%s7217_s6 + $0x4a] sm:$0xff]  ;;  %v6435_v6 = vpack.c.bf16 %v942_v61, %v941_v60  ;;  %v1184_v60 = vld [vmem:[%s7184_s4 + $0x1f8] sm:$0xff] }
  0x59   : > { %6024 = vmatmul.mubr.msk.f32.vlgmr.msra.gmra.mrb[0].mxu0 %vm288_vm1, %v7257_v53  ;;  %6398 = vmatpush3.bf16.msra.mxu1 %v6395_v56  ;;  %v699_v53 = vld [vmem:[%s7184_s4 + $0x100] sm:$0xff]  ;;  %v3103_v61 = vld [vmem:[%s7184_s4 + $0x530] sm:$0xff] }
  0x5a   : > { %6590 = vmatpush3.bf16.msra.mxu0 %v6587_v58  ;;  %5626 = vmatprep.mubr.msk.f32.mxu1 %vm288_vm1, %v7248_v47  ;;  %v2619_v47 = vld [vmem:[%s7184_s4 + $0x440] sm:$0xff]  ;;  %v6431_v58 = vpack.c.bf16 %v940_v49, %v939_v48  ;;  %v1182_v48 = vld [vmem:[%s7184_s4 + $0x1e8] sm:$0xff] }
  0x5b   : > { %6026 = vmatprep.mubr.msk.f32.mxu0 %vm288_vm1, %v7265_v55  ;;  %6400 = vmatprep.subr.bf16.mxu1 %v6399_v2  ;;  %v6599_v55 = vpack.c.bf16 %v2620_v14, %v2619_v47  ;;  %v4887_v56 = vld [vmem:[%s7217_s6 + $0x3a] sm:$0xff] }
  0x5c   : > { %5627 = vmatmul.mubr.msk.f32.gmra.mrb[2].mxu1 %vm288_vm1, %v7262_v54  ;;  %6592 = vmatprep.subr.bf16.mxu0 %v6591_v4  ;;  %v6407_v54 = vpack.c.bf16 %v700_v12, %v699_v53  ;;  %v2864_v53 = vld [vmem:[%s7184_s4 + $0x4d0] sm:$0xff]  ;;  %v4891_v47 = vld [vmem:[%s7217_s6 + $0x5a] sm:$0xff] }
  0x5d   : > { %6027 = vmatmul.mubr.msk.f32.gmra.mrb[2].mxu0 %vm288_vm1, %v7281_v63  ;;  %6402 = vmatpush3.bf16.msra.mxu1 %v6399_v2  ;;  %v701_v63 = vld [vmem:[%s7184_s4 + $0x110] sm:$0xff]  ;;  %v2862_v2 = vld [vmem:[%s7184_s4 + $0x4c0] sm:$0xff] }
  0x5e   : > { %6594 = vmatpush3.bf16.msra.mxu0 %v6591_v4  ;;  %5629 = vmatprep.mubr.msk.f32.mxu1 %vm288_vm1, %v7268_v57  ;;  %v2621_v57 = vld [vmem:[%s7184_s4 + $0x450] sm:$0xff]  ;;  %v4888_v4 = vld [vmem:[%s7217_s6 + $0x42] sm:$0xff]  ;;  %v6627_v8 = vpack.c.bf16 %v2862_v2, %v2861_v62  ;;  %v3104_v62 = vld [vmem:[%s7184_s4 + $0x538] sm:$0xff] }
  0x5f   : > { %6029 = vmatprep.mubr.msk.f32.mxu0 %vm288_vm1, %v7289_v1  ;;  %6404 = vmatprep.subr.bf16.mxu1 %v6403_v25  ;;  %v2622_v1 = vld [vmem:[%s7184_s4 + $0x458] sm:$0xff]  ;;  %v3101_v49 = vld [vmem:[%s7184_s4 + $0x520] sm:$0xff] }
  0x60   : > { %5630 = vmatmul.mubr.msk.f32.gmra.mrb[4].mxu1 %vm288_vm1, %v7286_v0  ;;  %6596 = vmatprep.subr.bf16.mxu0 %v6595_v45  ;;  %v6411_v0 = vpack.c.bf16 %v702_v16, %v701_v63  ;;  %v6603_v17 = vpack.c.bf16 %v2622_v1, %v2621_v57  ;;  %v4890_v12 = vld [vmem:[%s7217_s6 + $0x52] sm:$0xff]  ;;  %v4893_v63 = vld [vmem:[%s7217_s6 + $0x6a] sm:$0xff]  ;;  %v1173_v57 = vld [vmem:[%s7184_s4 + $0x1a0] sm:$0xff] }
  0x61   : > { %6030 = vmatmul.mubr.msk.f32.gmra.mrb[4].mxu0 %vm288_vm1, %v7299_v7  ;;  %5632 = vmatprep.mubr.msk.f32.mxu1 %vm288_vm1, %v7292_v3  ;;  %v703_v7 = vld [vmem:[%s7184_s4 + $0x120] sm:$0xff]  ;;  %v945_v16 = vld [vmem:[%s7184_s4 + $0x198] sm:$0xff]  ;;  %v1174_v1 = vld [vmem:[%s7184_s4 + $0x1a8] sm:$0xff] }
  0x62   : > { %6406 = vmatpush3.bf16.msra.mxu1 %v6403_v25  ;;  %6032 = vmatprep.mubr.msk.f32.mxu0 %vm288_vm1, %v7313_v11  ;;  %v2623_v3 = vld [vmem:[%s7184_s4 + $0x460] sm:$0xff]  ;;  %v944_v25 = vld [vmem:[%s7184_s4 + $0x190] sm:$0xff] }
  0x63   : > { %6598 = vmatpush3.bf16.msra.mxu0 %v6595_v45  ;;  %6408 = vmatprep.subr.bf16.mxu1 %v6407_v54  ;;  %v6607_v11 = vpack.c.bf16 %v2624_v20, %v2623_v3  ;;  %v2863_v45 = vld [vmem:[%s7184_s4 + $0x4c8] sm:$0xff]  ;;  %v6439_v14 = vpack.c.bf16 %v944_v25, %v943_v9  ;;  %v4895_v3 = vld [vmem:[%s7217_s6 + $0x7a] sm:$0xff]  ;;  %v6443_v20 = vpack.c.bf16 %v1174_v1, %v1173_v57 }
  0x64   : > { %5633 = vmatmul.mubr.msk.f32.gmra.mrb[6].mxu1 %vm288_vm1, %v7308_v10  ;;  %6600 = vmatprep.subr.bf16.mxu0 %v6599_v55  ;;  %v6415_v10 = vpack.c.bf16 %v704_v19, %v703_v7  ;;  %v3094_v7 = vld [vmem:[%s7184_s4 + $0x4e8] sm:$0xff]  ;;  %v4894_v19 = vld [vmem:[%s7217_s6 + $0x72] sm:$0xff]  ;;  %v1185_v25 = vld [vmem:[%s7184_s4 + $0x200] sm:$0xff] }
  0x65   : > { %6033 = vmatmul.mubr.msk.f32.gmra.mrb[6].mxu0 %vm288_vm1, %v7323_v15  ;;  %5635 = vmatprep.mubr.msk.f32.mxu1 %vm288_vm1, %v7318_v13  ;;  %v705_v13 = vld [vmem:[%s7184_s4 + $0x130] sm:$0xff]  ;;  %v933_v15 = vld [vmem:[%s7184_s4 + $0x138] sm:$0xff]  ;;  %v4929_v57 = vld [vmem:[%s7217_s6 + $0x83] sm:$0xff] }
  0x66   : > { %6410 = vmatpush3.bf16.msra.mxu1 %v6407_v54  ;;  %6035 = vmatprep.mubr.msk.f32.mxu0 %vm288_vm1, %v7337_v21  ;;  %v2625_v21 = vld [vmem:[%s7184_s4 + $0x470] sm:$0xff]  ;;  %v6631_v54 = vpack.c.bf16 %v2864_v53, %v2863_v45  ;;  %v1413_v45 = vld [vmem:[%s7184_s4 + $0x208] sm:$0xff] }
  0x67   : > { %6602 = vmatpush3.bf16.msra.mxu0 %v6599_v55  ;;  %6412 = vmatprep.subr.bf16.mxu1 %v6411_v0  ;;  %v4892_v55 = vld [vmem:[%s7217_s6 + $0x62] sm:$0xff]  ;;  %v4923_v2 = vld [vmem:[%s7217_s6 + $0x53] sm:$0xff]  ;;  %v4926_v9 = vld [vmem:[%s7217_s6 + $0x6b] sm:$0xff] }
  0x68   : > { %5636 = vmatmul.mubr.msk.f32.gmra.mrb[8].mxu1 %vm288_vm1, %v7330_v18  ;;  %6604 = vmatprep.subr.bf16.mxu0 %v6603_v17  ;;  %v934_v18 = vld [vmem:[%s7184_s4 + $0x140] sm:$0xff]  ;;  %v1414_v53 = vld [vmem:[%s7184_s4 + $0x210] sm:$0xff] }
  0x69   : > { %6036 = vmatmul.mubr.msk.f32.gmra.mrb[8].mxu0 %vm288_vm1, %v7345_v23  ;;  %5638 = vmatprep.mubr.msk.f32.mxu1 %vm288_vm1, %v7342_v22  ;;  %v2853_v22 = vld [vmem:[%s7184_s4 + $0x478] sm:$0xff]  ;;  %v2854_v23 = vld [vmem:[%s7184_s4 + $0x480] sm:$0xff]  ;;  %v6419_v24 = vpack.c.bf16 %v934_v18, %v933_v15  ;;  %v4914_v15 = vld [vmem:[%s7217_s6 + $0xb] sm:$0xff] }
  0x6a   : > { %6038 = vmatprep.mubr.msk.f32.mxu0 %vm288_vm1, %v7363_v32  ;;  %6414 = vmatpush3.bf16.msra.mxu1 %v6411_v0  ;;  %v2855_v32 = vld [vmem:[%s7184_s4 + $0x488] sm:$0xff]  ;;  %v2865_v0 = vld [vmem:[%s7184_s4 + $0x4d8] sm:$0xff]  ;;  %v1175_v18 = vld [vmem:[%s7184_s4 + $0x1b0] sm:$0xff] }
  0x6b   : > { %6606 = vmatpush3.bf16.msra.mxu0 %v6603_v17  ;;  %6416 = vmatprep.subr.bf16.mxu1 %v6415_v10  ;;  %v3093_v17 = vld [vmem:[%s7184_s4 + $0x4e0] sm:$0xff] }
  0x6c   : > { %5639 = vmatmul.mubr.msk.f32.gmra.mrb[10].mxu1 %vm288_vm1, %v7350_v26  ;;  %6608 = vmatprep.subr.bf16.mxu0 %v6607_v11  ;;  %v6611_v26 = vpack.c.bf16 %v2854_v23, %v2853_v22  ;;  %v3095_v22 = vld [vmem:[%s7184_s4 + $0x4f0] sm:$0xff]  ;;  %v3096_v23 = vld [vmem:[%s7184_s4 + $0x4f8] sm:$0xff]  ;;  %v4683_v1 = vld [vmem:[%s7217_s6 + $0x4] sm:$0xff] }
  0x6d   : > { %6039 = vmatmul.mubr.msk.f32.gmra.mrb[10].mxu0 %vm288_vm1, %v7371_v34  ;;  %5641 = vmatprep.mubr.msk.f32.mxu1 %vm288_vm1, %v7368_v33  ;;  %v2856_v33 = vld [vmem:[%s7184_s4 + $0x490] sm:$0xff] }
  0x6e   : > { %6041 = vmatprep.mubr.msk.f32.mxu0 %vm288_vm1, %v7383_v38  ;;  %6418 = vmatpush3.bf16.msra.mxu1 %v6415_v10  ;;  %v4882_v34 = vld [vmem:[%s7217_s6 + $0x12] sm:$0xff]  ;;  %v6615_v37 = vpack.c.bf16 %v2856_v33, %v2855_v32  ;;  %v6635_v10 = vpack.c.bf16 %v3094_v7, %v3093_v17  ;;  %v3098_v32 = vld [vmem:[%s7184_s4 + $0x508] sm:$0xff]  ;;  %v1416_v7 = vld [vmem:[%s7184_s4 + $0x220] sm:$0xff] }
  0x6f   : > { %6610 = vmatpush3.bf16.msra.mxu0 %v6607_v11  ;;  %5671 = vmatprep.subr.mxu1 %v705_v13  ;;  %v937_v38 = vld [vmem:[%s7184_s4 + $0x158] sm:$0xff]  ;;  %v4896_v11 = vld [vmem:[%s7217_s6 + $0x82] sm:$0xff] }
  0x70   : > { %5642 = vmatmul.mubr.msk.f32.gmra.mrb[12].mxu1 %vm288_vm1, %v7374_v36  ;;  %6071 = vmatprep.subr.mxu0 %v2625_v21  ;;  %v4883_v36 = vld [vmem:[%s7217_s6 + $0x1a] sm:$0xff]  ;;  %v4917_v33 = vld [vmem:[%s7217_s6 + $0x23] sm:$0xff] }
  0x71   : > { %6042 = vmatmul.mubr.msk.f32.gmra.mrb[12].mxu0 %vm288_vm1, %v7391_v40  ;;  %5644 = vmatprep.mubr.msk.f32.mxu1 %vm288_vm1, %v7388_v39  ;;  %v938_v39 = vld [vmem:[%s7184_s4 + $0x160] sm:$0xff]  ;;  %v2857_v40 = vld [vmem:[%s7184_s4 + $0x498] sm:$0xff] }
  0x72   : > { %6044 = vmatprep.mubr.msk.f32.mxu0 %vm288_vm1, %v7409_v50  ;;  %5672 = vmatpush3.msra.mxu1 %v705_v13  ;;  %v6427_v43 = vpack.c.bf16 %v938_v39, %v937_v38  ;;  %v2859_v50 = vld [vmem:[%s7184_s4 + $0x4a8] sm:$0xff]  ;;  %v1180_v38 = vld [vmem:[%s7184_s4 + $0x1d8] sm:$0xff]  ;;  %v3099_v39 = vld [vmem:[%s7184_s4 + $0x510] sm:$0xff] }
  0x73   : > { %6072 = vmatpush3.msra.mxu0 %v2625_v21  ;;  %6420 = vmatprep.subr.bf16.mxu1 %v6419_v24  ;;  %v6623_v59 = vpack.c.bf16 %v2860_v51, %v2859_v50  ;;  %v4650_v13 = vld [vmem:[%s7217_s6 + $0x3] sm:$0xff]  ;;  %v1176_v21 = vld [vmem:[%s7184_s4 + $0x1b8] sm:$0xff] }
  0x74   : > { %5645 = vmatmul.mubr.msk.f32.gmra.mrb[14].mxu1 %vm288_vm1, %v7394_v41  ;;  %6612 = vmatprep.subr.bf16.mxu0 %v6611_v26  ;;  %v2858_v41 = vld [vmem:[%s7184_s4 + $0x4a0] sm:$0xff]  ;;  %v3102_v50 = vld [vmem:[%s7184_s4 + $0x528] sm:$0xff]  ;;  %v1415_v17 = vld [vmem:[%s7184_s4 + $0x218] sm:$0xff] }
  0x75   : > { %6045 = vmatmul.mubr.msk.f32.gmra.mrb[14].mxu0 %vm288_vm1, %v4863_v27  ;;  %5673 = vmatprep.mubr.msk.f32.mxu1 %vm288_vm1, %v4617_v28  ;;  %v6619_v46 = vpack.c.bf16 %v2858_v41, %v2857_v40  ;;  %v4916_v27 = vld [vmem:[%s7217_s6 + $0x1b] sm:$0xff]  ;;  %v6639_v28 = vpack.c.bf16 %v3096_v23, %v3095_v22  ;;  %v4919_v41 = vld [vmem:[%s7217_s6 + $0x33] sm:$0xff]  ;;  %v4921_v51 = vld [vmem:[%s7217_s6 + $0x43] sm:$0xff] }
  0x76   : > { %6073 = vmatprep.mubr.msk.f32.mxu0 %vm288_vm1, %v4881_v29  ;;  %v3100_v40 = vld [vmem:[%s7184_s4 + $0x518] sm:$0xff]  ;;  %v3338_v22 = vld [vmem:[%s7184_s4 + $0x570] sm:$0xff]  ;;  %v4950_v23 = vld [vmem:[%s7217_s6 + $0x24] sm:$0xff] }
  0x78   : > { %5674 = vmatmul.mubr.msk.f32.vlgmr.msra.gmra.mrb[0].mxu1 %vm288_vm1, %v4881_v29  ;;  %v1177_v29 = vld [vmem:[%s7184_s4 + $0x1c0] sm:$0xff] }
  0x79   : > { %6074 = vmatmul.mubr.msk.f32.vlgmr.msra.gmra.mrb[0].mxu0 %vm288_vm1, %v4882_v34  ;;  %6422 = vmatpush3.bf16.msra.mxu1 %v6419_v24  ;;  %v4915_v24 = vld [vmem:[%s7217_s6 + $0x13] sm:$0xff] }
  0x7a   : > { %6614 = vmatpush3.bf16.msra.mxu0 %v6611_v26  ;;  %5676 = vmatprep.mubr.msk.f32.mxu1 %vm288_vm1, %v4882_v34  ;;  %v6447_v26 = vpack.c.bf16 %v1176_v21, %v1175_v18  ;;  %v6451_v34 = vpack.c.bf16 %v1178_v30, %v1177_v29  ;;  %v1418_v18 = vld [vmem:[%s7184_s4 + $0x230] sm:$0xff]  ;;  %v3337_v21 = vld [vmem:[%s7184_s4 + $0x568] sm:$0xff]  ;;  %v1420_v29 = vld [vmem:[%s7184_s4 + $0x240] sm:$0xff] }
  0x7b   : > { %6076 = vmatprep.mubr.msk.f32.mxu0 %vm288_vm1, %v4883_v36  ;;  %6424 = vmatprep.subr.bf16.mxu1 %v6423_v35  ;;  %v3339_v30 = vld [vmem:[%s7184_s4 + $0x578] sm:$0xff] }
  0x7c   : > { %5677 = vmatmul.mubr.msk.f32.gmra.mrb[2].mxu1 %vm288_vm1, %v4883_v36  ;;  %6616 = vmatprep.subr.bf16.mxu0 %v6615_v37  ;;  %v6643_v36 = vpack.c.bf16 %v3098_v32, %v3097_v31  ;;  %v3340_v31 = vld [vmem:[%s7184_s4 + $0x580] sm:$0xff]  ;;  %v4952_v32 = vld [vmem:[%s7217_s6 + $0x34] sm:$0xff] }
  0x7d   : > { %6077 = vmatmul.mubr.msk.f32.gmra.mrb[2].mxu0 %vm288_vm1, %v4884_v42  ;;  %6426 = vmatpush3.bf16.msra.mxu1 %v6423_v35  ;;  %v4918_v35 = vld [vmem:[%s7217_s6 + $0x2b] sm:$0xff] }
  0x7e   : > { %6618 = vmatpush3.bf16.msra.mxu0 %v6615_v37  ;;  %5679 = vmatprep.mubr.msk.f32.mxu1 %vm288_vm1, %v4884_v42  ;;  %v1179_v37 = vld [vmem:[%s7184_s4 + $0x1d0] sm:$0xff]  ;;  %v4920_v42 = vld [vmem:[%s7217_s6 + $0x3b] sm:$0xff] }
  0x7f   : > { %6079 = vmatprep.mubr.msk.f32.mxu0 %vm288_vm1, %v4885_v44  ;;  %6428 = vmatprep.subr.bf16.mxu1 %v6427_v43 }
  0x80   : > { %5680 = vmatmul.mubr.msk.f32.gmra.mrb[4].mxu1 %vm288_vm1, %v4885_v44  ;;  %6620 = vmatprep.subr.bf16.mxu0 %v6619_v46  ;;  %v6647_v44 = vpack.c.bf16 %v3100_v40, %v3099_v39  ;;  %v3342_v39 = vld [vmem:[%s7184_s4 + $0x590] sm:$0xff]  ;;  %v4954_v40 = vld [vmem:[%s7217_s6 + $0x44] sm:$0xff] }
  0x81   : > { %6080 = vmatmul.mubr.msk.f32.gmra.mrb[4].mxu0 %vm288_vm1, %v4886_v52  ;;  %5682 = vmatprep.mubr.msk.f32.mxu1 %vm288_vm1, %v4886_v52  ;;  %v4922_v52 = vld [vmem:[%s7217_s6 + $0x4b] sm:$0xff] }
  0x82   : > { %6430 = vmatpush3.bf16.msra.mxu1 %v6427_v43  ;;  %6082 = vmatprep.mubr.msk.f32.mxu0 %vm288_vm1, %v4887_v56  ;;  %v6455_v43 = vpack.c.bf16 %v1180_v38, %v1179_v37  ;;  %v1422_v37 = vld [vmem:[%s7184_s4 + $0x250] sm:$0xff]  ;;  %v3341_v38 = vld [vmem:[%s7184_s4 + $0x588] sm:$0xff] }
  0x83   : > { %6622 = vmatpush3.bf16.msra.mxu0 %v6619_v46  ;;  %6432 = vmatprep.subr.bf16.mxu1 %v6431_v58  ;;  %v1181_v46 = vld [vmem:[%s7184_s4 + $0x1e0] sm:$0xff] }
  0x84   : > { %5683 = vmatmul.mubr.msk.f32.gmra.mrb[6].mxu1 %vm288_vm1, %v4887_v56  ;;  %6624 = vmatprep.subr.bf16.mxu0 %v6623_v59  ;;  %v6459_v56 = vpack.c.bf16 %v1182_v48, %v1181_v46  ;;  %v1424_v46 = vld [vmem:[%s7184_s4 + $0x260] sm:$0xff]  ;;  %v3343_v48 = vld [vmem:[%s7184_s4 + $0x598] sm:$0xff] }
  0x85   : > { %6083 = vmatmul.mubr.msk.f32.gmra.mrb[6].mxu0 %vm288_vm1, %v4888_v4  ;;  %5685 = vmatprep.mubr.msk.f32.mxu1 %vm288_vm1, %v4888_v4  ;;  %v4924_v4 = vld [vmem:[%s7217_s6 + $0x5b] sm:$0xff] }
  0x86   : > { %6434 = vmatpush3.bf16.msra.mxu1 %v6431_v58  ;;  %6085 = vmatprep.mubr.msk.f32.mxu0 %vm288_vm1, %v4889_v5  ;;  %v6651_v58 = vpack.c.bf16 %v3102_v50, %v3101_v49  ;;  %v3344_v49 = vld [vmem:[%s7184_s4 + $0x5a0] sm:$0xff]  ;;  %v4956_v50 = vld [vmem:[%s7217_s6 + $0x54] sm:$0xff] }
  0x87   : > { %6626 = vmatpush3.bf16.msra.mxu0 %v6623_v59  ;;  %6436 = vmatprep.subr.bf16.mxu1 %v6435_v6  ;;  %v1183_v59 = vld [vmem:[%s7184_s4 + $0x1f0] sm:$0xff] }
  0x88   : > { %5686 = vmatmul.mubr.msk.f32.gmra.mrb[8].mxu1 %vm288_vm1, %v4889_v5  ;;  %6628 = vmatprep.subr.bf16.mxu0 %v6627_v8  ;;  %v6463_v5 = vpack.c.bf16 %v1184_v60, %v1183_v59  ;;  %v4959_v59 = vld [vmem:[%s7217_s6 + $0x6c] sm:$0xff] }
  0x89   : > { %6086 = vmatmul.mubr.msk.f32.gmra.mrb[8].mxu0 %vm288_vm1, %v4890_v12  ;;  %5688 = vmatprep.mubr.msk.f32.mxu1 %vm288_vm1, %v4890_v12  ;;  %v3105_v12 = vld [vmem:[%s7184_s4 + $0x540] sm:$0xff]  ;;  %v1425_v60 = vld [vmem:[%s7184_s4 + $0x268] sm:$0xff] }
  0x8a   : > { %6088 = vmatprep.mubr.msk.f32.mxu0 %vm288_vm1, %v4891_v47  ;;  %6438 = vmatpush3.bf16.msra.mxu1 %v6435_v6  ;;  %v6655_v6 = vpack.c.bf16 %v3104_v62, %v3103_v61  ;;  %v1653_v61 = vld [vmem:[%s7184_s4 + $0x270] sm:$0xff]  ;;  %v1654_v62 = vld [vmem:[%s7184_s4 + $0x278] sm:$0xff] }
  0x8b   : > { %6630 = vmatpush3.bf16.msra.mxu0 %v6627_v8  ;;  %6440 = vmatprep.subr.bf16.mxu1 %v6439_v14  ;;  %v4925_v8 = vld [vmem:[%s7217_s6 + $0x63] sm:$0xff] }
  0x8c   : > { %5689 = vmatmul.mubr.msk.f32.gmra.mrb[10].mxu1 %vm288_vm1, %v4891_v47  ;;  %6632 = vmatprep.subr.bf16.mxu0 %v6631_v54  ;;  %v3333_v47 = vld [vmem:[%s7184_s4 + $0x548] sm:$0xff] }
  0x8d   : > { %6089 = vmatmul.mubr.msk.f32.gmra.mrb[10].mxu0 %vm288_vm1, %v4892_v55  ;;  %5691 = vmatprep.mubr.msk.f32.mxu1 %vm288_vm1, %v4892_v55  ;;  %v4928_v55 = vld [vmem:[%s7217_s6 + $0x7b] sm:$0xff] }
  0x8e   : > { %6091 = vmatprep.mubr.msk.f32.mxu0 %vm288_vm1, %v4893_v63  ;;  %6442 = vmatpush3.bf16.msra.mxu1 %v6439_v14  ;;  %v3334_v14 = vld [vmem:[%s7184_s4 + $0x550] sm:$0xff] }
  0x8f   : > { %6634 = vmatpush3.bf16.msra.mxu0 %v6631_v54  ;;  %5721 = vmatprep.subr.mxu1 %v945_v16  ;;  %v4927_v54 = vld [vmem:[%s7217_s6 + $0x73] sm:$0xff] }
  0x90   : > { %5692 = vmatmul.mubr.msk.f32.gmra.mrb[12].mxu1 %vm288_vm1, %v4893_v63  ;;  %6121 = vmatprep.subr.mxu0 %v2865_v0  ;;  %v6467_v63 = vpack.c.bf16 %v1414_v53, %v1413_v45  ;;  %v4962_v45 = vld [vmem:[%s7217_s6 + $0x84] sm:$0xff] }
  0x91   : > { %6092 = vmatmul.mubr.msk.f32.gmra.mrb[12].mxu0 %vm288_vm1, %v4894_v19  ;;  %5694 = vmatprep.mubr.msk.f32.mxu1 %vm288_vm1, %v4894_v19  ;;  %v3335_v19 = vld [vmem:[%s7184_s4 + $0x558] sm:$0xff]  ;;  %v4716_v53 = vld [vmem:[%s7217_s6 + $0x5] sm:$0xff] }
  0x92   : > { %6094 = vmatprep.mubr.msk.f32.mxu0 %vm288_vm1, %v4895_v3  ;;  %5722 = vmatpush3.msra.mxu1 %v945_v16  ;;  %v6659_v16 = vpack.c.bf16 %v3334_v14, %v3333_v47  ;;  %v1655_v47 = vld [vmem:[%s7184_s4 + $0x280] sm:$0xff]  ;;  %v1656_v14 = vld [vmem:[%s7184_s4 + $0x288] sm:$0xff] }
  0x93   : > { %6122 = vmatpush3.msra.mxu0 %v2865_v0  ;;  %6444 = vmatprep.subr.bf16.mxu1 %v6443_v20  ;;  %v4947_v0 = vld [vmem:[%s7217_s6 + $0xc] sm:$0xff] }
  0x94   : > { %5695 = vmatmul.mubr.msk.f32.gmra.mrb[14].mxu1 %vm288_vm1, %v4895_v3  ;;  %6636 = vmatprep.subr.bf16.mxu0 %v6635_v10  ;;  %v3336_v3 = vld [vmem:[%s7184_s4 + $0x560] sm:$0xff] }
  0x95   : > { %6095 = vmatmul.mubr.msk.f32.gmra.mrb[14].mxu0 %vm288_vm1, %v4896_v11  ;;  %5723 = vmatprep.mubr.msk.f32.mxu1 %vm288_vm1, %v4650_v13  ;;  %v4949_v11 = vld [vmem:[%s7217_s6 + $0x1c] sm:$0xff]  ;;  %v6663_v13 = vpack.c.bf16 %v3336_v3, %v3335_v19  ;;  %v4983_v3 = vld [vmem:[%s7217_s6 + $0x25] sm:$0xff] }
  0x96   : > { %6123 = vmatprep.mubr.msk.f32.mxu0 %vm288_vm1, %v4914_v15  ;;  %v3578_v19 = vld [vmem:[%s7184_s4 + $0x5d8] sm:$0xff] }
  0x98   : > { %5724 = vmatmul.mubr.msk.f32.vlgmr.msra.gmra.mrb[0].mxu1 %vm288_vm1, %v4914_v15  ;;  %v1417_v15 = vld [vmem:[%s7184_s4 + $0x228] sm:$0xff] }
  0x99   : > { %6124 = vmatmul.mubr.msk.f32.vlgmr.msra.gmra.mrb[0].mxu0 %vm288_vm1, %v4915_v24  ;;  %6446 = vmatpush3.bf16.msra.mxu1 %v6443_v20  ;;  %v4948_v20 = vld [vmem:[%s7217_s6 + $0x14] sm:$0xff] }
  0x9a   : > { %6638 = vmatpush3.bf16.msra.mxu0 %v6635_v10  ;;  %5726 = vmatprep.mubr.msk.f32.mxu1 %vm288_vm1, %v4915_v24  ;;  %v6471_v10 = vpack.c.bf16 %v1416_v7, %v1415_v17  ;;  %v6475_v24 = vpack.c.bf16 %v1418_v18, %v1417_v15  ;;  %v1658_v17 = vld [vmem:[%s7184_s4 + $0x298] sm:$0xff]  ;;  %v3577_v7 = vld [vmem:[%s7184_s4 + $0x5d0] sm:$0xff]  ;;  %v1660_v15 = vld [vmem:[%s7184_s4 + $0x2a8] sm:$0xff] }
  0x9b   : > { %6126 = vmatprep.mubr.msk.f32.mxu0 %vm288_vm1, %v4916_v27  ;;  %6448 = vmatprep.subr.bf16.mxu1 %v6447_v26  ;;  %v3579_v18 = vld [vmem:[%s7184_s4 + $0x5e0] sm:$0xff] }
  0x9c   : > { %5727 = vmatmul.mubr.msk.f32.gmra.mrb[2].mxu1 %vm288_vm1, %v4916_v27  ;;  %6640 = vmatprep.subr.bf16.mxu0 %v6639_v28  ;;  %v6667_v27 = vpack.c.bf16 %v3338_v22, %v3337_v21  ;;  %v3580_v21 = vld [vmem:[%s7184_s4 + $0x5e8] sm:$0xff]  ;;  %v4985_v22 = vld [vmem:[%s7217_s6 + $0x35] sm:$0xff] }
  0x9d   : > { %6127 = vmatmul.mubr.msk.f32.gmra.mrb[2].mxu0 %vm288_vm1, %v4917_v33  ;;  %6450 = vmatpush3.bf16.msra.mxu1 %v6447_v26  ;;  %v4951_v26 = vld [vmem:[%s7217_s6 + $0x2c] sm:$0xff] }
  0x9e   : > { %6642 = vmatpush3.bf16.msra.mxu0 %v6639_v28  ;;  %5729 = vmatprep.mubr.msk.f32.mxu1 %vm288_vm1, %v4917_v33  ;;  %v1419_v28 = vld [vmem:[%s7184_s4 + $0x238] sm:$0xff] }
  0x9f   : > { %6129 = vmatprep.mubr.msk.f32.mxu0 %vm288_vm1, %v4918_v35  ;;  %6452 = vmatprep.subr.bf16.mxu1 %v6451_v34  ;;  %v4953_v33 = vld [vmem:[%s7217_s6 + $0x3c] sm:$0xff] }
  0xa0   : > { %5730 = vmatmul.mubr.msk.f32.gmra.mrb[4].mxu1 %vm288_vm1, %v4918_v35  ;;  %6644 = vmatprep.subr.bf16.mxu0 %v6643_v36  ;;  %v6671_v35 = vpack.c.bf16 %v3340_v31, %v3339_v30  ;;  %v3582_v30 = vld [vmem:[%s7184_s4 + $0x5f8] sm:$0xff]  ;;  %v4987_v31 = vld [vmem:[%s7217_s6 + $0x45] sm:$0xff] }
  0xa1   : > { %6130 = vmatmul.mubr.msk.f32.gmra.mrb[4].mxu0 %vm288_vm1, %v4919_v41  ;;  %5732 = vmatprep.mubr.msk.f32.mxu1 %vm288_vm1, %v4919_v41  ;;  %v4955_v41 = vld [vmem:[%s7217_s6 + $0x4c] sm:$0xff] }
  0xa2   : > { %6454 = vmatpush3.bf16.msra.mxu1 %v6451_v34  ;;  %6132 = vmatprep.mubr.msk.f32.mxu0 %vm288_vm1, %v4920_v42  ;;  %v6479_v34 = vpack.c.bf16 %v1420_v29, %v1419_v28  ;;  %v1662_v28 = vld [vmem:[%s7184_s4 + $0x2b8] sm:$0xff]  ;;  %v3581_v29 = vld [vmem:[%s7184_s4 + $0x5f0] sm:$0xff] }
  0xa3   : > { %6646 = vmatpush3.bf16.msra.mxu0 %v6643_v36  ;;  %6456 = vmatprep.subr.bf16.mxu1 %v6455_v43  ;;  %v1421_v36 = vld [vmem:[%s7184_s4 + $0x248] sm:$0xff] }
  0xa4   : > { %5733 = vmatmul.mubr.msk.f32.gmra.mrb[6].mxu1 %vm288_vm1, %v4920_v42  ;;  %6648 = vmatprep.subr.bf16.mxu0 %v6647_v44  ;;  %v6483_v42 = vpack.c.bf16 %v1422_v37, %v1421_v36  ;;  %v1664_v36 = vld [vmem:[%s7184_s4 + $0x2c8] sm:$0xff]  ;;  %v3583_v37 = vld [vmem:[%s7184_s4 + $0x600] sm:$0xff] }
  0xa5   : > { %6133 = vmatmul.mubr.msk.f32.gmra.mrb[6].mxu0 %vm288_vm1, %v4921_v51  ;;  %5735 = vmatprep.mubr.msk.f32.mxu1 %vm288_vm1, %v4921_v51  ;;  %v4957_v51 = vld [vmem:[%s7217_s6 + $0x5c] sm:$0xff] }
  0xa6   : > { %6458 = vmatpush3.bf16.msra.mxu1 %v6455_v43  ;;  %6135 = vmatprep.mubr.msk.f32.mxu0 %vm288_vm1, %v4922_v52  ;;  %v6675_v43 = vpack.c.bf16 %v3342_v39, %v3341_v38  ;;  %v3584_v38 = vld [vmem:[%s7184_s4 + $0x608] sm:$0xff]  ;;  %v4989_v39 = vld [vmem:[%s7217_s6 + $0x55] sm:$0xff] }
  0xa7   : > { %6650 = vmatpush3.bf16.msra.mxu0 %v6647_v44  ;;  %6460 = vmatprep.subr.bf16.mxu1 %v6459_v56  ;;  %v1423_v44 = vld [vmem:[%s7184_s4 + $0x258] sm:$0xff] }
  0xa8   : > { %5736 = vmatmul.mubr.msk.f32.gmra.mrb[8].mxu1 %vm288_vm1, %v4922_v52  ;;  %6652 = vmatprep.subr.bf16.mxu0 %v6651_v58  ;;  %v6487_v52 = vpack.c.bf16 %v1424_v46, %v1423_v44  ;;  %v4992_v44 = vld [vmem:[%s7217_s6 + $0x6d] sm:$0xff] }
  0xa9   : > { %6136 = vmatmul.mubr.msk.f32.gmra.mrb[8].mxu0 %vm288_vm1, %v4923_v2  ;;  %5738 = vmatprep.mubr.msk.f32.mxu1 %vm288_vm1, %v4923_v2  ;;  %v3345_v2 = vld [vmem:[%s7184_s4 + $0x5a8] sm:$0xff]  ;;  %v1665_v46 = vld [vmem:[%s7184_s4 + $0x2d0] sm:$0xff] }
  0xaa   : > { %6138 = vmatprep.mubr.msk.f32.mxu0 %vm288_vm1, %v4924_v4  ;;  %6462 = vmatpush3.bf16.msra.mxu1 %v6459_v56  ;;  %v6679_v56 = vpack.c.bf16 %v3344_v49, %v3343_v48  ;;  %v1893_v48 = vld [vmem:[%s7184_s4 + $0x2d8] sm:$0xff]  ;;  %v1894_v49 = vld [vmem:[%s7184_s4 + $0x2e0] sm:$0xff] }
  0xab   : > { %6654 = vmatpush3.bf16.msra.mxu0 %v6651_v58  ;;  %6464 = vmatprep.subr.bf16.mxu1 %v6463_v5  ;;  %v4958_v58 = vld [vmem:[%s7217_s6 + $0x64] sm:$0xff] }
  0xac   : > { %5739 = vmatmul.mubr.msk.f32.gmra.mrb[10].mxu1 %vm288_vm1, %v4924_v4  ;;  %6656 = vmatprep.subr.bf16.mxu0 %v6655_v6  ;;  %v3573_v4 = vld [vmem:[%s7184_s4 + $0x5b0] sm:$0xff] }
  0xad   : > { %6139 = vmatmul.mubr.msk.f32.gmra.mrb[10].mxu0 %vm288_vm1, %v4925_v8  ;;  %5741 = vmatprep.mubr.msk.f32.mxu1 %vm288_vm1, %v4925_v8  ;;  %v4961_v8 = vld [vmem:[%s7217_s6 + $0x7c] sm:$0xff] }
  0xae   : > { %6141 = vmatprep.mubr.msk.f32.mxu0 %vm288_vm1, %v4926_v9  ;;  %6466 = vmatpush3.bf16.msra.mxu1 %v6463_v5  ;;  %v3574_v5 = vld [vmem:[%s7184_s4 + $0x5b8] sm:$0xff] }
  0xaf   : > { %6658 = vmatpush3.bf16.msra.mxu0 %v6655_v6  ;;  %5771 = vmatprep.subr.mxu1 %v1185_v25  ;;  %v4960_v6 = vld [vmem:[%s7217_s6 + $0x74] sm:$0xff] }
  0xb0   : > { %5742 = vmatmul.mubr.msk.f32.gmra.mrb[12].mxu1 %vm288_vm1, %v4926_v9  ;;  %6171 = vmatprep.subr.mxu0 %v3105_v12  ;;  %v6491_v9 = vpack.c.bf16 %v1654_v62, %v1653_v61  ;;  %v4995_v61 = vld [vmem:[%s7217_s6 + $0x85] sm:$0xff] }
  0xb1   : > { %6142 = vmatmul.mubr.msk.f32.gmra.mrb[12].mxu0 %vm288_vm1, %v4927_v54  ;;  %5744 = vmatprep.mubr.msk.f32.mxu1 %vm288_vm1, %v4927_v54  ;;  %v3575_v54 = vld [vmem:[%s7184_s4 + $0x5c0] sm:$0xff] }
  0xb2   : > { %6144 = vmatprep.mubr.msk.f32.mxu0 %vm288_vm1, %v4928_v55  ;;  %5772 = vmatpush3.msra.mxu1 %v1185_v25  ;;  %v6683_v25 = vpack.c.bf16 %v3574_v5, %v3573_v4  ;;  %v4749_v62 = vld [vmem:[%s7217_s6 + $0x6] sm:$0xff]  ;;  %v1896_v5 = vld [vmem:[%s7184_s4 + $0x2f0] sm:$0xff] }
  0xb3   : > { %6172 = vmatpush3.msra.mxu0 %v3105_v12  ;;  %6468 = vmatprep.subr.bf16.mxu1 %v6467_v63  ;;  %v4980_v12 = vld [vmem:[%s7217_s6 + $0xd] sm:$0xff] }
  0xb4   : > { %5745 = vmatmul.mubr.msk.f32.gmra.mrb[14].mxu1 %vm288_vm1, %v4928_v55  ;;  %6660 = vmatprep.subr.bf16.mxu0 %v6659_v16  ;;  %v3576_v55 = vld [vmem:[%s7184_s4 + $0x5c8] sm:$0xff] }
  0xb5   : > { %6145 = vmatmul.mubr.msk.f32.gmra.mrb[14].mxu0 %vm288_vm1, %v4929_v57  ;;  %5773 = vmatprep.mubr.msk.f32.mxu1 %vm288_vm1, %v4683_v1  ;;  %v4982_v57 = vld [vmem:[%s7217_s6 + $0x1d] sm:$0xff]  ;;  %v6687_v1 = vpack.c.bf16 %v3576_v55, %v3575_v54  ;;  %v1895_v4 = vld [vmem:[%s7184_s4 + $0x2e8] sm:$0xff] }
  0xb6   : > { %6173 = vmatprep.mubr.msk.f32.mxu0 %vm288_vm1, %v4947_v0  ;;  %v3818_v54 = vld [vmem:[%s7184_s4 + $0x640] sm:$0xff] }
  0xb7   : > { %v5016_v55 = vld [vmem:[%s7217_s6 + $0x26] sm:$0xff] }
  0xb8   : > { %5774 = vmatmul.mubr.msk.f32.vlgmr.msra.gmra.mrb[0].mxu1 %vm288_vm1, %v4947_v0  ;;  %v1657_v0 = vld [vmem:[%s7184_s4 + $0x290] sm:$0xff] }
  0xb9   : > { %6174 = vmatmul.mubr.msk.f32.vlgmr.msra.gmra.mrb[0].mxu0 %vm288_vm1, %v4948_v20  ;;  %6470 = vmatpush3.bf16.msra.mxu1 %v6467_v63  ;;  %v4981_v63 = vld [vmem:[%s7217_s6 + $0x15] sm:$0xff] }
  0xba   : > { %6662 = vmatpush3.bf16.msra.mxu0 %v6659_v16  ;;  %5776 = vmatprep.mubr.msk.f32.mxu1 %vm288_vm1, %v4948_v20  ;;  %v6495_v16 = vpack.c.bf16 %v1656_v14, %v1655_v47  ;;  %v6499_v20 = vpack.c.bf16 %v1658_v17, %v1657_v0  ;;  %v1898_v47 = vld [vmem:[%s7184_s4 + $0x300] sm:$0xff]  ;;  %v3817_v14 = vld [vmem:[%s7184_s4 + $0x638] sm:$0xff]  ;;  %v1900_v0 = vld [vmem:[%s7184_s4 + $0x310] sm:$0xff] }
  0xbb   : > { %6176 = vmatprep.mubr.msk.f32.mxu0 %vm288_vm1, %v4949_v11  ;;  %6472 = vmatprep.subr.bf16.mxu1 %v6471_v10  ;;  %v3819_v17 = vld [vmem:[%s7184_s4 + $0x648] sm:$0xff] }
  0xbc   : > { %5777 = vmatmul.mubr.msk.f32.gmra.mrb[2].mxu1 %vm288_vm1, %v4949_v11  ;;  %6664 = vmatprep.subr.bf16.mxu0 %v6663_v13  ;;  %v6691_v11 = vpack.c.bf16 %v3578_v19, %v3577_v7  ;;  %v3820_v7 = vld [vmem:[%s7184_s4 + $0x650] sm:$0xff] }
  0xbd   : > { %6177 = vmatmul.mubr.msk.f32.gmra.mrb[2].mxu0 %vm288_vm1, %v4950_v23  ;;  %6474 = vmatpush3.bf16.msra.mxu1 %v6471_v10  ;;  %v4984_v10 = vld [vmem:[%s7217_s6 + $0x2d] sm:$0xff]  ;;  %v5018_v19 = vld [vmem:[%s7217_s6 + $0x36] sm:$0xff] }
  0xbe   : > { %6666 = vmatpush3.bf16.msra.mxu0 %v6663_v13  ;;  %5779 = vmatprep.mubr.msk.f32.mxu1 %vm288_vm1, %v4950_v23  ;;  %v1659_v13 = vld [vmem:[%s7184_s4 + $0x2a0] sm:$0xff] }
  0xbf   : > { %6179 = vmatprep.mubr.msk.f32.mxu0 %vm288_vm1, %v4951_v26  ;;  %6476 = vmatprep.subr.bf16.mxu1 %v6475_v24  ;;  %v4986_v23 = vld [vmem:[%s7217_s6 + $0x3d] sm:$0xff] }
  0xc0   : > { %5780 = vmatmul.mubr.msk.f32.gmra.mrb[4].mxu1 %vm288_vm1, %v4951_v26  ;;  %6668 = vmatprep.subr.bf16.mxu0 %v6667_v27  ;;  %v6695_v26 = vpack.c.bf16 %v3580_v21, %v3579_v18  ;;  %v3822_v18 = vld [vmem:[%s7184_s4 + $0x660] sm:$0xff] }
  0xc1   : > { %6180 = vmatmul.mubr.msk.f32.gmra.mrb[4].mxu0 %vm288_vm1, %v4952_v32  ;;  %5782 = vmatprep.mubr.msk.f32.mxu1 %vm288_vm1, %v4952_v32  ;;  %v4988_v32 = vld [vmem:[%s7217_s6 + $0x4d] sm:$0xff] }
  0xc2   : > { %6478 = vmatpush3.bf16.msra.mxu1 %v6475_v24  ;;  %6182 = vmatprep.mubr.msk.f32.mxu0 %vm288_vm1, %v4953_v33  ;;  %v6503_v24 = vpack.c.bf16 %v1660_v15, %v1659_v13  ;;  %v1902_v13 = vld [vmem:[%s7184_s4 + $0x320] sm:$0xff]  ;;  %v3821_v15 = vld [vmem:[%s7184_s4 + $0x658] sm:$0xff] }
  0xc3   : > { %6670 = vmatpush3.bf16.msra.mxu0 %v6667_v27  ;;  %6480 = vmatprep.subr.bf16.mxu1 %v6479_v34  ;;  %v1661_v27 = vld [vmem:[%s7184_s4 + $0x2b0] sm:$0xff]  ;;  %v5020_v21 = vld [vmem:[%s7217_s6 + $0x46] sm:$0xff] }
  0xc4   : > { %5783 = vmatmul.mubr.msk.f32.gmra.mrb[6].mxu1 %vm288_vm1, %v4953_v33  ;;  %6672 = vmatprep.subr.bf16.mxu0 %v6671_v35  ;;  %v6507_v33 = vpack.c.bf16 %v1662_v28, %v1661_v27  ;;  %v1904_v27 = vld [vmem:[%s7184_s4 + $0x330] sm:$0xff]  ;;  %v3823_v28 = vld [vmem:[%s7184_s4 + $0x668] sm:$0xff] }
  0xc5   : > { %6183 = vmatmul.mubr.msk.f32.gmra.mrb[6].mxu0 %vm288_vm1, %v4954_v40  ;;  %5785 = vmatprep.mubr.msk.f32.mxu1 %vm288_vm1, %v4954_v40  ;;  %v4990_v40 = vld [vmem:[%s7217_s6 + $0x5d] sm:$0xff] }
  0xc6   : > { %6482 = vmatpush3.bf16.msra.mxu1 %v6479_v34  ;;  %6185 = vmatprep.mubr.msk.f32.mxu0 %vm288_vm1, %v4955_v41  ;;  %v6699_v34 = vpack.c.bf16 %v3582_v30, %v3581_v29  ;;  %v3824_v29 = vld [vmem:[%s7184_s4 + $0x670] sm:$0xff] }
  0xc7   : > { %6674 = vmatpush3.bf16.msra.mxu0 %v6671_v35  ;;  %6484 = vmatprep.subr.bf16.mxu1 %v6483_v42  ;;  %v1663_v35 = vld [vmem:[%s7184_s4 + $0x2c0] sm:$0xff]  ;;  %v5022_v30 = vld [vmem:[%s7217_s6 + $0x56] sm:$0xff] }
  0xc8   : > { %5786 = vmatmul.mubr.msk.f32.gmra.mrb[8].mxu1 %vm288_vm1, %v4955_v41  ;;  %6676 = vmatprep.subr.bf16.mxu0 %v6675_v43  ;;  %v6511_v41 = vpack.c.bf16 %v1664_v36, %v1663_v35  ;;  %v5025_v35 = vld [vmem:[%s7217_s6 + $0x6e] sm:$0xff]  ;;  %v1905_v36 = vld [vmem:[%s7184_s4 + $0x338] sm:$0xff] }
  0xc9   : > { %6186 = vmatmul.mubr.msk.f32.gmra.mrb[8].mxu0 %vm288_vm1, %v4956_v50  ;;  %5788 = vmatprep.mubr.msk.f32.mxu1 %vm288_vm1, %v4956_v50  ;;  %v3585_v50 = vld [vmem:[%s7184_s4 + $0x610] sm:$0xff] }
  0xca   : > { %6188 = vmatprep.mubr.msk.f32.mxu0 %vm288_vm1, %v4957_v51  ;;  %6486 = vmatpush3.bf16.msra.mxu1 %v6483_v42  ;;  %v6703_v42 = vpack.c.bf16 %v3584_v38, %v3583_v37  ;;  %v3825_v37 = vld [vmem:[%s7184_s4 + $0x678] sm:$0xff] }
  0xcb   : > { %6678 = vmatpush3.bf16.msra.mxu0 %v6675_v43  ;;  %6488 = vmatprep.subr.bf16.mxu1 %v6487_v52  ;;  %v4991_v43 = vld [vmem:[%s7217_s6 + $0x65] sm:$0xff]  ;;  %v5026_v38 = vld [vmem:[%s7217_s6 + $0x76] sm:$0xff] }
  0xcc   : > { %5789 = vmatmul.mubr.msk.f32.gmra.mrb[10].mxu1 %vm288_vm1, %v4957_v51  ;;  %6680 = vmatprep.subr.bf16.mxu0 %v6679_v56  ;;  %v3813_v51 = vld [vmem:[%s7184_s4 + $0x618] sm:$0xff] }
  0xcd   : > { %6189 = vmatmul.mubr.msk.f32.gmra.mrb[10].mxu0 %vm288_vm1, %v4958_v58  ;;  %5791 = vmatprep.mubr.msk.f32.mxu1 %vm288_vm1, %v4958_v58  ;;  %v4994_v58 = vld [vmem:[%s7217_s6 + $0x7d] sm:$0xff] }
  0xce   : > { %6191 = vmatprep.mubr.msk.f32.mxu0 %vm288_vm1, %v4959_v59  ;;  %6490 = vmatpush3.bf16.msra.mxu1 %v6487_v52  ;;  %v3814_v52 = vld [vmem:[%s7184_s4 + $0x620] sm:$0xff] }
  0xcf   : > { %6682 = vmatpush3.bf16.msra.mxu0 %v6679_v56  ;;  %5821 = vmatprep.subr.mxu1 %v1425_v60  ;;  %v4993_v56 = vld [vmem:[%s7217_s6 + $0x75] sm:$0xff] }
  0xd0   : > { %5792 = vmatmul.mubr.msk.f32.gmra.mrb[12].mxu1 %vm288_vm1, %v4959_v59  ;;  %6221 = vmatprep.subr.mxu0 %v3345_v2  ;;  %v6515_v59 = vpack.c.bf16 %v1894_v49, %v1893_v48  ;;  %v5050_v48 = vld [vmem:[%s7217_s6 + $0x2f] sm:$0xff]  ;;  %v5051_v49 = vld [vmem:[%s7217_s6 + $0x37] sm:$0xff] }
  0xd1   : > { %6192 = vmatmul.mubr.msk.f32.gmra.mrb[12].mxu0 %vm288_vm1, %v4960_v6  ;;  %5794 = vmatprep.mubr.msk.f32.mxu1 %vm288_vm1, %v4960_v6  ;;  %v3815_v6 = vld [vmem:[%s7184_s4 + $0x628] sm:$0xff] }
  0xd2   : > { %6194 = vmatprep.mubr.msk.f32.mxu0 %vm288_vm1, %v4961_v8  ;;  %5822 = vmatpush3.msra.mxu1 %v1425_v60  ;;  %v6707_v60 = vpack.c.bf16 %v3814_v52, %v3813_v51  ;;  %v5053_v51 = vld [vmem:[%s7217_s6 + $0x47] sm:$0xff]  ;;  %v5054_v52 = vld [vmem:[%s7217_s6 + $0x4f] sm:$0xff] }
  0xd3   : > { %6222 = vmatpush3.msra.mxu0 %v3345_v2  ;;  %6492 = vmatprep.subr.bf16.mxu1 %v6491_v9  ;;  %v5013_v2 = vld [vmem:[%s7217_s6 + $0xe] sm:$0xff] }
  0xd4   : > { %5795 = vmatmul.mubr.msk.f32.gmra.mrb[14].mxu1 %vm288_vm1, %v4961_v8  ;;  %6684 = vmatprep.subr.bf16.mxu0 %v6683_v25  ;;  %v3816_v8 = vld [vmem:[%s7184_s4 + $0x630] sm:$0xff] }
  0xd5   : > { %6195 = vmatmul.mubr.msk.f32.gmra.mrb[14].mxu0 %vm288_vm1, %v4962_v45  ;;  %5823 = vmatprep.mubr.msk.f32.mxu1 %vm288_vm1, %v4716_v53  ;;  %v5015_v45 = vld [vmem:[%s7217_s6 + $0x1e] sm:$0xff]  ;;  %v6711_v53 = vpack.c.bf16 %v3816_v8, %v3815_v6  ;;  %v4036_v6 = vld [vmem:[#allocation2 + $0x8] sm:$0xff] }
  0xd6   : > { %6223 = vmatprep.mubr.msk.f32.mxu0 %vm288_vm1, %v4980_v12 }
  0xd8   : > { %5824 = vmatmul.mubr.msk.f32.vlgmr.msra.gmra.mrb[0].mxu1 %vm288_vm1, %v4980_v12  ;;  %v1897_v12 = vld [vmem:[%s7184_s4 + $0x2f8] sm:$0xff] }
  0xd9   : > { %6224 = vmatmul.mubr.msk.f32.vlgmr.msra.gmra.mrb[0].mxu0 %vm288_vm1, %v4981_v63  ;;  %6494 = vmatpush3.bf16.msra.mxu1 %v6491_v9  ;;  %v5014_v9 = vld [vmem:[%s7217_s6 + $0x16] sm:$0xff] }
  0xda   : > { %6686 = vmatpush3.bf16.msra.mxu0 %v6683_v25  ;;  %5826 = vmatprep.mubr.msk.f32.mxu1 %vm288_vm1, %v4981_v63  ;;  %v6519_v25 = vpack.c.bf16 %v1896_v5, %v1895_v4  ;;  %v6523_v63 = vpack.c.bf16 %v1898_v47, %v1897_v12 }
  0xdb   : > { %6226 = vmatprep.mubr.msk.f32.mxu0 %vm288_vm1, %v4982_v57  ;;  %6496 = vmatprep.subr.bf16.mxu1 %v6495_v16 }
  0xdc   : > { %5827 = vmatmul.mubr.msk.f32.gmra.mrb[2].mxu1 %vm288_vm1, %v4982_v57  ;;  %6688 = vmatprep.subr.bf16.mxu0 %v6687_v1  ;;  %v6715_v57 = vpack.c.bf16 %v3818_v54, %v3817_v14 }
  0xdd   : > { %6227 = vmatmul.mubr.msk.f32.gmra.mrb[2].mxu0 %vm288_vm1, %v4983_v3  ;;  %6498 = vmatpush3.bf16.msra.mxu1 %v6495_v16  ;;  %v5017_v16 = vld [vmem:[%s7217_s6 + $0x2e] sm:$0xff] }
  0xde   : > { %6690 = vmatpush3.bf16.msra.mxu0 %v6687_v1  ;;  %5829 = vmatprep.mubr.msk.f32.mxu1 %vm288_vm1, %v4983_v3  ;;  %v1899_v1 = vld [vmem:[%s7184_s4 + $0x308] sm:$0xff]  ;;  %v5019_v3 = vld [vmem:[%s7217_s6 + $0x3e] sm:$0xff] }
  0xdf   : > { %6229 = vmatprep.mubr.msk.f32.mxu0 %vm288_vm1, %v4984_v10  ;;  %6500 = vmatprep.subr.bf16.mxu1 %v6499_v20 }
  0xe0   : > { %5830 = vmatmul.mubr.msk.f32.gmra.mrb[4].mxu1 %vm288_vm1, %v4984_v10  ;;  %6692 = vmatprep.subr.bf16.mxu0 %v6691_v11  ;;  %v6719_v10 = vpack.c.bf16 %v3820_v7, %v3819_v17 }
  0xe1   : > { %6230 = vmatmul.mubr.msk.f32.gmra.mrb[4].mxu0 %vm288_vm1, %v4985_v22  ;;  %5832 = vmatprep.mubr.msk.f32.mxu1 %vm288_vm1, %v4985_v22  ;;  %v5021_v22 = vld [vmem:[%s7217_s6 + $0x4e] sm:$0xff] }
  0xe2   : > { %6502 = vmatpush3.bf16.msra.mxu1 %v6499_v20  ;;  %6232 = vmatprep.mubr.msk.f32.mxu0 %vm288_vm1, %v4986_v23  ;;  %v6527_v20 = vpack.c.bf16 %v1900_v0, %v1899_v1  ;;  %v4037_v1 = vld [vmem:[#allocation2 + $0x10] sm:$0xff] }
  0xe3   : > { %6694 = vmatpush3.bf16.msra.mxu0 %v6691_v11  ;;  %6504 = vmatprep.subr.bf16.mxu1 %v6503_v24  ;;  %v1901_v11 = vld [vmem:[%s7184_s4 + $0x318] sm:$0xff] }
  0xe4   : > { %5833 = vmatmul.mubr.msk.f32.gmra.mrb[6].mxu1 %vm288_vm1, %v4986_v23  ;;  %6696 = vmatprep.subr.bf16.mxu0 %v6695_v26  ;;  %v6531_v23 = vpack.c.bf16 %v1902_v13, %v1901_v11 }
  0xe5   : > { %6233 = vmatmul.mubr.msk.f32.gmra.mrb[6].mxu0 %vm288_vm1, %v4987_v31  ;;  %5835 = vmatprep.mubr.msk.f32.mxu1 %vm288_vm1, %v4987_v31  ;;  %v5023_v31 = vld [vmem:[%s7217_s6 + $0x5e] sm:$0xff] }
  0xe6   : > { %6506 = vmatpush3.bf16.msra.mxu1 %v6503_v24  ;;  %6235 = vmatprep.mubr.msk.f32.mxu0 %vm288_vm1, %v4988_v32  ;;  %v6723_v24 = vpack.c.bf16 %v3822_v18, %v3821_v15  ;;  %v4039_v15 = vld [vmem:[#allocation2 + $0x20] sm:$0xff] }
  0xe7   : > { %6698 = vmatpush3.bf16.msra.mxu0 %v6695_v26  ;;  %6508 = vmatprep.subr.bf16.mxu1 %v6507_v33  ;;  %v1903_v26 = vld [vmem:[%s7184_s4 + $0x328] sm:$0xff] }
  0xe8   : > { %5836 = vmatmul.mubr.msk.f32.gmra.mrb[8].mxu1 %vm288_vm1, %v4988_v32  ;;  %6700 = vmatprep.subr.bf16.mxu0 %v6699_v34  ;;  %v6535_v32 = vpack.c.bf16 %v1904_v27, %v1903_v26  ;;  %v4042_v26 = vld [vmem:[#allocation2 + $0x38] sm:$0xff] }
  0xe9   : > { %6236 = vmatmul.mubr.msk.f32.gmra.mrb[8].mxu0 %vm288_vm1, %v4989_v39  ;;  %5838 = vmatprep.mubr.msk.f32.mxu1 %vm288_vm1, %v4989_v39  ;;  %v5027_v39 = vld [vmem:[%s7217_s6 + $0x7e] sm:$0xff] }
  0xea   : > { %6238 = vmatprep.mubr.msk.f32.mxu0 %vm288_vm1, %v4990_v40  ;;  %6510 = vmatpush3.bf16.msra.mxu1 %v6507_v33  ;;  %v6727_v33 = vpack.c.bf16 %v3824_v29, %v3823_v28 }
  0xeb   : > { %6702 = vmatpush3.bf16.msra.mxu0 %v6699_v34  ;;  %6512 = vmatprep.subr.bf16.mxu1 %v6511_v41  ;;  %v5024_v34 = vld [vmem:[%s7217_s6 + $0x66] sm:$0xff] }
  0xec   : > { %5839 = vmatmul.mubr.msk.f32.gmra.mrb[10].mxu1 %vm288_vm1, %v4990_v40  ;;  %6704 = vmatprep.subr.bf16.mxu0 %v6703_v42  ;;  %v5028_v40 = vld [vmem:[%s7217_s6 + $0x86] sm:$0xff] }
  0xed   : > { %6239 = vmatmul.mubr.msk.f32.gmra.mrb[10].mxu0 %vm288_vm1, %v4991_v43  ;;  %5841 = vmatprep.mubr.msk.f32.mxu1 %vm288_vm1, %v4991_v43  ;;  %v5047_v43 = vld [vmem:[%s7217_s6 + $0x17] sm:$0xff] }
  0xee   : > { %6241 = vmatprep.mubr.msk.f32.mxu0 %vm288_vm1, %v4992_v44  ;;  %6514 = vmatpush3.bf16.msra.mxu1 %v6511_v41  ;;  %v4782_v41 = vld [vmem:[%s7217_s6 + $0x7] sm:$0xff] }
  0xef   : > { %6706 = vmatpush3.bf16.msra.mxu0 %v6703_v42  ;;  %5871 = vmatprep.subr.mxu1 %v1665_v46  ;;  %v5046_v42 = vld [vmem:[%s7217_s6 + $0xf] sm:$0xff] }
  0xf0   : > { %5842 = vmatmul.mubr.msk.f32.gmra.mrb[12].mxu1 %vm288_vm1, %v4992_v44  ;;  %6271 = vmatprep.subr.mxu0 %v3585_v50  ;;  %v5048_v44 = vld [vmem:[%s7217_s6 + $0x1f] sm:$0xff] }
  0xf1   : > { %6242 = vmatmul.mubr.msk.f32.gmra.mrb[12].mxu0 %vm288_vm1, %v4993_v56  ;;  %5844 = vmatprep.mubr.msk.f32.mxu1 %vm288_vm1, %v4993_v56  ;;  %v5055_v56 = vld [vmem:[%s7217_s6 + $0x57] sm:$0xff] }
  0xf2   : > { %6244 = vmatprep.mubr.msk.f32.mxu0 %vm288_vm1, %v4994_v58  ;;  %5872 = vmatpush3.msra.mxu1 %v1665_v46  ;;  %v5049_v46 = vld [vmem:[%s7217_s6 + $0x27] sm:$0xff] }
  0xf3   : > { %6272 = vmatpush3.msra.mxu0 %v3585_v50  ;;  %6516 = vmatprep.subr.bf16.mxu1 %v6515_v59  ;;  %v5052_v50 = vld [vmem:[%s7217_s6 + $0x3f] sm:$0xff] }
  0xf4   : > { %5845 = vmatmul.mubr.msk.f32.gmra.mrb[14].mxu1 %vm288_vm1, %v4994_v58  ;;  %6708 = vmatprep.subr.bf16.mxu0 %v6707_v60  ;;  %v5056_v58 = vld [vmem:[%s7217_s6 + $0x5f] sm:$0xff] }
  0xf5   : > { %6245 = vmatmul.mubr.msk.f32.gmra.mrb[14].mxu0 %vm288_vm1, %v4995_v61  ;;  %5873 = vmatprep.mubr.msk.f32.mxu1 %vm288_vm1, %v4749_v62  ;;  %v5059_v61 = vld [vmem:[%s7217_s6 + $0x77] sm:$0xff]  ;;  %v5060_v62 = vld [vmem:[%s7217_s6 + $0x7f] sm:$0xff] }
  0xf6   : > { %6273 = vmatprep.mubr.msk.f32.mxu0 %vm288_vm1, %v5013_v2 }
  0xf8   : > { %5874 = vmatmul.mubr.msk.f32.vlgmr.msra.gmra.mrb[0].mxu1 %vm288_vm1, %v5013_v2  ;;  %v5061_v2 = vld [vmem:[%s7217_s6 + $0x87] sm:$0xff] }
  0xf9   : > { %6274 = vmatmul.mubr.msk.f32.vlgmr.msra.gmra.mrb[0].mxu0 %vm288_vm1, %v5014_v9  ;;  %6518 = vmatpush3.bf16.msra.mxu1 %v6515_v59  ;;  %v5057_v59 = vld [vmem:[%s7217_s6 + $0x67] sm:$0xff] }
  0xfa   : > { %6710 = vmatpush3.bf16.msra.mxu0 %v6707_v60  ;;  %5876 = vmatprep.mubr.msk.f32.mxu1 %vm288_vm1, %v5014_v9  ;;  %v5058_v60 = vld [vmem:[%s7217_s6 + $0x6f] sm:$0xff] }
  0xfb   : > { %6276 = vmatprep.mubr.msk.f32.mxu0 %vm288_vm1, %v5015_v45  ;;  %6520 = vmatprep.subr.bf16.mxu1 %v6519_v25 }
  0xfc   : > { %5877 = vmatmul.mubr.msk.f32.gmra.mrb[2].mxu1 %vm288_vm1, %v5015_v45  ;;  %6712 = vmatprep.subr.bf16.mxu0 %v6711_v53  ;;  %v4035_v45 = vld [vmem:[#allocation2] sm:$0xff] }
  0xfd   : > { %6277 = vmatmul.mubr.msk.f32.gmra.mrb[2].mxu0 %vm288_vm1, %v5016_v55  ;;  %6522 = vmatpush3.bf16.msra.mxu1 %v6519_v25 }
  0xfe   : > { %6714 = vmatpush3.bf16.msra.mxu0 %v6711_v53  ;;  %5879 = vmatprep.mubr.msk.f32.mxu1 %vm288_vm1, %v5016_v55  ;;  %v4038_v55 = vld [vmem:[#allocation2 + $0x18] sm:$0xff] }
  0xff   : > { %6279 = vmatprep.mubr.msk.f32.mxu0 %vm288_vm1, %v5017_v16  ;;  %6524 = vmatprep.subr.bf16.mxu1 %v6523_v63 }
 0x100   : > { %5880 = vmatmul.mubr.msk.f32.gmra.mrb[4].mxu1 %vm288_vm1, %v5017_v16  ;;  %6716 = vmatprep.subr.bf16.mxu0 %v6715_v57 }
 0x101   : > { %6280 = vmatmul.mubr.msk.f32.gmra.mrb[4].mxu0 %vm288_vm1, %v5018_v19  ;;  %5882 = vmatprep.mubr.msk.f32.mxu1 %vm288_vm1, %v5018_v19 }
 0x102   : > { %6526 = vmatpush3.bf16.msra.mxu1 %v6523_v63  ;;  %6282 = vmatprep.mubr.msk.f32.mxu0 %vm288_vm1, %v5019_v3 }
 0x103   : > { %6718 = vmatpush3.bf16.msra.mxu0 %v6715_v57  ;;  %6528 = vmatprep.subr.bf16.mxu1 %v6527_v20 }
 0x104   : > { %5883 = vmatmul.mubr.msk.f32.gmra.mrb[6].mxu1 %vm288_vm1, %v5019_v3  ;;  %6720 = vmatprep.subr.bf16.mxu0 %v6719_v10 }
 0x105   : > { %6283 = vmatmul.mubr.msk.f32.gmra.mrb[6].mxu0 %vm288_vm1, %v5020_v21  ;;  %5885 = vmatprep.mubr.msk.f32.mxu1 %vm288_vm1, %v5020_v21 }
 0x106   : > { %6530 = vmatpush3.bf16.msra.mxu1 %v6527_v20  ;;  %6285 = vmatprep.mubr.msk.f32.mxu0 %vm288_vm1, %v5021_v22  ;;  %v4040_v20 = vld [vmem:[#allocation2 + $0x28] sm:$0xff] }
 0x107   : > { %6722 = vmatpush3.bf16.msra.mxu0 %v6719_v10  ;;  %6532 = vmatprep.subr.bf16.mxu1 %v6531_v23 }
 0x108   : > { %5886 = vmatmul.mubr.msk.f32.gmra.mrb[8].mxu1 %vm288_vm1, %v5021_v22  ;;  %6724 = vmatprep.subr.bf16.mxu0 %v6723_v24 }
 0x109   : > { %6286 = vmatmul.mubr.msk.f32.gmra.mrb[8].mxu0 %vm288_vm1, %v5022_v30  ;;  %5888 = vmatprep.mubr.msk.f32.mxu1 %vm288_vm1, %v5022_v30  ;;  %v4041_v30 = vld [vmem:[#allocation2 + $0x30] sm:$0xff] }
 0x10a   : > { %6288 = vmatprep.mubr.msk.f32.mxu0 %vm288_vm1, %v5023_v31  ;;  %6534 = vmatpush3.bf16.msra.mxu1 %v6531_v23 }
 0x10b   : > { %6726 = vmatpush3.bf16.msra.mxu0 %v6723_v24  ;;  %6536 = vmatprep.subr.bf16.mxu1 %v6535_v32 }
 0x10c   : > { %5889 = vmatmul.mubr.msk.f32.gmra.mrb[10].mxu1 %vm288_vm1, %v5023_v31  ;;  %6728 = vmatprep.subr.bf16.mxu0 %v6727_v33 }
 0x10d   : > { %6289 = vmatmul.mubr.msk.f32.gmra.mrb[10].mxu0 %vm288_vm1, %v5024_v34  ;;  %5891 = vmatprep.mubr.msk.f32.mxu1 %vm288_vm1, %v5024_v34 }
 0x10e   : > { %6291 = vmatprep.mubr.msk.f32.mxu0 %vm288_vm1, %v5025_v35  ;;  %6538 = vmatpush3.bf16.msra.mxu1 %v6535_v32 }
 0x10f   : > { %6730 = vmatpush3.bf16.msra.mxu0 %v6727_v33  ;;  %5921 = vmatprep.subr.mxu1 %v1905_v36 }
 0x110   : > { %5892 = vmatmul.mubr.msk.f32.gmra.mrb[12].mxu1 %vm288_vm1, %v5025_v35  ;;  %6321 = vmatprep.subr.mxu0 %v3825_v37 }
 0x111   : > { %6292 = vmatmul.mubr.msk.f32.gmra.mrb[12].mxu0 %vm288_vm1, %v5026_v38  ;;  %5894 = vmatprep.mubr.msk.f32.mxu1 %vm288_vm1, %v5026_v38 }
 0x112   : > { %6294 = vmatprep.mubr.msk.f32.mxu0 %vm288_vm1, %v5027_v39  ;;  %5922 = vmatpush3.msra.mxu1 %v1905_v36  ;;  %v4044_v36 = vld [vmem:[#allocation2 + $0x48] sm:$0xff] }
 0x113   : > { %6322 = vmatpush3.msra.mxu0 %v3825_v37 }
 0x114   : > { %5895 = vmatmul.mubr.msk.f32.gmra.mrb[14].mxu1 %vm288_vm1, %v5027_v39 }
 0x115   : > { %6295 = vmatmul.mubr.msk.f32.gmra.mrb[14].mxu0 %vm288_vm1, %v5028_v40  ;;  %5923 = vmatprep.mubr.msk.f32.mxu1 %vm288_vm1, %v4782_v41  ;;  %v4043_v40 = vld [vmem:[#allocation2 + $0x40] sm:$0xff] }
 0x116   : > { %6323 = vmatprep.mubr.msk.f32.mxu0 %vm288_vm1, %v5046_v42 }
 0x118   : > { %5924 = vmatmul.mubr.msk.f32.vlgmr.msra.gmra.mrb[0].mxu1 %vm288_vm1, %v5046_v42 }
 0x119   : > { %6324 = vmatmul.mubr.msk.f32.vlgmr.msra.gmra.mrb[0].mxu0 %vm288_vm1, %v5047_v43  ;;  %5926 = vmatprep.mubr.msk.f32.mxu1 %vm288_vm1, %v5047_v43 }
 0x11a   : > { %6326 = vmatprep.mubr.msk.f32.mxu0 %vm288_vm1, %v5048_v44 }
 0x11c   : > { %5927 = vmatmul.mubr.msk.f32.gmra.mrb[2].mxu1 %vm288_vm1, %v5048_v44 }
 0x11d   : > { %6327 = vmatmul.mubr.msk.f32.gmra.mrb[2].mxu0 %vm288_vm1, %v5049_v46  ;;  %5929 = vmatprep.mubr.msk.f32.mxu1 %vm288_vm1, %v5049_v46 }
 0x11e   : > { %6329 = vmatprep.mubr.msk.f32.mxu0 %vm288_vm1, %v5050_v48 }
 0x120   : > { %5930 = vmatmul.mubr.msk.f32.gmra.mrb[4].mxu1 %vm288_vm1, %v5050_v48  ;;  %v4046_v48 = vld [vmem:[#allocation2 + $0x58] sm:$0xff] }
 0x121   : > { %6330 = vmatmul.mubr.msk.f32.gmra.mrb[4].mxu0 %vm288_vm1, %v5051_v49  ;;  %5932 = vmatprep.mubr.msk.f32.mxu1 %vm288_vm1, %v5051_v49 }
 0x122   : > { %6332 = vmatprep.mubr.msk.f32.mxu0 %vm288_vm1, %v5052_v50 }
 0x124   : > { %5933 = vmatmul.mubr.msk.f32.gmra.mrb[6].mxu1 %vm288_vm1, %v5052_v50 }
 0x125   : > { %6333 = vmatmul.mubr.msk.f32.gmra.mrb[6].mxu0 %vm288_vm1, %v5053_v51  ;;  %5935 = vmatprep.mubr.msk.f32.mxu1 %vm288_vm1, %v5053_v51 }
 0x126   : > { %6335 = vmatprep.mubr.msk.f32.mxu0 %vm288_vm1, %v5054_v52 }
 0x128   : > { %5936 = vmatmul.mubr.msk.f32.gmra.mrb[8].mxu1 %vm288_vm1, %v5054_v52  ;;  %v4045_v52 = vld [vmem:[#allocation2 + $0x50] sm:$0xff] }
 0x129   : > { %6336 = vmatmul.mubr.msk.f32.gmra.mrb[8].mxu0 %vm288_vm1, %v5055_v56  ;;  %5938 = vmatprep.mubr.msk.f32.mxu1 %vm288_vm1, %v5055_v56 }
 0x12a   : > { %6338 = vmatprep.mubr.msk.f32.mxu0 %vm288_vm1, %v5056_v58 }
 0x12c   : > { %5939 = vmatmul.mubr.msk.f32.gmra.mrb[10].mxu1 %vm288_vm1, %v5056_v58 }
 0x12d   : > { %6339 = vmatmul.mubr.msk.f32.gmra.mrb[10].mxu0 %vm288_vm1, %v5057_v59  ;;  %5941 = vmatprep.mubr.msk.f32.mxu1 %vm288_vm1, %v5057_v59 }
 0x12e   : > { %6341 = vmatprep.mubr.msk.f32.mxu0 %vm288_vm1, %v5058_v60 }
 0x130   : > { %5942 = vmatmul.mubr.msk.f32.gmra.mrb[12].mxu1 %vm288_vm1, %v5058_v60 }
 0x131   : > { %6342 = vmatmul.mubr.msk.f32.gmra.mrb[12].mxu0 %vm288_vm1, %v5059_v61  ;;  %5944 = vmatprep.mubr.msk.f32.mxu1 %vm288_vm1, %v5059_v61 }
 0x132   : > { %6344 = vmatprep.mubr.msk.f32.mxu0 %vm288_vm1, %v5060_v62 }
 0x134   : > { %5945 = vmatmul.mubr.msk.f32.gmra.mrb[14].mxu1 %vm288_vm1, %v5060_v62  ;;  %v4048_v62 = vld [vmem:[#allocation2 + $0x68] sm:$0xff] }
 0x135   : > { %6345 = vmatmul.mubr.msk.f32.gmra.mrb[14].mxu0 %vm288_vm1, %v5061_v2 }
 0x1eb   : > { %v5925_v4 = vpop.f32.mrb[0].mxu1 }
 0x1ec   : > { %v6325_v5 = vpop.f32.mrb[0].mxu0  ;;  %v2020_v8 = vpop.f32.mrb[1].mxu1 }
 0x1ed   : > { %v6731_v9 = vadd.f32 %v6325_v5, %v5925_v4  ;;  %v3940_v25 = vpop.f32.mrb[1].mxu0 }
 0x1ee   : > { %v6732_v53 = vadd.f32 %v3940_v25, %v2020_v8 }
 0x1ef   : > { %v4052_v12 = vadd.f32 %v6731_v9, %v4036_v6  ;;  %v5928_v47 = vpop.f32.mrb[2].mxu1  ;;  %v4047_v6 = vld [vmem:[#allocation2 + $0x60] sm:$0xff] }
 0x1f0   : > { %v4051_v14 = vadd.f32 %v6732_v53, %v4035_v45  ;;  %v6328_v54 = vpop.f32.mrb[2].mxu0  ;;  %v2030_v63 = vpop.f32.mrb[3].mxu1 }
 0x1f1   : > { %4069 = vst.msk [vmem:[#allocation2 + $0x8] sm:$0xff] %vm4067_vm2, %v4052_v12  ;;  %v6733_v16 = vadd.f32 %v6328_v54, %v5928_v47  ;;  %v3950_v57 = vpop.f32.mrb[3].mxu0  ;;  %v4050_v12 = vld [vmem:[#allocation2 + $0x78] sm:$0xff] }
 0x1f2   : > { %4068 = vst.msk [vmem:[#allocation2] sm:$0xff] %vm4067_vm2, %v4051_v14  ;;  %v6734_v0 = vadd.f32 %v3950_v57, %v2030_v63 }
 0x1f3   : > { %v4054_v17 = vadd.f32 %v6733_v16, %v4038_v55  ;;  %v5931_v7 = vpop.f32.mrb[4].mxu1  ;;  %v4049_v55 = vld [vmem:[#allocation2 + $0x70] sm:$0xff] }
 0x1f4   : > { %v4053_v19 = vadd.f32 %v6734_v0, %v4037_v1  ;;  %v6331_v3 = vpop.f32.mrb[4].mxu0  ;;  %v2040_v10 = vpop.f32.mrb[5].mxu1  ;;  %v7947_v0 = vld [vmem:[%s8264_s2] ss:$0 sm:$0xff] (!%p5078_p8) }
 0x1f5   : > { %4071 = vst.msk [vmem:[#allocation2 + $0x18] sm:$0xff] %vm4067_vm2, %v4054_v17  ;;  %v6735_v11 = vadd.f32 %v6331_v3, %v5931_v7  ;;  %v3960_v13 = vpop.f32.mrb[5].mxu0 }
 0x1f6   : > { %4070 = vst.msk [vmem:[#allocation2 + $0x10] sm:$0xff] %vm4067_vm2, %v4053_v19  ;;  %v6736_v18 = vadd.f32 %v3960_v13, %v2040_v10 }
 0x1f7   : > { %v4056_v21 = vadd.f32 %v6735_v11, %v4040_v20  ;;  %v5934_v22 = vpop.f32.mrb[6].mxu1 }
 0x1f8   : > { %v4055_v23 = vadd.f32 %v6736_v18, %v4039_v15  ;;  %v6334_v24 = vpop.f32.mrb[6].mxu0  ;;  %v2050_v27 = vpop.f32.mrb[7].mxu1  ;;  %v4089_v17 = vld [vmem:[#allocation2 + $0x8] sm:$0xff] (!%p5078_p8) }
 0x1f9   : > { %4073 = vst.msk [vmem:[#allocation2 + $0x28] sm:$0xff] %vm4067_vm2, %v4056_v21  ;;  %v6737_v28 = vadd.f32 %v6334_v24, %v5934_v22  ;;  %v3970_v29 = vpop.f32.mrb[7].mxu0  ;;  %v4088_v1 = vld [vmem:[#allocation2] sm:$0xff] (!%p5078_p8)  ;;  %v7953_v19 = vadd.f32 (!%p5078_p8), %v7947_v0, %v4089_v17 }
 0x1fa   : > { %4072 = vst.msk [vmem:[#allocation2 + $0x20] sm:$0xff] %vm4067_vm2, %v4055_v23  ;;  %v6738_v31 = vadd.f32 %v3970_v29, %v2050_v27  ;;  %v7950_v7 = vadd.f32 (!%p5078_p8), %v7947_v0, %v4088_v1 }
 0x1fb   : > { %v4058_v32 = vadd.f32 %v6737_v28, %v4042_v26  ;;  %v5937_v33 = vpop.f32.mrb[8].mxu1  ;;  %v4176_v21 = vand.u32 (!%p5078_p8), 2147483647, %v7953_v19  ;;  %vm4144_vm6 = vcmp.ne.f32.partialorder (!%p5078_p8), %v7953_v19, %v7953_v19 }
 0x1fc   : > { %v4057_v34 = vadd.f32 %v6738_v31, %v4041_v30  ;;  %v6337_v35 = vpop.f32.mrb[8].mxu0  ;;  %v2060_v37 = vpop.f32.mrb[9].mxu1  ;;  %v4091_v20 = vld [vmem:[#allocation2 + $0x18] sm:$0xff] (!%p5078_p8)  ;;  %v4175_v15 = vand.u32 (!%p5078_p8), 2147483647, %v7950_v7  ;;  %vm4143_vm5 = vcmp.ne.f32.partialorder (!%p5078_p8), %v7950_v7, %v7950_v7 }
 0x1fd   : > { %4075 = vst.msk [vmem:[#allocation2 + $0x38] sm:$0xff] %vm4067_vm2, %v4058_v32  ;;  %v6739_v38 = vadd.f32 %v6337_v35, %v5937_v33  ;;  %v3980_v39 = vpop.f32.mrb[9].mxu0  ;;  %v4090_v3 = vld [vmem:[#allocation2 + $0x10] sm:$0xff] (!%p5078_p8)  ;;  %v7959_v13 = vadd.f32 (!%p5078_p8), %v7947_v0, %v4091_v20  ;;  %v4192_v27 = vsub.f32 (!%p5078_p8), 0.0, %v4176_v21 }
 0x1fe   : > { %4074 = vst.msk [vmem:[#allocation2 + $0x30] sm:$0xff] %vm4067_vm2, %v4057_v34  ;;  %v6740_v41 = vadd.f32 %v3980_v39, %v2060_v37  ;;  %v7956_v11 = vadd.f32 (!%p5078_p8), %v7947_v0, %v4090_v3  ;;  %v4191_v23 = vsub.f32 (!%p5078_p8), 0.0, %v4175_v15 }
 0x1ff   : > { %v4060_v42 = vadd.f32 %v6739_v38, %v4044_v36  ;;  %v5940_v43 = vpop.f32.mrb[10].mxu1  ;;  %v4178_v28 = vand.u32 (!%p5078_p8), 2147483647, %v7959_v13  ;;  %v4209_v34 = vmul.f32 (!%p5078_p8), 1.442695, %v4192_v27  ;;  %vm4146_vm9 = vcmp.ne.f32.partialorder (!%p5078_p8), %v7959_v13, %v7959_v13 }
 0x200   : > { %v4059_v44 = vadd.f32 %v6740_v41, %v4043_v40  ;;  %v6340_v46 = vpop.f32.mrb[10].mxu0  ;;  %v2070_v49 = vpop.f32.mrb[11].mxu1  ;;  %v4093_v22 = vld [vmem:[#allocation2 + $0x28] sm:$0xff] (!%p5078_p8)  ;;  %v4177_v24 = vand.u32 (!%p5078_p8), 2147483647, %v7956_v11  ;;  %vm4145_vm7 = vcmp.ne.f32.partialorder (!%p5078_p8), %v7956_v11, %v7956_v11 }
 0x201   : > { %4077 = vst.msk [vmem:[#allocation2 + $0x48] sm:$0xff] %vm4067_vm2, %v4060_v42  ;;  %v6741_v50 = vadd.f32 %v6340_v46, %v5940_v43  ;;  %v3990_v51 = vpop.f32.mrb[11].mxu0  ;;  %v4092_v10 = vld [vmem:[#allocation2 + $0x20] sm:$0xff] (!%p5078_p8)  ;;  %v4207_v30 = vmul.f32 (!%p5078_p8), 1.442695, %v4191_v23  ;;  %v7970_v33 = vadd.f32 (!%p5078_p8), %v7947_v0, %v4093_v22  ;;  %v4194_v35 = vsub.f32 (!%p5078_p8), 0.0, %v4178_v28 }
 0x202   : > { %4076 = vst.msk [vmem:[#allocation2 + $0x40] sm:$0xff] %vm4067_vm2, %v4059_v44  ;;  %v6742_v56 = vadd.f32 %v3990_v51, %v2070_v49  ;;  %v7963_v18 = vadd.f32 (!%p5078_p8), %v7947_v0, %v4092_v10  ;;  %v4193_v31 = vsub.f32 (!%p5078_p8), 0.0, %v4177_v24 }
 0x203   : > { %v4062_v58 = vadd.f32 %v6741_v50, %v4046_v48  ;;  %v5943_v59 = vpop.f32.mrb[12].mxu1  ;;  %7013 = vpow2.f32 (!%p5078_p8), %v4207_v30  ;;  %v4213_v40 = vmul.f32 (!%p5078_p8), 1.442695, %v4194_v35  ;;  %v4180_v41 = vand.u32 (!%p5078_p8), 2147483647, %v7970_v33 }
 0x204   : > { %v4061_v60 = vadd.f32 %v6742_v56, %v4045_v52  ;;  %v6343_v61 = vpop.f32.mrb[12].mxu0  ;;  %v2080_v2 = vpop.f32.mrb[13].mxu1  ;;  %v4095_v29 = vld [vmem:[#allocation2 + $0x38] sm:$0xff] (!%p5078_p8)  ;;  %v4179_v32 = vand.u32 (!%p5078_p8), 2147483647, %v7963_v18  ;;  %7015 = vpow2.f32 (!%p5078_p8), %v4209_v34  ;;  %vm4147_vm12 = vcmp.ne.f32.partialorder (!%p5078_p8), %v7963_v18, %v7963_v18 }
 0x205   : > { %4079 = vst.msk [vmem:[#allocation2 + $0x58] sm:$0xff] %vm4067_vm2, %v4062_v58  ;;  %v6743_v4 = vadd.f32 %v6343_v61, %v5943_v59  ;;  %v4000_v5 = vpop.f32.mrb[13].mxu0  ;;  %v4094_v26 = vld [vmem:[#allocation2 + $0x30] sm:$0xff] (!%p5078_p8)  ;;  %v4211_v37 = vmul.f32 (!%p5078_p8), 1.442695, %v4193_v31  ;;  %v7976_v39 = vadd.f32 (!%p5078_p8), %v7947_v0, %v4095_v29  ;;  %v4196_v46 = vsub.f32 (!%p5078_p8), 0.0, %v4180_v41 }
 0x206   : > { %4078 = vst.msk [vmem:[#allocation2 + $0x50] sm:$0xff] %vm4067_vm2, %v4061_v60  ;;  %v6744_v8 = vadd.f32 %v4000_v5, %v2080_v2  ;;  %v7973_v36 = vadd.f32 (!%p5078_p8), %v7947_v0, %v4094_v26  ;;  %v4195_v38 = vsub.f32 (!%p5078_p8), 0.0, %v4179_v32  ;;  %v4127_v59 = vmax.f32 (!%p5078_p8), %v7950_v7, 0.0 }
 0x207   : > { %v4064_v9 = vadd.f32 %v6743_v4, %v4048_v62  ;;  %v5946_v25 = vpop.f32.mrb[14].mxu1  ;;  %7017 = vpow2.f32 (!%p5078_p8), %v4211_v37  ;;  %v4182_v49 = vand.u32 (!%p5078_p8), 2147483647, %v7976_v39  ;;  %v4217_v52 = vmul.f32 (!%p5078_p8), 1.442695, %v4196_v46 }
 0x208   : > { %v4063_v45 = vadd.f32 %v6744_v8, %v4047_v6  ;;  %v6346_v53 = vpop.f32.mrb[14].mxu0  ;;  %v2090_v47 = vpop.f32.mrb[15].mxu1  ;;  %4087 = sbr.rel (%p5078_p8) target bundleno = 603 (0x25b), region = 40  ;;  %v4215_v43 = vmul.f32 (!%p5078_p8), 1.442695, %v4195_v38  ;;  %v4097_v44 = vld [vmem:[#allocation2 + $0x48] sm:$0xff] (!%p5078_p8)  ;;  %7019 = vpow2.f32 (!%p5078_p8), %v4213_v40  ;;  %vm4148_vm14 = vcmp.ne.f32.partialorder (!%p5078_p8), %v7970_v33, %v7970_v33 }
 0x209   : > { %4081 = vst.msk [vmem:[#allocation2 + $0x68] sm:$0xff] %vm4067_vm2, %v4064_v9  ;;  %v6745_v14 = vadd.f32 %v6346_v53, %v5946_v25  ;;  %v4010_v54 = vpop.f32.mrb[15].mxu0  ;;  %v4096_v42 = vld [vmem:[#allocation2 + $0x40] sm:$0xff] (!%p5078_p8)  ;;  %v4181_v48 = vand.u32 (!%p5078_p8), 2147483647, %v7973_v36  ;;  %v7985_v58 = vadd.f32 (!%p5078_p8), %v7947_v0, %v4097_v44  ;;  %v4128_v60 = vmax.f32 (!%p5078_p8), %v7953_v19, 0.0 }
 0x20a   : > { %4080 = vst.msk [vmem:[#allocation2 + $0x60] sm:$0xff] %vm4067_vm2, %v4063_v45  ;;  %v6746_v63 = vadd.f32 %v4010_v54, %v2090_v47  ;;  %7021 = vpow2.f32 (!%p5078_p8), %v4215_v43  ;;  %v7982_v50 = vadd.f32 (!%p5078_p8), %v7947_v0, %v4096_v42  ;;  %v4198_v61 = vsub.f32 (!%p5078_p8), 0.0, %v4182_v49 }
 0x20b   : > { %v4066_v16 = vadd.f32 %v6745_v14, %v4050_v12  ;;  %v4197_v56 = vsub.f32 (!%p5078_p8), 0.0, %v4181_v48  ;;  %v4129_v2 = vmax.f32 (!%p5078_p8), %v7956_v11, 0.0  ;;  %7023 = vpow2.f32 (!%p5078_p8), %v4217_v52 }
 0x20c   : > { %v4065_v57 = vadd.f32 %v6746_v63, %v4049_v55  ;;  %v4183_v62 = vand.u32 (!%p5078_p8), 2147483647, %v7982_v50  ;;  %v4130_v6 = vmax.f32 (!%p5078_p8), %v7959_v13, 0.0  ;;  %v4131_v8 = vmax.f32 (!%p5078_p8), %v7963_v18, 0.0  ;;  %v4099_v47 = vld [vmem:[#allocation2 + $0x58] sm:$0xff] (!%p5078_p8) }
 0x20d   : > { %4083 = vst.msk [vmem:[#allocation2 + $0x78] sm:$0xff] %vm4067_vm2, %v4066_v16  ;;  %v4098_v51 = vld [vmem:[#allocation2 + $0x50] sm:$0xff] (!%p5078_p8)  ;;  %v4219_v4 = vmul.f32 (!%p5078_p8), 1.442695, %v4197_v56  ;;  %v4221_v9 = vmul.f32 (!%p5078_p8), 1.442695, %v4198_v61  ;;  %v7014_v14 = vpop.eup (!%p5078_p8), %7013  ;;  %v8003_v22 = vadd.f32 (!%p5078_p8), %v7947_v0, %v4099_v47  ;;  %vm4149_vm15 = vcmp.ne.f32.partialorder (!%p5078_p8), %v7973_v36, %v7973_v36 }
 0x20e   : > { %4082 = vst.msk [vmem:[#allocation2 + $0x70] sm:$0xff] %vm4067_vm2, %v4065_v57  ;;  %v7992_v5 = vadd.f32 (!%p5078_p8), %v7947_v0, %v4098_v51  ;;  %v4199_v25 = vsub.f32 (!%p5078_p8), 0.0, %v4183_v62  ;;  %v4132_v45 = vmax.f32 (!%p5078_p8), %v7970_v33, 0.0  ;;  %v4133_v53 = vmax.f32 (!%p5078_p8), %v7973_v36, 0.0  ;;  %v7016_v57 = vpop.eup (!%p5078_p8), %7015 }
 0x20f   : > { %7025 = vpow2.f32 %v4219_v4  ;;  %v4184_v12 = vand.u32 2147483647, %v7985_v58  ;;  %v4134_v54 = vmax.f32 %v7976_v39, 0.0  ;;  %v4135_v55 = vmax.f32 %v7982_v50, 0.0 }
 0x210   : > { %7027 = vpow2.f32 %v4221_v9  ;;  %v4223_v63 = vmul.f32 1.442695, %v4199_v25  ;;  %v4239_v1 = vadd.f32 1.0, %v7014_v14  ;;  %v4242_v17 = vmul.f32 -0.5, %v7014_v14 }
 0x211   : > { %v4100_v16 = vld [vmem:[#allocation2 + $0x60] sm:$0xff]  ;;  %v4245_v3 = vand.u32 2147483647, %v7014_v14  ;;  %v4185_v20 = vand.u32 2147483647, %v7992_v5  ;;  %v7018_v10 = vpop.eup %7017  ;;  %v4248_v15 = vadd.f32 1.0, %v7016_v57  ;;  %vm4150_vm1 = vcmp.ne.f32.partialorder %v7976_v39, %v7976_v39 }
 0x212   : > { %v4251_v21 = vmul.f32 -0.5, %v7016_v57  ;;  %7029 = vpow2.f32 %v4223_v63  ;;  %v7020_v23 = vpop.eup %7019  ;;  %v4254_v24 = vand.u32 2147483647, %v7016_v57  ;;  %v4257_v26 = vadd.f32 1.0, %v7018_v10 }
 0x213   : > { %7031 = vlog2.f32 %v4239_v1  ;;  %v8005_v27 = vsub.f32 0.0, %v4184_v12  ;;  %v4243_v29 = vadd.f32 1.0, %v4242_v17  ;;  %v4260_v30 = vmul.f32 -0.5, %v7018_v10 }
 0x214   : > { %v7022_v28 = vpop.eup %7021  ;;  %7033 = vlog2.f32 %v4248_v15  ;;  %v8008_v31 = vadd.f32 %v7947_v0, %v4100_v16  ;;  %vm8010_vm3 = vcmp.lt.f32.partialorder %v4245_v3, 0.0004427343  ;;  %v4266_v34 = vadd.f32 1.0, %v7020_v23 }
 0x215   : > { %7035 = vlog2.f32 %v4257_v26  ;;  %v8014_v35 = vsub.f32 0.0, %v4185_v20  ;;  %v4252_v37 = vadd.f32 1.0, %v4251_v21  ;;  %v4261_v38 = vadd.f32 1.0, %v4260_v30  ;;  %v7024_v42 = vpop.eup %7023  ;;  %v4101_v21 = vld [vmem:[#allocation2 + $0x68] sm:$0xff] }
 0x216   : > { %v4263_v40 = vand.u32 2147483647, %v7018_v10  ;;  %v4269_v41 = vmul.f32 -0.5, %v7020_v23  ;;  %vm8016_vm4 = vcmp.lt.f32.partialorder %v4254_v24, 0.0004427343  ;;  %7037 = vlog2.f32 %v4266_v34 }
 0x217   : > { %v4275_v44 = vadd.f32 1.0, %v7022_v28  ;;  %v4278_v46 = vmul.f32 -0.5, %v7022_v28  ;;  %v4244_v48 = vmul.f32 %v7014_v14, %v4243_v29  ;;  %v4272_v51 = vand.u32 2147483647, %v7020_v23 }
 0x218   : > { %v4270_v49 = vadd.f32 1.0, %v4269_v41  ;;  %v4281_v52 = vand.u32 2147483647, %v7022_v28  ;;  %v4284_v62 = vadd.f32 1.0, %v7024_v42  ;;  %v4287_v4 = vmul.f32 -0.5, %v7024_v42 }
 0x219   : > { %v7026_v56 = vpop.eup %7025  ;;  %7039 = vlog2.f32 %v4275_v44  ;;  %v4279_v61 = vadd.f32 1.0, %v4278_v46  ;;  %v4253_v25 = vmul.f32 %v7016_v57, %v4252_v37  ;;  %v4262_v12 = vmul.f32 %v7018_v10, %v4261_v38 }
 0x21a   : > { %v8024_v9 = vpop.eup %7027  ;;  %vm8028_vm8 = vcmp.lt.f32.partialorder %v4263_v40, 0.0004427343  ;;  %v4293_v14 = vadd.f32 1.0, %v7026_v56  ;;  %7041 = vlog2.f32 %v4284_v62  ;;  %v4288_v63 = vadd.f32 1.0, %v4287_v4 }
 0x21b   : > { %v4290_v16 = vand.u32 2147483647, %v7024_v42  ;;  %v4296_v1 = vmul.f32 -0.5, %v7026_v56  ;;  %v4271_v3 = vmul.f32 %v7020_v23, %v4270_v49  ;;  %vm8036_vm10 = vcmp.lt.f32.partialorder %v4272_v51, 0.0004427343 }
 0x21c   : > { %v8032_v17 = vpop.eup %7029  ;;  %7043 = vlog2.f32 %v4293_v14  ;;  %v4302_v20 = vadd.f32 1.0, %v8024_v9  ;;  %v4280_v15 = vmul.f32 %v7022_v28, %v4279_v61  ;;  %vm8041_vm11 = vcmp.lt.f32.partialorder %v4281_v52, 0.0004427343 }
 0x21d   : > { %v7032_v10 = vpop.eup %7031  ;;  %v4297_v24 = vadd.f32 1.0, %v4296_v1  ;;  %v4299_v26 = vand.u32 2147483647, %v7026_v56  ;;  %v4305_v23 = vmul.f32 -0.5, %v8024_v9  ;;  %v4311_v34 = vadd.f32 1.0, %v8032_v17 }
 0x21e   : > { %v7034_v29 = vpop.eup %7033  ;;  %v4241_v30 = vmul.f32 0.6931472, %v7032_v10  ;;  %7045 = vlog2.f32 %v4302_v20  ;;  %v4289_v40 = vmul.f32 %v7024_v42, %v4288_v63  ;;  %vm8049_vm13 = vcmp.lt.f32.partialorder %v4290_v16, 0.0004427343 }
 0x21f   : > { %v7036_v37 = vpop.eup %7035  ;;  %v4250_v38 = vmul.f32 0.6931472, %v7034_v29  ;;  %v4308_v41 = vand.u32 2147483647, %v8024_v9  ;;  %7047 = vlog2.f32 %v4311_v34  ;;  %v4314_v49 = vmul.f32 -0.5, %v8032_v17 }
 0x220   : > { %v4247_v44 = vsel %vm8010_vm3, %v4244_v48, %v4241_v30  ;;  %v4259_v46 = vmul.f32 0.6931472, %v7036_v37  ;;  %v7038_v51 = vpop.eup %7037  ;;  %v4298_v32 = vmul.f32 %v7026_v56, %v4297_v24  ;;  %vm8065_vm0 = vcmp.lt.f32.partialorder %v4299_v26, 0.0004427343 }
 0x221   : > { %v4383_v42 = vadd.f32 %v4247_v44, %v4127_v59  ;;  %v4256_v52 = vsel %vm8016_vm4, %v4253_v25, %v4250_v38  ;;  %v4268_v4 = vmul.f32 0.6931472, %v7038_v51  ;;  %v4306_v59 = vadd.f32 1.0, %v4305_v23 }
 0x222   : > { %v4384_v61 = vadd.f32 %v4256_v52, %v4128_v60  ;;  %v4265_v62 = vsel %vm8028_vm8, %v4262_v12, %v4259_v46  ;;  %v4317_v60 = vand.u32 2147483647, %v8032_v17  ;;  %v4225_v25 = vmul.f32 1.442695, %v8005_v27 }
 0x223   : > { %v7040_v14 = vpop.eup %7039  ;;  %v4399_v43 = vsel %vm4143_vm5, %v7950_v7, %v4383_v42  ;;  %v4385_v56 = vadd.f32 %v4265_v62, %v4129_v2  ;;  %v4274_v7 = vsel %vm8036_vm10, %v4271_v3, %v4268_v4  ;;  %v4315_v2 = vadd.f32 1.0, %v4314_v49 }
 0x224   : > { %4415 = vst.msk [vmem:[%s7179_s27] sm:$0xff] %vm4067_vm2, %v4399_v43  ;;  %v4400_v12 = vsel %vm4144_vm6, %v7953_v19, %v4384_v61  ;;  %v4277_v47 = vmul.f32 0.6931472, %v7040_v14  ;;  %v7042_v63 = vpop.eup %7041  ;;  %v4386_v16 = vadd.f32 %v4274_v7, %v4130_v6  ;;  %7049 = vpow2.f32 %v4225_v25 }
 0x225   : > { %4416 = vst.msk [vmem:[%s7179_s27 + $0x8] sm:$0xff] %vm4067_vm2, %v4400_v12  ;;  %v4401_v27 = vsel %vm4145_vm7, %v7956_v11, %v4385_v56  ;;  %v4227_v19 = vmul.f32 1.442695, %v8014_v35  ;;  %v4286_v57 = vmul.f32 0.6931472, %v7042_v63  ;;  %v4307_v20 = vmul.f32 %v8024_v9, %v4306_v59 }
 0x226   : > { %v7044_v1 = vpop.eup %7043  ;;  %4417 = vst.msk [vmem:[%s7179_s27 + $0x10] sm:$0xff] %vm4067_vm2, %v4401_v27  ;;  %v4283_v3 = vsel %vm8041_vm11, %v4280_v15, %v4277_v47  ;;  %vm8105_vm3 = vcmp.lt.f32.partialorder %v4308_v41, 0.0004427343  ;;  %v4402_v11 = vsel %vm4146_vm9, %v7959_v13, %v4386_v16  ;;  %v4316_v24 = vmul.f32 %v8032_v17, %v4315_v2 }
 0x227   : > { %v4387_v6 = vadd.f32 %v4283_v3, %v4131_v8  ;;  %v4295_v35 = vmul.f32 0.6931472, %v7044_v1  ;;  %7051 = vpow2.f32 %v4227_v19  ;;  %4418 = vst.msk [vmem:[%s7179_s27 + $0x18] sm:$0xff] %vm4067_vm2, %v4402_v11  ;;  %v4292_v9 = vsel %vm8049_vm13, %v4289_v40, %v4286_v57  ;;  %v4102_v8 = vld [vmem:[#allocation2 + $0x70] sm:$0xff] }
 0x228   : > { %v7046_v15 = vpop.eup %7045  ;;  %vm8120_vm4 = vcmp.lt.f32.partialorder %v4317_v60, 0.0004427343  ;;  %v4186_v13 = vand.u32 2147483647, %v8003_v22  ;;  %v4388_v30 = vadd.f32 %v4292_v9, %v4132_v45  ;;  %v4187_v40 = vand.u32 2147483647, %v8008_v31 }
 0x229   : > { %v4403_v29 = vsel %vm4147_vm12, %v7963_v18, %v4387_v6  ;;  %v4301_v23 = vsel %vm8065_vm0, %v4298_v32, %v4295_v35  ;;  %v4304_v17 = vmul.f32 0.6931472, %v7046_v15  ;;  %v7048_v34 = vpop.eup %7047  ;;  %v8139_v28 = vadd.f32 %v7947_v0, %v4101_v21  ;;  %v4103_v32 = vld [vmem:[#allocation2 + $0x78] sm:$0xff] }
 0x22a   : > { %4419 = vst.msk [vmem:[%s7179_s27 + $0x20] sm:$0xff] %vm4067_vm2, %v4403_v29  ;;  %v4389_v37 = vadd.f32 %v4301_v23, %v4133_v53  ;;  %v4202_v38 = vsub.f32 0.0, %v4186_v13  ;;  %v4404_v18 = vsel %vm4148_vm14, %v7970_v33, %v4388_v30  ;;  %v4313_v41 = vmul.f32 0.6931472, %v7048_v34 }
 0x22b   : > { %v4310_v45 = vsel %vm8105_vm3, %v4307_v20, %v4304_v17  ;;  %v8148_v44 = vadd.f32 %v7947_v0, %v4102_v8  ;;  %4420 = vst.msk [vmem:[%s7179_s27 + $0x28] sm:$0xff] %vm4067_vm2, %v4404_v18  ;;  %v4203_v33 = vsub.f32 0.0, %v4187_v40  ;;  %vm4151_vm5 = vcmp.ne.f32.partialorder %v7982_v50, %v7982_v50 }
 0x22c   : > { %v4405_v53 = vsel %vm4149_vm15, %v7973_v36, %v4389_v37  ;;  %v4390_v46 = vadd.f32 %v4310_v45, %v4134_v54  ;;  %v4229_v49 = vmul.f32 1.442695, %v4202_v38  ;;  %v4319_v51 = vsel %vm8120_vm4, %v4316_v24, %v4313_v41 }
 0x22d   : > { %4421 = vst.msk [vmem:[%s7179_s27 + $0x30] sm:$0xff] %vm4067_vm2, %v4405_v53  ;;  %v4188_v42 = vand.u32 2147483647, %v8139_v28  ;;  %v4391_v54 = vadd.f32 %v4319_v51, %v4135_v55  ;;  %v4231_v52 = vmul.f32 1.442695, %v4203_v33  ;;  %v8178_v55 = vadd.f32 %v7947_v0, %v4103_v32 }
 0x22e   : > { %v4406_v36 = vsel %vm4150_vm1, %v7976_v39, %v4390_v46  ;;  %7053 = vpow2.f32 %v4229_v49  ;;  %v7050_v48 = vpop.eup %7049  ;;  %v4189_v62 = vand.u32 2147483647, %v8148_v44  ;;  %v4136_v3 = vmax.f32 %v7985_v58, 0.0 }
 0x22f   : > { %4422 = vst.msk [vmem:[%s7179_s27 + $0x38] sm:$0xff] %vm4067_vm2, %v4406_v36  ;;  %v4204_v61 = vsub.f32 0.0, %v4188_v42  ;;  %v4407_v4 = vsel %vm4151_vm5, %v7982_v50, %v4391_v54  ;;  %v4320_v59 = vadd.f32 1.0, %v7050_v48  ;;  %7055 = vpow2.f32 %v4231_v52 }
 0x230   : > { %4423 = vst.msk [vmem:[%s7179_s27 + $0x40] sm:$0xff] %vm4067_vm2, %v4407_v4  ;;  %v4205_v43 = vsub.f32 0.0, %v4189_v62  ;;  %v4323_v60 = vmul.f32 -0.5, %v7050_v48  ;;  %v4190_v50 = vand.u32 2147483647, %v8178_v55  ;;  %v4137_v24 = vmax.f32 %v7992_v5, 0.0 }
 0x231   : > { %v7052_v14 = vpop.eup %7051  ;;  %v4233_v39 = vmul.f32 1.442695, %v4204_v61  ;;  %7057 = vlog2.f32 %v4320_v59  ;;  %v4326_v63 = vand.u32 2147483647, %v7050_v48  ;;  %vm4152_vm8 = vcmp.ne.f32.partialorder %v7985_v58, %v7985_v58 }
 0x232   : > { %v4329_v56 = vadd.f32 1.0, %v7052_v14  ;;  %v4235_v25 = vmul.f32 1.442695, %v4205_v43  ;;  %v4332_v12 = vmul.f32 -0.5, %v7052_v14  ;;  %v4324_v7 = vadd.f32 1.0, %v4323_v60 }
 0x233   : > { %7059 = vpow2.f32 %v4233_v39  ;;  %v4206_v47 = vsub.f32 0.0, %v4190_v50  ;;  %v4335_v1 = vand.u32 2147483647, %v7052_v14  ;;  %vm8182_vm6 = vcmp.lt.f32.partialorder %v4326_v63, 0.0004427343 }
 0x234   : > { %7061 = vlog2.f32 %v4329_v56  ;;  %v4333_v27 = vadd.f32 1.0, %v4332_v12  ;;  %v4325_v57 = vmul.f32 %v7050_v48, %v4324_v7  ;;  %vm4153_vm9 = vcmp.ne.f32.partialorder %v7992_v5, %v7992_v5 }
 0x235   : > { %7063 = vpow2.f32 %v4235_v25  ;;  %v4237_v19 = vmul.f32 1.442695, %v4206_v47  ;;  %vm8187_vm7 = vcmp.lt.f32.partialorder %v4335_v1, 0.0004427343  ;;  %v4138_v36 = vmax.f32 %v8003_v22, 0.0 }
 0x236   : > { %v4334_v15 = vmul.f32 %v7052_v14, %v4333_v27  ;;  %vm4154_vm11 = vcmp.ne.f32.partialorder %v8003_v22, %v8003_v22  ;;  %v4139_v59 = vmax.f32 %v8008_v31, 0.0  ;;  %vm4155_vm13 = vcmp.ne.f32.partialorder %v8008_v31, %v8008_v31 }
 0x237   : > { %v4140_v12 = vmax.f32 %v8139_v28, 0.0  ;;  %vm4156_vm0 = vcmp.ne.f32.partialorder %v8139_v28, %v8139_v28  ;;  %vm4157_vm1 = vcmp.ne.f32.partialorder %v8148_v44, %v8148_v44  ;;  %vm4158_vm4 = vcmp.ne.f32.partialorder %v8178_v55, %v8178_v55 }
 0x238   : > { %v7054_v2 = vpop.eup %7053 }
 0x239   : > { %v4338_v16 = vadd.f32 1.0, %v7054_v2  ;;  %v7056_v0 = vpop.eup %7055  ;;  %v4341_v11 = vmul.f32 -0.5, %v7054_v2  ;;  %v4344_v40 = vand.u32 2147483647, %v7054_v2 }
 0x23a   : > { %v4347_v6 = vadd.f32 1.0, %v7056_v0  ;;  %v4350_v23 = vmul.f32 -0.5, %v7056_v0  ;;  %v4353_v51 = vand.u32 2147483647, %v7056_v0 }
 0x23b   : > { %7065 = vlog2.f32 %v4338_v16  ;;  %v7058_v20 = vpop.eup %7057  ;;  %v4342_v34 = vadd.f32 1.0, %v4341_v11  ;;  %vm4345_vm10 = vcmp.lt.f32.partialorder %v4344_v40, 0.0004427343 }
 0x23c   : > { %7067 = vpow2.f32 %v4237_v19  ;;  %v4322_v21 = vmul.f32 0.6931472, %v7058_v20  ;;  %v4351_v53 = vadd.f32 1.0, %v4350_v23  ;;  %vm8209_vm12 = vcmp.lt.f32.partialorder %v4353_v51, 0.0004427343 }
 0x23d   : > { %v7060_v35 = vpop.eup %7059  ;;  %7069 = vlog2.f32 %v4347_v6  ;;  %v4343_v33 = vmul.f32 %v7054_v2, %v4342_v34  ;;  %v4141_v19 = vmax.f32 %v8148_v44, 0.0 }
 0x23e   : > { %v7062_v9 = vpop.eup %7061  ;;  %v4356_v13 = vadd.f32 1.0, %v7060_v35  ;;  %v4328_v29 = vsel %vm8182_vm6, %v4325_v57, %v4322_v21  ;;  %v4359_v18 = vmul.f32 -0.5, %v7060_v35  ;;  %v4352_v48 = vmul.f32 %v7056_v0, %v4351_v53 }
 0x23f   : > { %v7064_v8 = vpop.eup %7063  ;;  %v4331_v30 = vmul.f32 0.6931472, %v7062_v9  ;;  %v4392_v17 = vadd.f32 %v4328_v29, %v4136_v3 }
 0x240   : > { %7071 = vlog2.f32 %v4356_v13  ;;  %v4365_v37 = vadd.f32 1.0, %v7064_v8  ;;  %v4368_v46 = vmul.f32 -0.5, %v7064_v8  ;;  %v4360_v54 = vadd.f32 1.0, %v4359_v18 }
 0x241   : > { %v4337_v38 = vsel %vm8187_vm7, %v4334_v15, %v4331_v30  ;;  %v4408_v45 = vsel %vm4152_vm8, %v7985_v58, %v4392_v17  ;;  %v4362_v58 = vand.u32 2147483647, %v7060_v35  ;;  %v4371_v39 = vand.u32 2147483647, %v7064_v8 }
 0x242   : > { %v4393_v41 = vadd.f32 %v4337_v38, %v4137_v24  ;;  %7073 = vlog2.f32 %v4365_v37  ;;  %4424 = vst.msk [vmem:[%s7179_s27 + $0x48] sm:$0xff] %vm4067_vm2, %v4408_v45  ;;  %v4369_v61 = vadd.f32 1.0, %v4368_v46  ;;  %v4361_v60 = vmul.f32 %v7060_v35, %v4360_v54 }
 0x243   : > { %vm4363_vm14 = vcmp.lt.f32.partialorder %v4362_v58, 0.0004427343  ;;  %vm4372_vm15 = vcmp.lt.f32.partialorder %v4371_v39, 0.0004427343 }
 0x244   : > { %v4409_v49 = vsel %vm4153_vm9, %v7992_v5, %v4393_v41  ;;  %v4370_v63 = vmul.f32 %v7064_v8, %v4369_v61 }
 0x245   : > { %v7066_v42 = vpop.eup %7065  ;;  %4425 = vst.msk [vmem:[%s7179_s27 + $0x50] sm:$0xff] %vm4067_vm2, %v4409_v49 }
 0x246   : > { %v7068_v52 = vpop.eup %7067  ;;  %v4340_v32 = vmul.f32 0.6931472, %v7066_v42 }
 0x247   : > { %v4374_v62 = vadd.f32 1.0, %v7068_v52  ;;  %v7070_v4 = vpop.eup %7069  ;;  %v4377_v50 = vmul.f32 -0.5, %v7068_v52  ;;  %v4380_v10 = vand.u32 2147483647, %v7068_v52 }
 0x248   : > { %v4346_v5 = vsel %vm4345_vm10, %v4343_v33, %v4340_v32  ;;  %v4349_v56 = vmul.f32 0.6931472, %v7070_v4 }
 0x249   : > { %v4394_v43 = vadd.f32 %v4346_v5, %v4138_v36  ;;  %7075 = vlog2.f32 %v4374_v62  ;;  %v4378_v57 = vadd.f32 1.0, %v4377_v50  ;;  %vm4381_vm3 = vcmp.lt.f32.partialorder %v4380_v10, 0.0004427343 }
 0x24a   : > { %v7072_v25 = vpop.eup %7071  ;;  %v4355_v47 = vsel %vm8209_vm12, %v4352_v48, %v4349_v56 }
 0x24b   : > { %v4410_v7 = vsel %vm4154_vm11, %v8003_v22, %v4394_v43  ;;  %v4358_v2 = vmul.f32 0.6931472, %v7072_v25  ;;  %v4395_v16 = vadd.f32 %v4355_v47, %v4139_v59  ;;  %v4379_v21 = vmul.f32 %v7068_v52, %v4378_v57 }
 0x24c   : > { %v7074_v27 = vpop.eup %7073  ;;  %4426 = vst.msk [vmem:[%s7179_s27 + $0x58] sm:$0xff] %vm4067_vm2, %v4410_v7 }
 0x24d   : > { %v4364_v1 = vsel %vm4363_vm14, %v4361_v60, %v4358_v2  ;;  %v4367_v0 = vmul.f32 0.6931472, %v7074_v27  ;;  %v4411_v22 = vsel %vm4155_vm13, %v8008_v31, %v4395_v16  ;;  %v4142_v31 = vmax.f32 %v8178_v55, 0.0 }
 0x24e   : > { %v4396_v3 = vadd.f32 %v4364_v1, %v4140_v12  ;;  %4427 = vst.msk [vmem:[%s7179_s27 + $0x60] sm:$0xff] %vm4067_vm2, %v4411_v22 }
 0x24f   : > { %v4373_v20 = vsel %vm4372_vm15, %v4370_v63, %v4367_v0 }
 0x250   : > { %v4412_v11 = vsel %vm4156_vm0, %v8139_v28, %v4396_v3  ;;  %v4397_v6 = vadd.f32 %v4373_v20, %v4141_v19 }
 0x251   : > { %4428 = vst.msk [vmem:[%s7179_s27 + $0x68] sm:$0xff] %vm4067_vm2, %v4412_v11 }
 0x252   : > { %v4413_v35 = vsel %vm4157_vm1, %v8148_v44, %v4397_v6 }
 0x253   : > { %v7076_v15 = vpop.eup %7075  ;;  %4429 = vst.msk [vmem:[%s7179_s27 + $0x70] sm:$0xff] %vm4067_vm2, %v4413_v35 }
 0x254   : > { %v4376_v9 = vmul.f32 0.6931472, %v7076_v15 }
 0x256   : > { %v4382_v24 = vsel %vm4381_vm3, %v4379_v21, %v4376_v9 }
 0x257   : > { %v4398_v26 = vadd.f32 %v4382_v24, %v4142_v31 }
 0x259   : > { %v4414_v28 = vsel %vm4158_vm4, %v8178_v55, %v4398_v26 }
 0x25a   : > { %4430 = vst.msk [vmem:[%s7179_s27 + $0x78] sm:$0xff] %vm4067_vm2, %v4414_v28 }
 0x25b PF: > { %s13_s16 = sadd.s32 1, %s7115_s16   ;;  %s8290_s12 = smov %s7107_s14 }
 0x25c   : > { %p10_p9 = scmp.ge.s32.totalorder %s13_s16, 78   ;;  %s8291_s13 = smov %s7111_s15 }
 0x25d   : > { %s8292_s14 = smov %s8295_s17  ;;  %s8293_s15 = smov %s8299_s18 }
 0x25e   :  { %12 = sbr.rel (!%p10_p9) target bundleno = 3 (0x3), region = 89 }

</bundles_post_ra>
